<compile_context>
chip_gen: v6e
topology: v6e:2x2x1
jax: 0.10.0
libtpu: 0.0.40
codegen_flags: <defaults>
</compile_context>

<pallas_src>
import numpy as np
import jax
import jax.numpy as jnp
from jax.experimental import pallas as pl
from jax.experimental.pallas import tpu as pltpu

NFILTERS = 128          # channels == one full 128-lane vreg tile
TIMESTEP = 1.0          # module default
EPS = 1e-5              # nn.BatchNorm2d default eps
VMEM_LIMIT = 32 * 1024 * 1024


# --------------------------------------------------------------------------------------
# shared conv helper (runs inside the kernels)
# --------------------------------------------------------------------------------------
def _conv3x3_im2col(x_f32, w_stk_ref):
    """3x3 conv (stride 1, pad 1, no bias) as ONE full-im2col MXU matmul.

    x_f32:     (1, H, W, Cin) float32 activation (NHWC: C on lanes, W on sublanes).
    w_stk_ref: (9*Cin, Cout) bf16 ref; rows [(3*kh+kw)*Cin : +Cin] hold w[kh, kw, :, :].
    returns:   (1, H, W, Cout) float32.
    """
    _, H, W, Cin = x_f32.shape
    w_stk = w_stk_ref[...]
    Cout = w_stk.shape[1]

    # kw = 0 / 2 taps: W shifts (sublane axis) via positive-only rolls; zero the
    # wrapped column with a tiny (1,1,W,1) iota mask (no full-size int32 tensor).
    w_idx = jax.lax.broadcasted_iota(jnp.int32, (1, 1, W, 1), 2)
    x_left = jnp.where(w_idx == 0, 0.0,
                       pltpu.roll(x_f32, shift=1, axis=2))          # x[.., w-1, :]
    x_right = jnp.where(w_idx == W - 1, 0.0,
                        pltpu.roll(x_f32, shift=W - 1, axis=2))     # x[.., w+1, :]

    # Stack the kw taps along channels (each Cin block is lane-aligned), cast to bf16.
    xw = jnp.concatenate([x_left, x_f32, x_right], axis=-1).astype(jnp.bfloat16)  # (1,H,W,3Cin)

    # kh taps: one zero row of H padding on each side (H is untiled -> cheap slices).
    # Resulting LHS channel block index is exactly 3*kh + kw, matching the weight rows.
    zrow = jnp.zeros((1, 1, W, 3 * Cin), jnp.bfloat16)
    xp = jnp.concatenate([zrow, xw, zrow], axis=1)                                # (1,H+2,W,3Cin)
    lhs = jnp.concatenate([xp[:, 0:H], xp[:, 1:H + 1], xp[:, 2:H + 2]], axis=-1)  # (1,H,W,9Cin)

    y = jnp.dot(lhs.reshape(H * W, 9 * Cin), w_stk,
                preferred_element_type=jnp.float32)                               # (H*W, Cout)
    return y.reshape(1, H, W, Cout)


# --------------------------------------------------------------------------------------
# phase 1: conv1 + per-sample BN partial statistics (grid parallel over N)
# --------------------------------------------------------------------------------------
def conv1_stats_kernel(x_ref, w1_ref, y1_ref, sum_ref, ssq_ref):
    _, H, W, C = x_ref.shape
    y1 = _conv3x3_im2col(x_ref[...], w1_ref)             # (1, H, W, C) f32
    y1_ref[...] = y1.astype(y1_ref.dtype)                 # bf16 intermediate to HBM
    # single-pass stats: per-channel sum and sum-of-squares for this sample (f32)
    y2d = y1.reshape(H * W, C)
    sum_ref[...] = jnp.sum(y2d, axis=0, keepdims=True).reshape(1, 1, C)
    ssq_ref[...] = jnp.sum(y2d * y2d, axis=0, keepdims=True).reshape(1, 1, C)


# --------------------------------------------------------------------------------------
# phase 2: fold BN stats + relu + conv2 + residual (grid parallel over N)
# --------------------------------------------------------------------------------------
def bn_relu_conv2_kernel(psum_ref, psq_ref, gamma_ref, beta_ref,
                         y1_ref, x_ref, w2_ref, out_ref, z_ref):
    _, H, W, C = x_ref.shape
    n_total = psum_ref.shape[0]
    cnt = float(n_total * H * W)

    # Fold the tiny (N, C) partials into per-channel scale/shift in-kernel
    # (training-mode BN: biased batch variance, clamped against cancellation).
    mean = jnp.sum(psum_ref[...], axis=0) / cnt                      # (1, C)
    var = jnp.maximum(jnp.sum(psq_ref[...], axis=0) / cnt - mean * mean, 0.0)
    scale = gamma_ref[...] * jax.lax.rsqrt(var + EPS)                # (1, C)
    shift = beta_ref[...] - mean * scale

    a = jnp.maximum(y1_ref[...].astype(jnp.float32) * scale.reshape(1, 1, 1, C)
                    + shift.reshape(1, 1, 1, C), 0.0)                # BN + relu, f32
    z = _conv3x3_im2col(a, w2_ref)                                   # (1, H, W, C) f32
    z_ref[...] = z
    out_ref[...] = x_ref[...] + TIMESTEP * z


# --------------------------------------------------------------------------------------
# wrapper
# --------------------------------------------------------------------------------------
def first_res_block(x, params):
    """x: (N, H, W, C) f32, NHWC.  Returns (x + timestep*z, z) exactly like the module."""
    N, H, W, C = x.shape
    assert C == NFILTERS, "kernel assumes C == 128 (one full lane tile)"
    assert W % 8 == 0, "W must be a multiple of the f32 sublane packing (8)"
    w1, w2 = params["w1_stk"], params["w2_stk"]
    gamma, beta = params["gamma"], params["beta"]

    img_spec = pl.BlockSpec((1, H, W, C), lambda n: (n, 0, 0, 0))
    stat_out_spec = pl.BlockSpec((1, 1, C), lambda n: (n, 0, 0))
    stat_in_spec = pl.BlockSpec((N, 1, C), lambda n: (0, 0, 0))
    w_spec = pl.BlockSpec((9 * C, C), lambda n: (0, 0))
    vec_spec = pl.BlockSpec((1, C), lambda n: (0, 0))
    cparams = pltpu.CompilerParams(dimension_semantics=("parallel",),
                                   vmem_limit_bytes=VMEM_LIMIT)

    y1, psum, psq = pl.pallas_call(
        conv1_stats_kernel,
        out_shape=[jax.ShapeDtypeStruct((N, H, W, C), jnp.bfloat16),
                   jax.ShapeDtypeStruct((N, 1, C), jnp.float32),
                   jax.ShapeDtypeStruct((N, 1, C), jnp.float32)],
        grid=(N,),
        in_specs=[img_spec, w_spec],
        out_specs=[img_spec, stat_out_spec, stat_out_spec],
        compiler_params=cparams,
    )(x, w1)

    out, z = pl.pallas_call(
        bn_relu_conv2_kernel,
        out_shape=[jax.ShapeDtypeStruct((N, H, W, C), jnp.float32),
                   jax.ShapeDtypeStruct((N, H, W, C), jnp.float32)],
        grid=(N,),
        in_specs=[stat_in_spec, stat_in_spec, vec_spec, vec_spec,
                  img_spec, img_spec, w_spec],
        out_specs=[img_spec, img_spec],
        compiler_params=cparams,
    )(psum, psq, gamma, beta, y1, x, w2)
    return out, z


def prepare_params(w1_hwio, w2_hwio, gamma, beta):
    """One-time parameter prep: reshape each HWIO 3x3 weight to (9*Cin, Cout) so row
    block (3*kh+kw) holds tap (kh,kw); cast to bf16 for the MXU."""
    def stack(w):
        kh, kw, cin, cout = w.shape
        return w.reshape(kh * kw * cin, cout).astype(jnp.bfloat16)
    return dict(w1_stk=stack(w1_hwio), w2_stk=stack(w2_hwio),
                gamma=gamma.reshape(1, -1).astype(jnp.float32),
                beta=beta.reshape(1, -1).astype(jnp.float32))


# --------------------------------------------------------------------------------------
# pure-JAX reference mirroring the PyTorch forward (training-mode BN)
# --------------------------------------------------------------------------------------
def first_res_block_ref(x, w1, w2, gamma, beta):
    dn = ("NHWC", "HWIO", "NHWC")
    hi = jax.lax.Precision.HIGHEST
    z1 = jax.lax.conv_general_dilated(x, w1, (1, 1), ((1, 1), (1, 1)),
                                      dimension_numbers=dn, precision=hi)
    m = jnp.mean(z1, axis=(0, 1, 2), keepdims=True)
    v = jnp.mean((z1 - m) ** 2, axis=(0, 1, 2), keepdims=True)
    a = jax.nn.relu((z1 - m) * jax.lax.rsqrt(v + EPS) * gamma.reshape(1, 1, 1, -1)
                    + beta.reshape(1, 1, 1, -1))
    z = jax.lax.conv_general_dilated(a, w2, (1, 1), ((1, 1), (1, 1)),
                                     dimension_numbers=dn, precision=hi)
    return x + TIMESTEP * z, z


if __name__ == "__main__":
    key = jax.random.PRNGKey(0)
    kx, k1, k2, kg, kb = jax.random.split(key, 5)
    N, H, W, C = 2, 16, 16, NFILTERS
    x = jax.random.normal(kx, (N, H, W, C), jnp.float32)           # NHWC end-to-end
    w1 = 0.1 * jax.random.normal(k1, (3, 3, C, C), jnp.float32)    # HWIO
    w2 = 0.1 * jax.random.normal(k2, (3, 3, C, C), jnp.float32)
    gamma = 1.0 + 0.1 * jax.random.normal(kg, (C,), jnp.float32)
    beta = 0.1 * jax.random.normal(kb, (C,), jnp.float32)

    params = prepare_params(w1, w2, gamma, beta)
    fwd = jax.jit(first_res_block)
    out, z = jax.block_until_ready(fwd(x, params))

    out_ref, z_ref = first_res_block_ref(x, w1, w2, gamma, beta)
    # Tolerance sized for bf16 MXU inputs + the bf16 y1 intermediate over two K=1152
    # contractions; accumulation and all BN/residual math are f32.  (Users expecting
    # PyTorch-exact f32 outputs should note the deliberate bf16 matmul inputs.)
    np.testing.assert_allclose(np.asarray(z), np.asarray(z_ref), rtol=2e-2, atol=1.5e-1)
    np.testing.assert_allclose(np.asarray(out), np.asarray(out_ref), rtol=2e-2, atol=1.5e-1)
    print("KERNEL_OK")
</pallas_src>

<mosaic_0001>
module attributes {stable_mosaic.version = 11 : i64} {
  func.func @conv1_stats_kernel(%arg0: i32, %arg1: memref<1x16x16x128xf32, #tpu.memory_space<vmem>>, %arg2: memref<1152x128xbf16, #tpu.memory_space<vmem>>, %arg3: memref<1x16x16x128xbf16, #tpu.memory_space<vmem>>, %arg4: memref<1x1x128xf32, #tpu.memory_space<vmem>>, %arg5: memref<1x1x128xf32, #tpu.memory_space<vmem>>) attributes {dimension_semantics = [#tpu.dimension_semantics<parallel>], iteration_bounds = array<i64: 2>, scalar_prefetch = 0 : i64, scratch_operands = 0 : i64, tpu.core_type = #tpu.core_type<tc>, window_params = [{transform_indices = @transform_0, window_bounds = array<i64: 1, 16, 16, 128>}, {pipeline_mode = #tpu.pipeline_mode<synchronous>, transform_indices = @transform_1, window_bounds = array<i64: 1152, 128>}, {transform_indices = @transform_2, window_bounds = array<i64: 1, 16, 16, 128>}, {transform_indices = @transform_3, window_bounds = array<i64: 1, 1, 128>}, {transform_indices = @transform_4, window_bounds = array<i64: 1, 1, 128>}]} {
    %c0 = arith.constant 0 : index
    %c0_0 = arith.constant 0 : index
    %c0_1 = arith.constant 0 : index
    %c0_2 = arith.constant 0 : index
    %0 = vector.load %arg1[%c0, %c0_0, %c0_1, %c0_2] : memref<1x16x16x128xf32, #tpu.memory_space<vmem>>, vector<1x16x16x128xf32>
    %c0_3 = arith.constant 0 : index
    %c0_4 = arith.constant 0 : index
    %1 = vector.load %arg2[%c0_3, %c0_4] : memref<1152x128xbf16, #tpu.memory_space<vmem>>, vector<1152x128xbf16>
    %2 = tpu.iota {dimensions = array<i32: 2>} : vector<1x1x16x1xi32>
    %c0_i32 = arith.constant 0 : i32
    %3 = vector.broadcast %c0_i32 : i32 to vector<1x1x16x1xi32>
    %4 = arith.cmpi eq, %2, %3 : vector<1x1x16x1xi32>
    %c1_i32 = arith.constant 1 : i32
    %5 = tpu.dynamic_rotate %0 by %c1_i32 dim 2 : vector<1x16x16x128xf32>, i32 -> vector<1x16x16x128xf32>
    %cst = arith.constant 0.000000e+00 : f32
    %6 = vector.shape_cast %4 : vector<1x1x16x1xi1> to vector<1x1x16x1xi1>
    %7 = vector.broadcast %6 : vector<1x1x16x1xi1> to vector<1x16x16x128xi1>
    %8 = vector.broadcast %cst : f32 to vector<1x16x16x128xf32>
    %9 = arith.select %7, %8, %5 : vector<1x16x16x128xi1>, vector<1x16x16x128xf32>
    %c15_i32 = arith.constant 15 : i32
    %10 = vector.broadcast %c15_i32 : i32 to vector<1x1x16x1xi32>
    %11 = arith.cmpi eq, %2, %10 : vector<1x1x16x1xi32>
    %c15_i32_5 = arith.constant 15 : i32
    %12 = tpu.dynamic_rotate %0 by %c15_i32_5 dim 2 : vector<1x16x16x128xf32>, i32 -> vector<1x16x16x128xf32>
    %cst_6 = arith.constant 0.000000e+00 : f32
    %13 = vector.shape_cast %11 : vector<1x1x16x1xi1> to vector<1x1x16x1xi1>
    %14 = vector.broadcast %13 : vector<1x1x16x1xi1> to vector<1x16x16x128xi1>
    %15 = vector.broadcast %cst_6 : f32 to vector<1x16x16x128xf32>
    %16 = arith.select %14, %15, %12 : vector<1x16x16x128xi1>, vector<1x16x16x128xf32>
    %17 = tpu.concatenate %9, %0, %16 in 3 : vector<1x16x16x128xf32>, vector<1x16x16x128xf32>, vector<1x16x16x128xf32> -> vector<1x16x16x384xf32>
    %18 = arith.truncf %17 : vector<1x16x16x384xf32> to vector<1x16x16x384xbf16>
    %cst_7 = arith.constant 0.000000e+00 : bf16
    %19 = vector.broadcast %cst_7 : bf16 to vector<1x1x16x384xbf16>
    %20 = tpu.concatenate %19, %18, %19 in 1 : vector<1x1x16x384xbf16>, vector<1x16x16x384xbf16>, vector<1x1x16x384xbf16> -> vector<1x18x16x384xbf16>
    %21 = vector.extract_strided_slice %20 {offsets = [0, 0, 0, 0], sizes = [1, 16, 16, 384], strides = [1, 1, 1, 1]} : vector<1x18x16x384xbf16> to vector<1x16x16x384xbf16>
    %22 = vector.extract_strided_slice %20 {offsets = [0, 1, 0, 0], sizes = [1, 16, 16, 384], strides = [1, 1, 1, 1]} : vector<1x18x16x384xbf16> to vector<1x16x16x384xbf16>
    %23 = vector.extract_strided_slice %20 {offsets = [0, 2, 0, 0], sizes = [1, 16, 16, 384], strides = [1, 1, 1, 1]} : vector<1x18x16x384xbf16> to vector<1x16x16x384xbf16>
    %24 = tpu.concatenate %21, %22, %23 in 3 : vector<1x16x16x384xbf16>, vector<1x16x16x384xbf16>, vector<1x16x16x384xbf16> -> vector<1x16x16x1152xbf16>
    %25 = vector.shape_cast %24 : vector<1x16x16x1152xbf16> to vector<256x1152xbf16>
    %cst_8 = arith.constant dense<0.000000e+00> : vector<256x128xf32>
    %26 = tpu.matmul %25, %1, %cst_8 {dimension_numbers = #tpu.dot_dimension_numbers<[1], [0], [0], [1], [0, 0, 1, 1], [], []>} : vector<256x1152xbf16>, vector<1152x128xbf16>, vector<256x128xf32> -> vector<256x128xf32>
    %27 = vector.shape_cast %26 : vector<256x128xf32> to vector<1x16x16x128xf32>
    %28 = arith.truncf %27 : vector<1x16x16x128xf32> to vector<1x16x16x128xbf16>
    %c0_9 = arith.constant 0 : index
    %c0_10 = arith.constant 0 : index
    %c0_11 = arith.constant 0 : index
    %c0_12 = arith.constant 0 : index
    %29 = vector.load %arg3[%c0_9, %c0_10, %c0_11, %c0_12] : memref<1x16x16x128xbf16, #tpu.memory_space<vmem>>, vector<1x16x16x128xbf16>
    tpu.vector_store %arg3[%c0_9, %c0_10, %c0_11, %c0_12], %28 {strides = array<i32>} : memref<1x16x16x128xbf16, #tpu.memory_space<vmem>>, vector<1x16x16x128xbf16>,
    %30 = vector.shape_cast %27 : vector<1x16x16x128xf32> to vector<256x128xf32>
    %cst_13 = arith.constant dense<0.000000e+00> : vector<128xf32>
    %31 = vector.multi_reduction <add>, %30, %cst_13 [0] : vector<256x128xf32> to vector<128xf32>
    %32 = vector.shape_cast %31 : vector<128xf32> to vector<1x128xf32>
    %33 = vector.shape_cast %32 : vector<1x128xf32> to vector<1x1x128xf32>
    %c0_14 = arith.constant 0 : index
    %c0_15 = arith.constant 0 : index
    %c0_16 = arith.constant 0 : index
    %34 = vector.load %arg4[%c0_14, %c0_15, %c0_16] : memref<1x1x128xf32, #tpu.memory_space<vmem>>, vector<1x1x128xf32>
    tpu.vector_store %arg4[%c0_14, %c0_15, %c0_16], %33 {strides = array<i32>} : memref<1x1x128xf32, #tpu.memory_space<vmem>>, vector<1x1x128xf32>,
    %35 = arith.mulf %30, %30 : vector<256x128xf32>
    %cst_17 = arith.constant dense<0.000000e+00> : vector<128xf32>
    %36 = vector.multi_reduction <add>, %35, %cst_17 [0] : vector<256x128xf32> to vector<128xf32>
    %37 = vector.shape_cast %36 : vector<128xf32> to vector<1x128xf32>
    %38 = vector.shape_cast %37 : vector<1x128xf32> to vector<1x1x128xf32>
    %c0_18 = arith.constant 0 : index
    %c0_19 = arith.constant 0 : index
    %c0_20 = arith.constant 0 : index
    %39 = vector.load %arg5[%c0_18, %c0_19, %c0_20] : memref<1x1x128xf32, #tpu.memory_space<vmem>>, vector<1x1x128xf32>
    tpu.vector_store %arg5[%c0_18, %c0_19, %c0_20], %38 {strides = array<i32>} : memref<1x1x128xf32, #tpu.memory_space<vmem>>, vector<1x1x128xf32>,
    return
  }
  func.func @transform_0(%arg0: i32) -> (i32, i32, i32, i32) {
    %c0_i32 = arith.constant 0 : i32
    %c0_i32_0 = arith.constant 0 : i32
    %c0_i32_1 = arith.constant 0 : i32
    %c0_i32_2 = arith.constant 0 : i32
    return %arg0, %c0_i32, %c0_i32_0, %c0_i32_1 : i32, i32, i32, i32
  }
  func.func @transform_1(%arg0: i32) -> (i32, i32) {
    %c0_i32 = arith.constant 0 : i32
    %c0_i32_0 = arith.constant 0 : i32
    %c0_i32_1 = arith.constant 0 : i32
    return %c0_i32, %c0_i32_0 : i32, i32
  }
  func.func @transform_2(%arg0: i32) -> (i32, i32, i32, i32) {
    %c0_i32 = arith.constant 0 : i32
    %c0_i32_0 = arith.constant 0 : i32
    %c0_i32_1 = arith.constant 0 : i32
    %c0_i32_2 = arith.constant 0 : i32
    return %arg0, %c0_i32, %c0_i32_0, %c0_i32_1 : i32, i32, i32, i32
  }
  func.func @transform_3(%arg0: i32) -> (i32, i32, i32) {
    %c0_i32 = arith.constant 0 : i32
    %c0_i32_0 = arith.constant 0 : i32
    %c0_i32_1 = arith.constant 0 : i32
    return %arg0, %c0_i32, %c0_i32_0 : i32, i32, i32
  }
  func.func @transform_4(%arg0: i32) -> (i32, i32, i32) {
    %c0_i32 = arith.constant 0 : i32
    %c0_i32_0 = arith.constant 0 : i32
    %c0_i32_1 = arith.constant 0 : i32
    return %arg0, %c0_i32, %c0_i32_0 : i32, i32, i32
  }
}

module attributes {stable_mosaic.version = 11 : i64} {
  func.func @bn_relu_conv2_kernel(%arg0: i32, %arg1: memref<2x1x128xf32, #tpu.memory_space<vmem>>, %arg2: memref<2x1x128xf32, #tpu.memory_space<vmem>>, %arg3: memref<1x128xf32, #tpu.memory_space<vmem>>, %arg4: memref<1x128xf32, #tpu.memory_space<vmem>>, %arg5: memref<1x16x16x128xbf16, #tpu.memory_space<vmem>>, %arg6: memref<1x16x16x128xf32, #tpu.memory_space<vmem>>, %arg7: memref<1152x128xbf16, #tpu.memory_space<vmem>>, %arg8: memref<1x16x16x128xf32, #tpu.memory_space<vmem>>, %arg9: memref<1x16x16x128xf32, #tpu.memory_space<vmem>>) attributes {dimension_semantics = [#tpu.dimension_semantics<parallel>], iteration_bounds = array<i64: 2>, scalar_prefetch = 0 : i64, scratch_operands = 0 : i64, tpu.core_type = #tpu.core_type<tc>, window_params = [{pipeline_mode = #tpu.pipeline_mode<synchronous>, transform_indices = @transform_0, window_bounds = array<i64: 2, 1, 128>}, {pipeline_mode = #tpu.pipeline_mode<synchronous>, transform_indices = @transform_1, window_bounds = array<i64: 2, 1, 128>}, {pipeline_mode = #tpu.pipeline_mode<synchronous>, transform_indices = @transform_2, window_bounds = array<i64: 1, 128>}, {pipeline_mode = #tpu.pipeline_mode<synchronous>, transform_indices = @transform_3, window_bounds = array<i64: 1, 128>}, {transform_indices = @transform_4, window_bounds = array<i64: 1, 16, 16, 128>}, {transform_indices = @transform_5, window_bounds = array<i64: 1, 16, 16, 128>}, {pipeline_mode = #tpu.pipeline_mode<synchronous>, transform_indices = @transform_6, window_bounds = array<i64: 1152, 128>}, {transform_indices = @transform_7, window_bounds = array<i64: 1, 16, 16, 128>}, {transform_indices = @transform_8, window_bounds = array<i64: 1, 16, 16, 128>}]} {
    %c0 = arith.constant 0 : index
    %c0_0 = arith.constant 0 : index
    %c0_1 = arith.constant 0 : index
    %0 = vector.load %arg1[%c0, %c0_0, %c0_1] : memref<2x1x128xf32, #tpu.memory_space<vmem>>, vector<2x1x128xf32>
    %cst = arith.constant dense<0.000000e+00> : vector<1x128xf32>
    %1 = vector.multi_reduction <add>, %0, %cst [0] : vector<2x1x128xf32> to vector<1x128xf32>
    %cst_2 = arith.constant 5.120000e+02 : f32
    %2 = vector.broadcast %cst_2 : f32 to vector<1x128xf32>
    %3 = arith.divf %1, %2 : vector<1x128xf32>
    %c0_3 = arith.constant 0 : index
    %c0_4 = arith.constant 0 : index
    %c0_5 = arith.constant 0 : index
    %4 = vector.load %arg2[%c0_3, %c0_4, %c0_5] : memref<2x1x128xf32, #tpu.memory_space<vmem>>, vector<2x1x128xf32>
    %cst_6 = arith.constant dense<0.000000e+00> : vector<1x128xf32>
    %5 = vector.multi_reduction <add>, %4, %cst_6 [0] : vector<2x1x128xf32> to vector<1x128xf32>
    %cst_7 = arith.constant 5.120000e+02 : f32
    %6 = vector.broadcast %cst_7 : f32 to vector<1x128xf32>
    %7 = arith.divf %5, %6 : vector<1x128xf32>
    %8 = arith.mulf %3, %3 : vector<1x128xf32>
    %9 = arith.subf %7, %8 : vector<1x128xf32>
    %cst_8 = arith.constant 0.000000e+00 : f32
    %10 = vector.broadcast %cst_8 : f32 to vector<1x128xf32>
    %11 = arith.maximumf %9, %10 : vector<1x128xf32>
    %c0_9 = arith.constant 0 : index
    %c0_10 = arith.constant 0 : index
    %12 = vector.load %arg3[%c0_9, %c0_10] : memref<1x128xf32, #tpu.memory_space<vmem>>, vector<1x128xf32>
    %cst_11 = arith.constant 9.99999974E-6 : f32
    %13 = vector.broadcast %cst_11 : f32 to vector<1x128xf32>
    %14 = arith.addf %11, %13 : vector<1x128xf32>
    %15 = math.rsqrt %14 : vector<1x128xf32>
    %16 = arith.mulf %12, %15 : vector<1x128xf32>
    %c0_12 = arith.constant 0 : index
    %c0_13 = arith.constant 0 : index
    %17 = vector.load %arg4[%c0_12, %c0_13] : memref<1x128xf32, #tpu.memory_space<vmem>>, vector<1x128xf32>
    %18 = arith.mulf %3, %16 : vector<1x128xf32>
    %19 = arith.subf %17, %18 : vector<1x128xf32>
    %c0_14 = arith.constant 0 : index
    %c0_15 = arith.constant 0 : index
    %c0_16 = arith.constant 0 : index
    %c0_17 = arith.constant 0 : index
    %20 = vector.load %arg5[%c0_14, %c0_15, %c0_16, %c0_17] : memref<1x16x16x128xbf16, #tpu.memory_space<vmem>>, vector<1x16x16x128xbf16>
    %21 = arith.extf %20 : vector<1x16x16x128xbf16> to vector<1x16x16x128xf32>
    %22 = vector.shape_cast %16 : vector<1x128xf32> to vector<1x1x1x128xf32>
    %23 = vector.broadcast %22 : vector<1x1x1x128xf32> to vector<1x16x16x128xf32>
    %24 = arith.mulf %21, %23 : vector<1x16x16x128xf32>
    %25 = vector.shape_cast %19 : vector<1x128xf32> to vector<1x1x1x128xf32>
    %26 = vector.broadcast %25 : vector<1x1x1x128xf32> to vector<1x16x16x128xf32>
    %27 = arith.addf %24, %26 : vector<1x16x16x128xf32>
    %cst_18 = arith.constant 0.000000e+00 : f32
    %28 = vector.broadcast %cst_18 : f32 to vector<1x16x16x128xf32>
    %29 = arith.maximumf %27, %28 : vector<1x16x16x128xf32>
    %c0_19 = arith.constant 0 : index
    %c0_20 = arith.constant 0 : index
    %30 = vector.load %arg7[%c0_19, %c0_20] : memref<1152x128xbf16, #tpu.memory_space<vmem>>, vector<1152x128xbf16>
    %31 = tpu.iota {dimensions = array<i32: 2>} : vector<1x1x16x1xi32>
    %c0_i32 = arith.constant 0 : i32
    %32 = vector.broadcast %c0_i32 : i32 to vector<1x1x16x1xi32>
    %33 = arith.cmpi eq, %31, %32 : vector<1x1x16x1xi32>
    %c1_i32 = arith.constant 1 : i32
    %34 = tpu.dynamic_rotate %29 by %c1_i32 dim 2 : vector<1x16x16x128xf32>, i32 -> vector<1x16x16x128xf32>
    %cst_21 = arith.constant 0.000000e+00 : f32
    %35 = vector.shape_cast %33 : vector<1x1x16x1xi1> to vector<1x1x16x1xi1>
    %36 = vector.broadcast %35 : vector<1x1x16x1xi1> to vector<1x16x16x128xi1>
    %37 = vector.broadcast %cst_21 : f32 to vector<1x16x16x128xf32>
    %38 = arith.select %36, %37, %34 : vector<1x16x16x128xi1>, vector<1x16x16x128xf32>
    %c15_i32 = arith.constant 15 : i32
    %39 = vector.broadcast %c15_i32 : i32 to vector<1x1x16x1xi32>
    %40 = arith.cmpi eq, %31, %39 : vector<1x1x16x1xi32>
    %c15_i32_22 = arith.constant 15 : i32
    %41 = tpu.dynamic_rotate %29 by %c15_i32_22 dim 2 : vector<1x16x16x128xf32>, i32 -> vector<1x16x16x128xf32>
    %cst_23 = arith.constant 0.000000e+00 : f32
    %42 = vector.shape_cast %40 : vector<1x1x16x1xi1> to vector<1x1x16x1xi1>
    %43 = vector.broadcast %42 : vector<1x1x16x1xi1> to vector<1x16x16x128xi1>
    %44 = vector.broadcast %cst_23 : f32 to vector<1x16x16x128xf32>
    %45 = arith.select %43, %44, %41 : vector<1x16x16x128xi1>, vector<1x16x16x128xf32>
    %46 = tpu.concatenate %38, %29, %45 in 3 : vector<1x16x16x128xf32>, vector<1x16x16x128xf32>, vector<1x16x16x128xf32> -> vector<1x16x16x384xf32>
    %47 = arith.truncf %46 : vector<1x16x16x384xf32> to vector<1x16x16x384xbf16>
    %cst_24 = arith.constant 0.000000e+00 : bf16
    %48 = vector.broadcast %cst_24 : bf16 to vector<1x1x16x384xbf16>
    %49 = tpu.concatenate %48, %47, %48 in 1 : vector<1x1x16x384xbf16>, vector<1x16x16x384xbf16>, vector<1x1x16x384xbf16> -> vector<1x18x16x384xbf16>
    %50 = vector.extract_strided_slice %49 {offsets = [0, 0, 0, 0], sizes = [1, 16, 16, 384], strides = [1, 1, 1, 1]} : vector<1x18x16x384xbf16> to vector<1x16x16x384xbf16>
    %51 = vector.extract_strided_slice %49 {offsets = [0, 1, 0, 0], sizes = [1, 16, 16, 384], strides = [1, 1, 1, 1]} : vector<1x18x16x384xbf16> to vector<1x16x16x384xbf16>
    %52 = vector.extract_strided_slice %49 {offsets = [0, 2, 0, 0], sizes = [1, 16, 16, 384], strides = [1, 1, 1, 1]} : vector<1x18x16x384xbf16> to vector<1x16x16x384xbf16>
    %53 = tpu.concatenate %50, %51, %52 in 3 : vector<1x16x16x384xbf16>, vector<1x16x16x384xbf16>, vector<1x16x16x384xbf16> -> vector<1x16x16x1152xbf16>
    %54 = vector.shape_cast %53 : vector<1x16x16x1152xbf16> to vector<256x1152xbf16>
    %cst_25 = arith.constant dense<0.000000e+00> : vector<256x128xf32>
    %55 = tpu.matmul %54, %30, %cst_25 {dimension_numbers = #tpu.dot_dimension_numbers<[1], [0], [0], [1], [0, 0, 1, 1], [], []>} : vector<256x1152xbf16>, vector<1152x128xbf16>, vector<256x128xf32> -> vector<256x128xf32>
    %56 = vector.shape_cast %55 : vector<256x128xf32> to vector<1x16x16x128xf32>
    %c0_26 = arith.constant 0 : index
    %c0_27 = arith.constant 0 : index
    %c0_28 = arith.constant 0 : index
    %c0_29 = arith.constant 0 : index
    %57 = vector.load %arg9[%c0_26, %c0_27, %c0_28, %c0_29] : memref<1x16x16x128xf32, #tpu.memory_space<vmem>>, vector<1x16x16x128xf32>
    tpu.vector_store %arg9[%c0_26, %c0_27, %c0_28, %c0_29], %56 {strides = array<i32>} : memref<1x16x16x128xf32, #tpu.memory_space<vmem>>, vector<1x16x16x128xf32>,
    %c0_30 = arith.constant 0 : index
    %c0_31 = arith.constant 0 : index
    %c0_32 = arith.constant 0 : index
    %c0_33 = arith.constant 0 : index
    %58 = vector.load %arg6[%c0_30, %c0_31, %c0_32, %c0_33] : memref<1x16x16x128xf32, #tpu.memory_space<vmem>>, vector<1x16x16x128xf32>
    %cst_34 = arith.constant 1.000000e+00 : f32
    %59 = vector.broadcast %cst_34 : f32 to vector<1x16x16x128xf32>
    %60 = arith.mulf %59, %56 : vector<1x16x16x128xf32>
    %61 = arith.addf %58, %60 : vector<1x16x16x128xf32>
    %c0_35 = arith.constant 0 : index
    %c0_36 = arith.constant 0 : index
    %c0_37 = arith.constant 0 : index
    %c0_38 = arith.constant 0 : index
    %62 = vector.load %arg8[%c0_35, %c0_36, %c0_37, %c0_38] : memref<1x16x16x128xf32, #tpu.memory_space<vmem>>, vector<1x16x16x128xf32>
    tpu.vector_store %arg8[%c0_35, %c0_36, %c0_37, %c0_38], %61 {strides = array<i32>} : memref<1x16x16x128xf32, #tpu.memory_space<vmem>>, vector<1x16x16x128xf32>,
    return
  }
  func.func @transform_0(%arg0: i32) -> (i32, i32, i32) {
    %c0_i32 = arith.constant 0 : i32
    %c0_i32_0 = arith.constant 0 : i32
    %c0_i32_1 = arith.constant 0 : i32
    %c0_i32_2 = arith.constant 0 : i32
    return %c0_i32, %c0_i32_0, %c0_i32_1 : i32, i32, i32
  }
  func.func @transform_1(%arg0: i32) -> (i32, i32, i32) {
    %c0_i32 = arith.constant 0 : i32
    %c0_i32_0 = arith.constant 0 : i32
    %c0_i32_1 = arith.constant 0 : i32
    %c0_i32_2 = arith.constant 0 : i32
    return %c0_i32, %c0_i32_0, %c0_i32_1 : i32, i32, i32
  }
  func.func @transform_2(%arg0: i32) -> (i32, i32) {
    %c0_i32 = arith.constant 0 : i32
    %c0_i32_0 = arith.constant 0 : i32
    %c0_i32_1 = arith.constant 0 : i32
    return %c0_i32, %c0_i32_0 : i32, i32
  }
  func.func @transform_3(%arg0: i32) -> (i32, i32) {
    %c0_i32 = arith.constant 0 : i32
    %c0_i32_0 = arith.constant 0 : i32
    %c0_i32_1 = arith.constant 0 : i32
    return %c0_i32, %c0_i32_0 : i32, i32
  }
  func.func @transform_4(%arg0: i32) -> (i32, i32, i32, i32) {
    %c0_i32 = arith.constant 0 : i32
    %c0_i32_0 = arith.constant 0 : i32
    %c0_i32_1 = arith.constant 0 : i32
    %c0_i32_2 = arith.constant 0 : i32
    return %arg0, %c0_i32, %c0_i32_0, %c0_i32_1 : i32, i32, i32, i32
  }
  func.func @transform_5(%arg0: i32) -> (i32, i32, i32, i32) {
    %c0_i32 = arith.constant 0 : i32
    %c0_i32_0 = arith.constant 0 : i32
    %c0_i32_1 = arith.constant 0 : i32
    %c0_i32_2 = arith.constant 0 : i32
    return %arg0, %c0_i32, %c0_i32_0, %c0_i32_1 : i32, i32, i32, i32
  }
  func.func @transform_6(%arg0: i32) -> (i32, i32) {
    %c0_i32 = arith.constant 0 : i32
    %c0_i32_0 = arith.constant 0 : i32
    %c0_i32_1 = arith.constant 0 : i32
    return %c0_i32, %c0_i32_0 : i32, i32
  }
  func.func @transform_7(%arg0: i32) -> (i32, i32, i32, i32) {
    %c0_i32 = arith.constant 0 : i32
    %c0_i32_0 = arith.constant 0 : i32
    %c0_i32_1 = arith.constant 0 : i32
    %c0_i32_2 = arith.constant 0 : i32
    return %arg0, %c0_i32, %c0_i32_0, %c0_i32_1 : i32, i32, i32, i32
  }
  func.func @transform_8(%arg0: i32) -> (i32, i32, i32, i32) {
    %c0_i32 = arith.constant 0 : i32
    %c0_i32_0 = arith.constant 0 : i32
    %c0_i32_1 = arith.constant 0 : i32
    %c0_i32_2 = arith.constant 0 : i32
    return %arg0, %c0_i32, %c0_i32_0, %c0_i32_1 : i32, i32, i32, i32
  }
}

</mosaic_0001>

<bundles_post_ra>
// kernel: first_res_block.2
= control target key start
LH: loop header
LB: loop body
LE: loop exit
PB: predicated region body
PF: predicated region fallthrough
CT: control target
= control target key end

     0   :  { %10 = vsyncpa [#allocation3], 0  ;;  %s5027_s0 = inlined_call_operand.hbm [shape: f32[2,16,16,128], index: 0, kind: input, shape index: {}]   ;;  %s5028_s1 = inlined_call_operand.hbm [shape: bf16[1152,128], index: 1, kind: input, shape index: {}]   ;;  %s5029_s2 = inlined_call_operand.vmem [shape: bf16[2,16,16,128], index: 2, kind: output, shape index: {0}]   ;;  %s5030_s3 = inlined_call_operand.vmem [shape: f32[2,1,128], index: 3, kind: output, shape index: {1}]   ;;  %s5031_s4 = inlined_call_operand.vmem [shape: f32[2,1,128], index: 4, kind: output, shape index: {2}]  }
   0x1   :  { %12 = vsyncpa [#allocation3 + $0x1], 0 }
   0x2   :  { %13 = vsyncpa [#allocation5], 0  ;;  %s3724_s15 = smov 0   ;;  %s3726_s16 = smov 0  }
   0x3   :  { %s3728_s17 = smov 0   ;;  %s3730_s18 = smov 0  }
   0x4 LB: > { %s3743_s19 = sadd.s32 4294967295, %s3689_s18   ;;  %p39_p0 = scmp.ne.s32.totalorder %s3681_s16, %s3677_s15  ;;  %s3689_s18 = sphi %s3730_s18, %s5082_s18   ;;  %s3685_s17 = sphi %s3728_s17, %s5081_s17   ;;  %s3681_s16 = sphi %s3726_s16, %s5080_s16   ;;  %s3677_s15 = sphi %s3724_s15, %s5079_s15  }
   0x5   : > { %p5032_p1 = scmp.eq.s32.totalorder %s3743_s19, 0  ;;  %p2317_p2 = scmp.ge.s32.totalorder %s3689_s18, 1 }
   0x6   : > { %p149_p3 = scmp.lt.s32.totalorder %s3689_s18, 3  ;;  %s3691_s22 = smov [#allocation4]  }
   0x7   : > { %p3751_p4 = por %p5032_p1, %p39_p0  ;;  %s161_s23 = sshll.u32 %s3691_s22, 4  ;;  %s162_s23 = int_to_ptr.vmem [resolvable:$true] %s161_s23 }
   0x8   : > { %p3755_p5 = pnand %p2317_p2, %p149_p3  ;;  %s3768_s25 = sadd.s32 1, %s3689_s18  }
   0x9   : > { %s5040_s20 = scalar_select %p3751_p4, 1, 0 }
   0xa   : > { %s5041_s21 = scalar_select %p3755_p5, 1, 0 }
   0xb   : > { %p3475_p6 = pneg %p3755_p5  ;;  %s26_s26 = sadd.s32 1, %s3685_s17 }
   0xc   : > { %s23_s27 = ssub.s32 %s3689_s18, %s3768_s25  ;;  %s3608_s28 = scalar_lea.vmem %s162_s23, 9216 }
   0xd   : > { %p3763_p7 = pnand %p3475_p6, %p5032_p1  ;;  %p3609_p9 = scmp.ne.s32.totalorder %s162_s23, %s3608_s28 }
   0xe   : > { %p3616_p12 = scmp.lt.s32.totalorder %s162_s23, %s162_s23  ;;  %p3617_p13 = scmp.lt.s32.totalorder %s3608_s28, %s3608_s28 }
   0xf   : > { %p3599_p8 = pneg %p3763_p7 }
  0x10   : > { %p3618_p0 = por %p3617_p13, %p3616_p12 }
  0x11   : > { %p3611_p10 = pnand %p3609_p9, %p3599_p8 }
  0x13   : > { %p3612_p11 = pneg %p3611_p10 }
  0x15   : > { %p3619_p2 = pnand %p3618_p0, %p3612_p11 }
  0x17   : > { %3622 = shalt.err (!%p3619_p2)
}
  0x18   : > { %s3692_s29 = smov 64   ;;  %s3693_s30 = smov 4  }
  0x19   : > { %3478 = dma.hbm_to_vmem [thread:$0]  (!%p3763_p7), %s5028_s1, 9216, %s162_s23, [#allocation5], %s3692_s29, %s3692_s29, %s3693_s30  }
  0x1a   : > { %p24_p3 = scmp.eq.s32.totalorder %s23_s27, 0  ;;  %p33_p6 = scmp.ne.s32.totalorder %s3685_s17, %s3681_s16 }
  0x1b   : > { %p34_p8 = scmp.eq.s32.totalorder %s3689_s18, 0  ;;  %p3484_p9 = scmp.lt.s32.totalorder %s3689_s18, 2 }
  0x1c   : > { %s3785_s7 = scalar_select %p24_p3, %s3685_s17, %s26_s26  }
  0x1d   : > { %p35_p10 = por %p34_p8, %p33_p6  ;;  %s175_s8 = sand.u32 1, %s3685_s17  }
  0x1e   : > { %s2320_s9 = sshll.u32 %s175_s8, 8  ;;  %s2802_s10 = sshll.u32 %s3689_s18, 12 }
  0x1f   : > { %s3792_s13 = scalar_lea.hbm %s5027_s0, %s2802_s10  ;;  %s179_s14 = scalar_lea.vmem [#allocation2], %s2320_s9 }
  0x20   : > { %s186_s15 = sshll.u32 %s179_s14, 4  ;;  %p3796_p7 = pnand %p3484_p9, %p35_p10  ;;  %s3794_s15 = int_to_ptr.vmem [resolvable:$true] %s186_s15 }
  0x21   : > { %s3800_s23 = scalar_lea.sflag [#allocation3], %s175_s8  ;;  %s3623_s18 = scalar_lea.hbm %s3792_s13, 4096 }
  0x22   : > { %p3624_p11 = scmp.ne.s32.totalorder %s3792_s13, %s3623_s18  ;;  %p3625_p12 = pneg %p3796_p7 }
  0x23   : > { %s3628_s27 = scalar_lea.hbm %s5027_s0, 8192  ;;  %p3629_p2 = scmp.lt.s32.totalorder %s3792_s13, %s5027_s0 }
  0x24   : > { %p3626_p13 = pnand %p3625_p12, %p3624_p11  ;;  %p3630_p3 = scmp.lt.s32.totalorder %s3628_s27, %s3623_s18 }
  0x26   : > { %p3627_p0 = pneg %p3626_p13  ;;  %p3631_p6 = por %p3630_p3, %p3629_p2 }
  0x28   : > { %p3632_p8 = pnand %p3631_p6, %p3627_p0 }
  0x2a   : > { %3635 = shalt.err (!%p3632_p8)
}
  0x2b   : > { %s3636_s30 = scalar_lea.vmem %s3794_s15, 4096  ;;  %s3694_s5 = smov [#allocation2]  }
  0x2c   : > { %p3637_p9 = scmp.ne.s32.totalorder %s3794_s15, %s3636_s30  ;;  %s3641_s6 = sshll.u32 %s3694_s5, 4  ;;  %s3642_s6 = int_to_ptr.vmem [resolvable:$false] %s3641_s6 }
  0x2d   : > { %s3643_s8 = scalar_lea.vmem %s3642_s6, 8192  ;;  %p3644_p13 = scmp.lt.s32.totalorder %s3794_s15, %s3642_s6 }
  0x2e   : > { %p3639_p10 = pnand %p3637_p9, %p3625_p12  ;;  %p3645_p1 = scmp.lt.s32.totalorder %s3643_s8, %s3636_s30 }
  0x30   : > { %p3640_p11 = pneg %p3639_p10  ;;  %p3646_p4 = por %p3645_p1, %p3644_p13 }
  0x32   : > { %p3647_p5 = pnand %p3646_p4, %p3640_p11 }
  0x34   : > { %3650 = shalt.err (!%p3647_p5)
}
  0x35   : > { %s3695_s9 = smov 128   ;;  %s3696_s10 = smov 8  }
  0x36   : > { %3482 = dma.hbm_to_vmem [thread:$0]  (!%p3796_p7), %s3792_s13, 4096, %s3794_s15, %s3800_s23, %s3695_s9, %s3695_s9, %s3696_s10  }
  0x37   : > { %p5044_p12 = scmp.ne.s32.totalorder %s5041_s21, 0 }
  0x39   : > { %198 = sbr.rel (%p5044_p12) target bundleno = 605 (0x25d), region = 28 }
  0x3e   : > { %s200_s11 = sand.u32 1, %s3681_s16   ;;  %p5045_p1 = scmp.ne.s32.totalorder %s5040_s20, 0 }
  0x3f   : > { %s2324_s12 = sshll.u32 %s200_s11, 8  ;;  %s201_s14 = scalar_lea.sflag [#allocation3], %s200_s11 }
  0x40   : > { %s3824_s18 = scalar_lea.vmem [#allocation2], %s2324_s12 }
  0x41   : > { %3668 = dma.done.wait (%p5045_p1), %s201_s14, 4096  }
  0x42   : > { %3670 = vsyncadd (%p5045_p1), %s201_s14, 4294963200  ;;  %p5046_p4 = scmp.eq.s32.totalorder %s3743_s19, 0 }
  0x44   : > { %3672 = dma.done.wait (%p5046_p4), [#allocation5], 9216   ;;  %p5047_p5 = pmov %p5046_p4 }
  0x45   : > { %v5035_v0 = vmov 0   ;;  %v3525_v1 = vld [vmem:[#allocation4 + $0x78] sm:$0xff]   ;;  %v3527_v3 = vld [vmem:[#allocation4 + $0x70] sm:$0xff]   ;;  %v3529_v5 = vld [vmem:[#allocation4 + $0x68] sm:$0xff]   ;;  %v427_v12 = vlaneseq  ;;  %vm3698_vm3 = vmmov 1   ;;  %p239_p7 = scmp.lt.s32.totalorder %s3743_s19, 1 }
  0x46   : > { %3674 = vsyncadd (%p5047_p5), [#allocation5], 4294958080  ;;  %1148 = vmatprep.mubr.bf16.mxu0 %v5035_v0  ;;  %v3526_v2 = vld [vmem:[#allocation4 + $0x38] sm:$0xff]   ;;  %2933 = vmatprep.subr.bf16.mxu0 %v3525_v1  ;;  %v3528_v4 = vld [vmem:[#allocation4 + $0x30] sm:$0xff]  }
  0x47   : > { %3453 = vmatprep.subr.bf16.mxu1 %v3525_v1  ;;  %2934 = vmatpush3.bf16.msra.mxu0 %v3526_v2  ;;  %v3530_v6 = vld [vmem:[#allocation4 + $0x28] sm:$0xff]   ;;  %v3531_v7 = vld [vmem:[#allocation4 + $0x60] sm:$0xff]   ;;  %v3533_v9 = vld [vmem:[#allocation4 + $0x58] sm:$0xff]   ;;  %v3839_v18 = vshrl.u32 %v427_v12, 7  ;;  %s5084_s19 = smov (!%p239_p7, %s3743_s19), 1 }
  0x48   : > { %3461 = vmatpush3.bf16.msra.mxu1 %v3526_v2  ;;  %2935 = vmatprep.subr.bf16.mxu0 %v3527_v3  ;;  %v3532_v8 = vld [vmem:[#allocation4 + $0x20] sm:$0xff]   ;;  %v3534_v10 = vld [vmem:[#allocation4 + $0x18] sm:$0xff]   ;;  %v3535_v11 = vld [vmem:[#allocation4 + $0x50] sm:$0xff]   ;;  %s2803_s20 = sshll.u32 %s5084_s19, 7  ;;  %s246_s24 = scalar_lea.vmem %s5030_s3, %s5084_s19 }
  0x49   : > { %3454 = vmatprep.subr.bf16.mxu1 %v3527_v3  ;;  %v273_v13 = vld [vmem:[%s3824_s18 + $0xb0] sm:$0xff]  ;;  %v274_v14 = vld [vmem:[%s3824_s18 + $0xb8] sm:$0xff]  ;;  %v3537_v17 = vld [vmem:[#allocation4 + $0x48] sm:$0xff]   ;;  %vm464_vm0 = vcmp.lt.s32.totalorder %v3839_v18, 1  ;;  %vm2931_vm1 = vcmp.ne.s32.totalorder %v3839_v18, 0  ;;  %vm567_vm2 = vcmp.lt.s32.totalorder %v3839_v18, 7  ;;  %s4907_s15 = scalar_lea.vmem %s5029_s2, %s2803_s20  ;;  %s249_s28 = scalar_lea.vmem %s5031_s4, %s5084_s19 }
  0x4a   : > { %v3837_v15 = vpack.c.bf16 %v274_v14, %v273_v13  ;;  %v3536_v16 = vld [vmem:[#allocation4 + $0x10] sm:$0xff]   ;;  %v3538_v19 = vld [vmem:[#allocation4 + $0x8] sm:$0xff]   ;;  %v443_v20 = vrot.slane %v273_v13, 7  ;;  %v459_v21 = vrot.slane %v274_v14, 7  ;;  %v3539_v22 = vld [vmem:[#allocation4 + $0x40] sm:$0xff]   ;;  %v546_v24 = vrot.slane %v273_v13, 1 }
  0x4b   : > { %2936 = vmatpush3.bf16.msra.mxu0 %v3528_v4  ;;  %v3540_v23 = vld [vmem:[#allocation4] sm:$0xff]   ;;  %v562_v25 = vrot.slane %v274_v14, 1  ;;  %v3541_v27 = vld [vmem:[#allocation4 + $0xf8] sm:$0xff]   ;;  %v3848_v29 = vld [vmem:[%s3824_s18 + $0x8] sm:$0xff] }
  0x4c   : > { %3462 = vmatpush3.bf16.msra.mxu1 %v3528_v4  ;;  %2937 = vmatprep.subr.bf16.mxu0 %v3529_v5  ;;  %v3844_v26 = vld [vmem:[%s3824_s18] sm:$0xff]  ;;  %v3542_v28 = vld [vmem:[#allocation4 + $0x178] sm:$0xff]   ;;  %v476_v31 = vsel %vm464_vm0, %v443_v20, %v459_v21  ;;  %v492_v32 = vsel %vm464_vm0, %v459_v21, %v443_v20  ;;  %v276_v33 = vld [vmem:[%s3824_s18 + $0xc8] sm:$0xff]  ;;  %v448_v39 = vrot.slane %v3848_v29, 7 }
  0x4d   : > { %3455 = vmatprep.subr.bf16.mxu1 %v3529_v5  ;;  %1244 = vmatprep.mubr.bf16.mxu1 %v3837_v15  ;;  %v275_v30 = vld [vmem:[%s3824_s18 + $0xc0] sm:$0xff]  ;;  %v579_v34 = vsel %vm567_vm2, %v546_v24, %v562_v25  ;;  %v595_v35 = vsel %vm567_vm2, %v562_v25, %v546_v24  ;;  %vm3864_vm4 = vmpackc.low %vm3698_vm3, %vm2931_vm1  ;;  %v3868_v37 = vpack.c.bf16 %v476_v31, %v492_v32  ;;  %v432_v38 = vrot.slane %v3844_v26, 7  ;;  %v3543_v41 = vld [vmem:[#allocation4 + $0xb8] sm:$0xff]  }
  0x4e   : > { %v3872_v40 = vpack.c.bf16 %v595_v35, %v579_v34  ;;  %v3544_v42 = vld [vmem:[#allocation4 + $0x138] sm:$0xff]   ;;  %v444_v43 = vrot.slane %v275_v30, 7  ;;  %v460_v44 = vrot.slane %v276_v33, 7  ;;  %v3545_v45 = vld [vmem:[#allocation4 + $0xf0] sm:$0xff]   ;;  %v3876_v46 = vpack.c.bf16 %v3848_v29, %v3844_v26  ;;  %v3547_v61 = vld [vmem:[#allocation4 + $0xe8] sm:$0xff]  }
  0x4f   : > { %2938 = vmatpush3.bf16.msra.mxu0 %v3530_v6  ;;  %v3550_v47 = vld [vmem:[#allocation4 + $0x170] sm:$0xff]   ;;  %v547_v49 = vrot.slane %v275_v30, 1  ;;  %v563_v50 = vrot.slane %v276_v33, 1  ;;  %v3878_v51 = vpack.c.bf16 %v276_v33, %v275_v30  ;;  %v3884_v54 = vld [vmem:[%s3824_s18 + $0x18] sm:$0xff]  ;;  %v465_v55 = vsel %vm464_vm0, %v432_v38, %v448_v39  ;;  %v3558_v13 = vld [vmem:[#allocation4 + $0x168] sm:$0xff]  }
  0x50   : > { %3463 = vmatpush3.bf16.msra.mxu1 %v3530_v6  ;;  %2939 = vmatprep.subr.bf16.mxu0 %v3531_v7  ;;  %v3546_v48 = vld [vmem:[#allocation4 + $0xb0] sm:$0xff]   ;;  %v481_v56 = vsel %vm464_vm0, %v448_v39, %v432_v38  ;;  %v278_v58 = vld [vmem:[%s3824_s18 + $0xd8] sm:$0xff]  ;;  %v477_v59 = vsel %vm464_vm0, %v444_v43, %v460_v44  ;;  %v493_v60 = vsel %vm464_vm0, %v460_v44, %v444_v43  ;;  %v449_v1 = vrot.slane %v3884_v54, 7  ;;  %v3551_v14 = vld [vmem:[#allocation4 + $0xa0] sm:$0xff]  }
  0x51   : > { %3456 = vmatprep.subr.bf16.mxu1 %v3531_v7  ;;  %v3552_v52 = vld [vmem:[#allocation4 + $0x130] sm:$0xff]   ;;  %v3902_v62 = vpack.c.bf16 %v465_v55, %v481_v56  ;;  %v580_v2 = vsel %vm567_vm2, %v547_v49, %v563_v50  ;;  %v3908_v3 = vpack.c.bf16 %v477_v59, %v493_v60  ;;  %v461_v5 = vrot.slane %v278_v58, 7  ;;  %v3548_v7 = vld [vmem:[#allocation4 + $0xa8] sm:$0xff]   ;;  %v279_v20 = vld [vmem:[%s3824_s18 + $0xe0] sm:$0xff] }
  0x52   : > { %v3881_v53 = vld [vmem:[%s3824_s18 + $0x10] sm:$0xff]  ;;  %v596_v6 = vsel %vm567_vm2, %v563_v50, %v547_v49  ;;  %v280_v24 = vld [vmem:[%s3824_s18 + $0xe8] sm:$0xff]  ;;  %v3554_v34 = vld [vmem:[#allocation4 + $0x98] sm:$0xff]   ;;  %v549_v44 = vrot.slane %v279_v20, 1 }
  0x53   : > { %2940 = vmatpush3.bf16.msra.mxu0 %v3532_v8  ;;  %v277_v57 = vld [vmem:[%s3824_s18 + $0xd0] sm:$0xff]  ;;  %v433_v63 = vrot.slane %v3881_v53, 7  ;;  %v3560_v25 = vld [vmem:[#allocation4 + $0x128] sm:$0xff]   ;;  %v3565_v49 = vld [vmem:[#allocation4 + $0x160] sm:$0xff]  }
  0x54   : > { %3464 = vmatpush3.bf16.msra.mxu1 %v3532_v8  ;;  %2941 = vmatprep.subr.bf16.mxu0 %v3533_v9  ;;  %v445_v4 = vrot.slane %v277_v57, 7  ;;  %v3914_v8 = vpack.c.bf16 %v3884_v54, %v3881_v53  ;;  %v3916_v12 = vpack.c.bf16 %v278_v58, %v277_v57  ;;  %v3566_v56 = vld [vmem:[#allocation4 + $0x120] sm:$0xff]   ;;  %v3557_v59 = vld [vmem:[#allocation4 + $0xc8] sm:$0xff]   ;;  %v3978_v60 = vld [vmem:[%s3824_s18 + $0x30] sm:$0xff] }
  0x55   : > { %3457 = vmatprep.subr.bf16.mxu1 %v3533_v9  ;;  %v3549_v9 = vld [vmem:[#allocation4 + $0xe0] sm:$0xff]   ;;  %v482_v21 = vsel %vm464_vm0, %v449_v1, %v433_v63 }
  0x57   : > { %2942 = vmatpush3.bf16.msra.mxu0 %v3534_v10 }
  0x58   : > { %3465 = vmatpush3.bf16.msra.mxu1 %v3534_v10  ;;  %2943 = vmatprep.subr.bf16.mxu0 %v3535_v11  ;;  %v548_v10 = vrot.slane %v277_v57, 1  ;;  %v3556_v57 = vld [vmem:[#allocation4 + $0x90] sm:$0xff]  }
  0x59   : > { %3458 = vmatprep.subr.bf16.mxu1 %v3535_v11  ;;  %v564_v11 = vrot.slane %v278_v58, 1 }
  0x5b   : > { %2944 = vmatpush3.bf16.msra.mxu0 %v3536_v16  ;;  %v581_v30 = vsel %vm567_vm2, %v548_v10, %v564_v11  ;;  %v597_v31 = vsel %vm567_vm2, %v564_v11, %v548_v10  ;;  %v3561_v11 = vld [vmem:[#allocation4 + $0xc0] sm:$0xff]  }
  0x5c   : > { %3466 = vmatpush3.bf16.msra.mxu1 %v3536_v16  ;;  %2945 = vmatprep.subr.bf16.mxu0 %v3537_v17  ;;  %v466_v16 = vsel %vm464_vm0, %v433_v63, %v449_v1  ;;  %v3952_v35 = vpack.c.bf16 %v597_v31, %v581_v30  ;;  %v3986_v1 = vld [vmem:[%s3824_s18 + $0x38] sm:$0xff]  ;;  %v535_v30 = vrot.slane %v3844_v26, 1  ;;  %v551_v31 = vrot.slane %v3848_v29, 1  ;;  %v3568_v26 = vld [vmem:[#allocation4 + $0x1f0] sm:$0xff]   ;;  %v3575_v29 = vld [vmem:[#allocation4 + $0x148] sm:$0xff]  }
  0x5d   : > { %3459 = vmatprep.subr.bf16.mxu1 %v3537_v17  ;;  %v3921_v17 = vld [vmem:[%s3824_s18 + $0x20] sm:$0xff]  ;;  %v3948_v32 = vpack.c.bf16 %v466_v16, %v482_v21  ;;  %v3996_v10 = vpack.c.bf16 %v3986_v1, %v3978_v60  ;;  %v3571_v16 = vld [vmem:[#allocation4 + $0x150] sm:$0xff]  }
  0x5e   : > { %v434_v38 = vrot.slane %v3921_v17, 7 }
  0x5f   : > { %2946 = vmatpush3.bf16.msra.mxu0 %v3538_v19 }
  0x60   : > { %3467 = vmatpush3.bf16.msra.mxu1 %v3538_v19  ;;  %2947 = vmatprep.subr.bf16.mxu0 %v3539_v22  ;;  %v3924_v19 = vld [vmem:[%s3824_s18 + $0x28] sm:$0xff] }
  0x61   : > { %3460 = vmatprep.subr.bf16.mxu1 %v3539_v22  ;;  %v478_v22 = vsel %vm464_vm0, %v445_v4, %v461_v5  ;;  %v450_v39 = vrot.slane %v3924_v19, 7  ;;  %v3958_v43 = vpack.c.bf16 %v3924_v19, %v3921_v17 }
  0x63   : > { %2948 = vmatpush3.bf16.msra.mxu0 %v3540_v23  ;;  %v467_v50 = vsel %vm464_vm0, %v434_v38, %v450_v39 }
  0x64   : > { %3468 = vmatpush3.bf16.msra.mxu1 %v3540_v23  ;;  %3157 = vmatprep.subr.bf16.mxu0 %v3542_v28  ;;  %v494_v23 = vsel %vm464_vm0, %v461_v5, %v445_v4  ;;  %v3553_v28 = vld [vmem:[#allocation4 + $0xd8] sm:$0xff]   ;;  %v3559_v4 = vld [vmem:[#allocation4 + $0x88] sm:$0xff]  }
  0x65   : > { %3045 = vmatprep.subr.bf16.mxu1 %v3541_v27  ;;  %v3941_v27 = vpack.c.bf16 %v596_v6, %v580_v2  ;;  %v3950_v33 = vpack.c.bf16 %v478_v22, %v494_v23  ;;  %v3567_v2 = vld [vmem:[#allocation4 + $0x158] sm:$0xff]  }
  0x66   : > { %1149 = vmatmul.mubr.bf16.vlgmr.msra.gmra.mxu0 %v5035_v0  ;;  %v3563_v23 = vld [vmem:[#allocation4 + $0x1f8] sm:$0xff]  }
  0x67   : > { %2447 = vmatmul.mubr.msk.bf16.vlgmr.msra.gmra.mxu1 %vm3864_vm4, %v3868_v37  ;;  %3158 = vmatpush3.bf16.msra.mxu0 %v3544_v42  ;;  %v462_v42 = vrot.slane %v280_v24, 7 }
  0x68   : > { %3046 = vmatpush3.bf16.msra.mxu1 %v3543_v41  ;;  %1156 = vmatprep.mubr.bf16.mxu0 %v3876_v46  ;;  %v446_v41 = vrot.slane %v279_v20, 7 }
  0x69   : > { %3047 = vmatprep.subr.bf16.mxu1 %v3545_v45  ;;  %1252 = vmatprep.mubr.bf16.mxu1 %v3878_v51  ;;  %v565_v45 = vrot.slane %v280_v24, 1 }
  0x6a   : > { %3159 = vmatprep.subr.bf16.mxu0 %v3550_v47  ;;  %v3555_v47 = vld [vmem:[#allocation4 + $0xd0] sm:$0xff]   ;;  %v479_v55 = vsel %vm464_vm0, %v446_v41, %v462_v42  ;;  %v495_v58 = vsel %vm464_vm0, %v462_v42, %v446_v41 }
  0x6b   : > { %3160 = vmatpush3.bf16.msra.mxu0 %v3552_v52  ;;  %v483_v52 = vsel %vm464_vm0, %v450_v39, %v434_v38  ;;  %v598_v63 = vsel %vm567_vm2, %v565_v45, %v549_v44  ;;  %v3990_v6 = vpack.c.bf16 %v479_v55, %v495_v58  ;;  %v429_v38 = vadd.s32 8, %v3839_v18  ;;  %v3564_v39 = vld [vmem:[#allocation4 + $0x1b8] sm:$0xff]   ;;  %v3579_v58 = vld [vmem:[#allocation4 + $0x140] sm:$0xff]  }
  0x6c   : > { %3048 = vmatpush3.bf16.msra.mxu1 %v3546_v48  ;;  %3161 = vmatprep.subr.bf16.mxu0 %v3558_v13  ;;  %v3960_v48 = vpack.c.bf16 %v280_v24, %v279_v20  ;;  %v3988_v5 = vpack.c.bf16 %v467_v50, %v483_v52  ;;  %v3569_v13 = vld [vmem:[#allocation4 + $0x118] sm:$0xff]   ;;  %v3562_v20 = vld [vmem:[#allocation4 + $0x80] sm:$0xff]   ;;  %v584_v55 = vsel %vm567_vm2, %v551_v31, %v535_v30 }
  0x6d   : > { %3049 = vmatprep.subr.bf16.mxu1 %v3547_v61  ;;  %v582_v61 = vsel %vm567_vm2, %v549_v44, %v565_v45  ;;  %v4015_v24 = vld [vmem:[%s3824_s18 + $0x40] sm:$0xff]  ;;  %v568_v44 = vsel %vm567_vm2, %v535_v30, %v551_v31  ;;  %v4038_v45 = vld [vmem:[%s3824_s18 + $0x50] sm:$0xff]  ;;  %vm2932_vm5 = vcmp.ne.s32.totalorder %v429_v38, 15  ;;  %v4094_v30 = vld [vmem:[%s3824_s18 + $0x68] sm:$0xff] }
  0x6e   : > { %2403 = vmatmul.mubr.msk.bf16.gmra.mxu0 %vm3864_vm4, %v3902_v62  ;;  %5050 = vst [vmem:[#allocation8_spill] sm:$0xff] %v3960_v48  ;;  %vm4054_vm6 = vmpackc.low %vm2932_vm5, %vm3698_vm3  ;;  %v3578_v31 = vld [vmem:[#allocation4 + $0x1a0] sm:$0xff]   ;;  %v3581_v38 = vld [vmem:[#allocation4 + $0x1d8] sm:$0xff]  }
  0x6f   : > { %2451 = vmatmul.mubr.msk.bf16.gmra.mxu1 %vm3864_vm4, %v3908_v3  ;;  %1164 = vmatprep.mubr.bf16.mxu0 %v3914_v8 }
  0x70   : > { %3050 = vmatpush3.bf16.msra.mxu1 %v3548_v7  ;;  %1260 = vmatprep.mubr.bf16.mxu1 %v3916_v12  ;;  %v435_v7 = vrot.slane %v3978_v60, 7 }
  0x71   : > { %3051 = vmatprep.subr.bf16.mxu1 %v3549_v9  ;;  %3162 = vmatpush3.bf16.msra.mxu0 %v3560_v25  ;;  %v451_v9 = vrot.slane %v3986_v1, 7  ;;  %v4018_v25 = vld [vmem:[%s3824_s18 + $0x48] sm:$0xff] }
  0x72   : > { %3163 = vmatprep.subr.bf16.mxu0 %v3565_v49  ;;  %v452_v41 = vrot.slane %v4018_v25, 7  ;;  %v4029_v42 = vpack.c.bf16 %v4018_v25, %v4015_v24  ;;  %v3576_v49 = vld [vmem:[#allocation4 + $0x108] sm:$0xff]  }
  0x73   : > { %v468_v21 = vsel %vm464_vm0, %v435_v7, %v451_v9  ;;  %v484_v22 = vsel %vm464_vm0, %v451_v9, %v435_v7  ;;  %v437_v7 = vrot.slane %v4038_v45, 7 }
  0x74   : > { %3052 = vmatpush3.bf16.msra.mxu1 %v3551_v14  ;;  %v3998_v14 = vpack.c.bf16 %v598_v63, %v582_v61  ;;  %v536_v61 = vrot.slane %v3881_v53, 1  ;;  %v552_v63 = vrot.slane %v3884_v54, 1  ;;  %v3577_v53 = vld [vmem:[#allocation4 + $0x1e0] sm:$0xff]  }
  0x75   : > { %3053 = vmatprep.subr.bf16.mxu1 %v3553_v28  ;;  %3164 = vmatpush3.bf16.msra.mxu0 %v3566_v56  ;;  %v3572_v28 = vld [vmem:[#allocation4 + $0x110] sm:$0xff]   ;;  %v3580_v54 = vld [vmem:[#allocation4 + $0x100] sm:$0xff]  }
  0x76   : > { %2407 = vmatmul.mubr.msk.bf16.gmra.mxu0 %vm3864_vm4, %v3948_v32  ;;  %3165 = vmatprep.subr.bf16.mxu0 %v3567_v2  ;;  %v3570_v56 = vld [vmem:[#allocation4 + $0x1b0] sm:$0xff]  }
  0x77   : > { %2455 = vmatmul.mubr.msk.bf16.gmra.mxu1 %vm3864_vm4, %v3950_v33  ;;  %1172 = vmatprep.mubr.bf16.mxu0 %v3958_v43 }
  0x78   : > { %3054 = vmatpush3.bf16.msra.mxu1 %v3554_v34  ;;  %1268 = vmatprep.mubr.bf16.mxu1 %v3960_v48  ;;  %v4022_v34 = vpack.c.bf16 %v468_v21, %v484_v22  ;;  %v4081_v21 = vld [vmem:[%s3824_s18 + $0x60] sm:$0xff] }
  0x79   : > { %3055 = vmatprep.subr.bf16.mxu1 %v3555_v47  ;;  %3166 = vmatpush3.bf16.msra.mxu0 %v3569_v13  ;;  %v4041_v47 = vld [vmem:[%s3824_s18 + $0x58] sm:$0xff]  ;;  %v3574_v13 = vld [vmem:[#allocation4 + $0x1a8] sm:$0xff]  }
  0x7a   : > { %3167 = vmatprep.subr.bf16.mxu0 %v3571_v16  ;;  %v453_v9 = vrot.slane %v4041_v47, 7  ;;  %v4070_v16 = vld [vmem:[#allocation4 + $0x238] sm:$0xff]  }
  0x7c   : > { %3056 = vmatpush3.bf16.msra.mxu1 %v3556_v57  ;;  %v3573_v57 = vld [vmem:[#allocation4 + $0x1e8] sm:$0xff]   ;;  %v470_v22 = vsel %vm464_vm0, %v437_v7, %v453_v9 }
  0x7d   : > { %3057 = vmatprep.subr.bf16.mxu1 %v3557_v59  ;;  %3168 = vmatpush3.bf16.msra.mxu0 %v3572_v28  ;;  %v585_v28 = vsel %vm567_vm2, %v552_v63, %v536_v61 }
  0x7e   : > { %2411 = vmatmul.mubr.msk.bf16.gmra.mxu0 %vm3864_vm4, %v3988_v5  ;;  %3169 = vmatprep.subr.bf16.mxu0 %v3575_v29  ;;  %v438_v29 = vrot.slane %v4081_v21, 7 }
  0x7f   : > { %2459 = vmatmul.mubr.msk.bf16.gmra.mxu1 %vm3864_vm4, %v3990_v6  ;;  %1180 = vmatprep.mubr.bf16.mxu0 %v3996_v10 }
  0x80   : > { %3058 = vmatpush3.bf16.msra.mxu1 %v3559_v4  ;;  %2463 = vmatprep.mubr.msk.bf16.mxu1 %vm3864_vm4, %v3902_v62  ;;  %v436_v62 = vrot.slane %v4015_v24, 7  ;;  %v4062_v4 = vpack.c.bf16 %v584_v55, %v568_v44  ;;  %v454_v44 = vrot.slane %v4094_v30, 7 }
  0x81   : > { %3059 = vmatprep.subr.bf16.mxu1 %v3561_v11  ;;  %3170 = vmatpush3.bf16.msra.mxu0 %v3576_v49  ;;  %v4068_v11 = vpack.c.bf16 %v4041_v47, %v4038_v45  ;;  %v4107_v49 = vpack.c.bf16 %v4094_v30, %v4081_v21 }
  0x82   : > { %v469_v50 = vsel %vm464_vm0, %v436_v62, %v452_v41  ;;  %v485_v52 = vsel %vm464_vm0, %v452_v41, %v436_v62  ;;  %3171 = vmatprep.subr.bf16.mxu0 %v3579_v58  ;;  %v553_v62 = vrot.slane %v3924_v19, 1  ;;  %v487_v55 = vsel %vm464_vm0, %v454_v44, %v438_v29  ;;  %v4131_v58 = vld [vmem:[%s3824_s18 + $0x78] sm:$0xff] }
  0x83   : > { %v4060_v2 = vpack.c.bf16 %v469_v50, %v485_v52  ;;  %v3583_v50 = vld [vmem:[#allocation4 + $0x198] sm:$0xff]   ;;  %v471_v52 = vsel %vm464_vm0, %v438_v29, %v454_v44  ;;  %v3592_v29 = vld [vmem:[#allocation4 + $0x180] sm:$0xff]   ;;  %v539_v44 = vrot.slane %v4015_v24, 1 }
  0x84   : > { %3060 = vmatpush3.bf16.msra.mxu1 %v3562_v20  ;;  %v569_v20 = vsel %vm567_vm2, %v536_v61, %v552_v63  ;;  %v3586_v61 = vld [vmem:[#allocation4 + $0x190] sm:$0xff]   ;;  %v3587_v63 = vld [vmem:[#allocation4 + $0x1c8] sm:$0xff]  }
  0x85   : > { %3269 = vmatprep.subr.bf16.mxu1 %v3563_v23  ;;  %v486_v23 = vsel %vm464_vm0, %v453_v9, %v437_v7  ;;  %3172 = vmatpush3.bf16.msra.mxu0 %v3580_v54  ;;  %v538_v7 = vrot.slane %v3978_v60, 1  ;;  %v554_v9 = vrot.slane %v3986_v1, 1  ;;  %v3590_v60 = vld [vmem:[#allocation4 + $0x1c0] sm:$0xff]  }
  0x86   : > { %2415 = vmatmul.mubr.msk.bf16.gmra.mxu0 %vm3864_vm4, %v4022_v34  ;;  %3405 = vmatprep.subr.bf16.mxu0 %v4070_v16  ;;  %v4099_v41 = vpack.c.bf16 %v470_v22, %v486_v23  ;;  %v3589_v23 = vld [vmem:[#allocation4 + $0x188] sm:$0xff]  }
  0x87   : > { %1310 = vmatmul.mubr.bf16.vlgmr.msra.gmra.mxu1 %v5035_v0  ;;  %1188 = vmatprep.mubr.bf16.mxu0 %v4029_v42  ;;  %v571_v1 = vsel %vm567_vm2, %v538_v7, %v554_v9 }
  0x88   : > { %3270 = vmatpush3.bf16.msra.mxu1 %v3564_v39  ;;  %2467 = vmatprep.mubr.msk.bf16.mxu1 %vm3864_vm4, %v3948_v32  ;;  %v537_v39 = vrot.slane %v3921_v17, 1  ;;  %v3584_v17 = vld [vmem:[#allocation4 + $0x1d0] sm:$0xff]  }
  0x89   : > { %3271 = vmatprep.subr.bf16.mxu1 %v3568_v26  ;;  %v4101_v26 = vpack.c.bf16 %v585_v28, %v569_v20  ;;  %v455_v20 = vrot.slane %v4131_v58, 7 }
  0x8a   : > { %v570_v19 = vsel %vm567_vm2, %v537_v39, %v553_v62 }
  0x8c   : > { %3272 = vmatpush3.bf16.msra.mxu1 %v3570_v56  ;;  %v586_v56 = vsel %vm567_vm2, %v553_v62, %v537_v39  ;;  %v4164_v39 = vld [vmem:[%s3824_s18 + $0x80] sm:$0xff]  ;;  %v4167_v62 = vld [vmem:[%s3824_s18 + $0x88] sm:$0xff] }
  0x8d   : > { %3273 = vmatprep.subr.bf16.mxu1 %v3573_v57  ;;  %v4128_v57 = vld [vmem:[%s3824_s18 + $0x70] sm:$0xff] }
  0x8e   : > { %2419 = vmatmul.mubr.msk.bf16.gmra.mxu0 %vm3864_vm4, %v4060_v2  ;;  %v439_v54 = vrot.slane %v4128_v57, 7  ;;  %v4143_v22 = vpack.c.bf16 %v4131_v58, %v4128_v57 }
  0x8f   : > { %2471 = vmatmul.mubr.msk.bf16.gmra.mxu1 %vm4054_vm6, %v4062_v4  ;;  %1196 = vmatprep.mubr.bf16.mxu0 %v4068_v11 }
  0x90   : > { %2475 = vmatprep.mubr.msk.bf16.mxu1 %vm3864_vm4, %v3988_v5  ;;  %3274 = vmatpush3.bf16.msra.mxu1 %v3574_v13  ;;  %v4135_v13 = vpack.c.bf16 %v471_v52, %v487_v55  ;;  %v472_v28 = vsel %vm464_vm0, %v439_v54, %v455_v20  ;;  %v440_v52 = vrot.slane %v4164_v39, 7  ;;  %v456_v55 = vrot.slane %v4167_v62, 7 }
  0x91   : > { %3275 = vmatprep.subr.bf16.mxu1 %v3577_v53  ;;  %v4137_v53 = vpack.c.bf16 %v586_v56, %v570_v19  ;;  %v4179_v56 = vpack.c.bf16 %v4167_v62, %v4164_v39 }
  0x94   : > { %3276 = vmatpush3.bf16.msra.mxu1 %v3578_v31  ;;  %v488_v31 = vsel %vm464_vm0, %v455_v20, %v439_v54  ;;  %v540_v54 = vrot.slane %v4038_v45, 1  ;;  %v556_v20 = vrot.slane %v4041_v47, 1 }
  0x95   : > { %3277 = vmatprep.subr.bf16.mxu1 %v3581_v38  ;;  %v587_v38 = vsel %vm567_vm2, %v554_v9, %v538_v7  ;;  %v4200_v7 = vld [vmem:[%s3824_s18 + $0x90] sm:$0xff]  ;;  %v4203_v9 = vld [vmem:[%s3824_s18 + $0x98] sm:$0xff] }
  0x96   : > { %2423 = vmatmul.mubr.msk.bf16.gmra.mxu0 %vm3864_vm4, %v4099_v41  ;;  %v4173_v19 = vpack.c.bf16 %v587_v38, %v571_v1  ;;  %v441_v1 = vrot.slane %v4200_v7, 7  ;;  %v573_v45 = vsel %vm567_vm2, %v540_v54, %v556_v20 }
  0x97   : > { %2479 = vmatmul.mubr.msk.bf16.gmra.mxu1 %vm4054_vm6, %v4101_v26  ;;  %1204 = vmatprep.mubr.bf16.mxu0 %v4107_v49 }
  0x98   : > { %2483 = vmatprep.mubr.msk.bf16.mxu1 %vm3864_vm4, %v4022_v34  ;;  %3278 = vmatpush3.bf16.msra.mxu1 %v3583_v50  ;;  %v555_v50 = vrot.slane %v4018_v25, 1  ;;  %v473_v25 = vsel %vm464_vm0, %v440_v52, %v456_v55 }
  0x99   : > { %3279 = vmatprep.subr.bf16.mxu1 %v3584_v17  ;;  %v4171_v17 = vpack.c.bf16 %v472_v28, %v488_v31  ;;  %v457_v28 = vrot.slane %v4203_v9, 7  ;;  %v4215_v31 = vpack.c.bf16 %v4203_v9, %v4200_v7 }
  0x9a   : > { %v572_v24 = vsel %vm567_vm2, %v539_v44, %v555_v50 }
  0x9b   : > { %5053 = vst [vmem:[#allocation9_spill] sm:$0xff] %v4171_v17  ;;  %v474_v47 = vsel %vm464_vm0, %v441_v1, %v457_v28  ;;  %v490_v38 = vsel %vm464_vm0, %v457_v28, %v441_v1  ;;  %v4272_v28 = vld [vmem:[%s3824_s18 + $0xf0] sm:$0xff] }
  0x9c   : > { %3280 = vmatpush3.bf16.msra.mxu1 %v3586_v61  ;;  %v489_v61 = vsel %vm464_vm0, %v456_v55, %v440_v52  ;;  %v541_v52 = vrot.slane %v4081_v21, 1  ;;  %v557_v55 = vrot.slane %v4094_v30, 1 }
  0x9d   : > { %3281 = vmatprep.subr.bf16.mxu1 %v3587_v63  ;;  %v588_v63 = vsel %vm567_vm2, %v555_v50, %v539_v44  ;;  %v4236_v44 = vld [vmem:[%s3824_s18 + $0xa0] sm:$0xff]  ;;  %v4239_v50 = vld [vmem:[%s3824_s18 + $0xa8] sm:$0xff] }
  0x9e   : > { %2427 = vmatmul.mubr.msk.bf16.gmra.mxu0 %vm3864_vm4, %v4135_v13  ;;  %v574_v21 = vsel %vm567_vm2, %v541_v52, %v557_v55  ;;  %v590_v1 = vsel %vm567_vm2, %v557_v55, %v541_v52  ;;  %v542_v52 = vrot.slane %v4128_v57, 1  ;;  %v558_v55 = vrot.slane %v4131_v58, 1 }
  0x9f   : > { %2487 = vmatmul.mubr.msk.bf16.gmra.mxu1 %vm4054_vm6, %v4137_v53  ;;  %1212 = vmatprep.mubr.bf16.mxu0 %v4143_v22  ;;  %v4281_v0 = vpack.c.bf16 %v590_v1, %v574_v21  ;;  %v543_v21 = vrot.slane %v4164_v39, 1 }
  0xa0   : > { %2491 = vmatprep.mubr.msk.bf16.mxu1 %vm3864_vm4, %v4060_v2  ;;  %3282 = vmatpush3.bf16.msra.mxu1 %v3589_v23  ;;  %v4207_v23 = vpack.c.bf16 %v473_v25, %v489_v61  ;;  %v442_v61 = vrot.slane %v4236_v44, 7  ;;  %v575_v57 = vsel %vm567_vm2, %v542_v52, %v558_v55  ;;  %v591_v58 = vsel %vm567_vm2, %v558_v55, %v542_v52 }
  0xa1   : > { %3283 = vmatprep.subr.bf16.mxu1 %v3590_v60  ;;  %v4209_v60 = vpack.c.bf16 %v588_v63, %v572_v24  ;;  %v4243_v24 = vpack.c.bf16 %v474_v47, %v490_v38  ;;  %v458_v63 = vrot.slane %v4239_v50, 7  ;;  %v550_v47 = vrot.slane %v4272_v28, 1 }
  0xa2   : > { %v545_v52 = vrot.slane %v4236_v44, 1  ;;  %v561_v55 = vrot.slane %v4239_v50, 1 }
  0xa3   : > { %v475_v30 = vsel %vm464_vm0, %v442_v61, %v458_v63 }
  0xa4   : > { %3284 = vmatpush3.bf16.msra.mxu1 %v3592_v29  ;;  %v589_v29 = vsel %vm567_vm2, %v556_v20, %v540_v54  ;;  %v4251_v54 = vpack.c.bf16 %v4239_v50, %v4236_v44  ;;  %v491_v20 = vsel %vm464_vm0, %v458_v63, %v442_v61  ;;  %v578_v44 = vsel %vm567_vm2, %v545_v52, %v561_v55 }
  0xa5   : > { %v4245_v25 = vpack.c.bf16 %v589_v29, %v573_v45  ;;  %v4275_v45 = vld [vmem:[%s3824_s18 + $0xf8] sm:$0xff]  ;;  %v4279_v29 = vpack.c.bf16 %v475_v30, %v491_v20  ;;  %v559_v30 = vrot.slane %v4167_v62, 1  ;;  %v3585_v20 = vld [vmem:[#allocation4 + $0x230] sm:$0xff]   ;;  %v3588_v62 = vld [vmem:[#allocation4 + $0x228] sm:$0xff]   ;;  %v594_v50 = vsel %vm567_vm2, %v561_v55, %v545_v52 }
  0xa6   : > { %2431 = vmatmul.mubr.msk.bf16.gmra.mxu0 %vm3864_vm4, %v4171_v17  ;;  %v566_v38 = vrot.slane %v4275_v45, 1  ;;  %v4293_v48 = vpack.c.bf16 %v4275_v45, %v4272_v28 }
  0xa7   : > { %2495 = vmatmul.mubr.msk.bf16.gmra.mxu1 %vm4054_vm6, %v4173_v19  ;;  %1220 = vmatprep.mubr.bf16.mxu0 %v4179_v56  ;;  %v592_v39 = vsel %vm567_vm2, %v559_v30, %v543_v21 }
  0xa8   : > { %2499 = vmatprep.mubr.msk.bf16.mxu1 %vm3864_vm4, %v4099_v41  ;;  %v599_v61 = vsel %vm567_vm2, %v566_v38, %v550_v47 }
  0xae   : > { %2435 = vmatmul.mubr.msk.bf16.gmra.mxu0 %vm3864_vm4, %v4207_v23 }
  0xaf   : > { %2503 = vmatmul.mubr.msk.bf16.gmra.mxu1 %vm4054_vm6, %v4209_v60  ;;  %1228 = vmatprep.mubr.bf16.mxu0 %v4215_v31 }
  0xb0   : > { %2507 = vmatprep.mubr.msk.bf16.mxu1 %vm3864_vm4, %v4135_v13 }
  0xb6   : > { %2439 = vmatmul.mubr.msk.bf16.gmra.mxu0 %vm3864_vm4, %v4243_v24 }
  0xb7   : > { %2511 = vmatmul.mubr.msk.bf16.gmra.mxu1 %vm4054_vm6, %v4245_v25  ;;  %1236 = vmatprep.mubr.bf16.mxu0 %v4251_v54 }
  0xb8   : > { %2515 = vmatprep.mubr.msk.bf16.mxu1 %vm3864_vm4, %v4171_v17  ;;  %v583_v17 = vsel %vm567_vm2, %v550_v47, %v566_v38  ;;  %v3591_v47 = vld [vmem:[#allocation4 + $0x220] sm:$0xff]   ;;  %v3593_v38 = vld [vmem:[#allocation4 + $0x218] sm:$0xff]  }
  0xb9   : > { %v4289_v63 = vpack.c.bf16 %v599_v61, %v583_v17  ;;  %v4311_v17 = vpack.c.bf16 %v591_v58, %v575_v57  ;;  %v3594_v57 = vld [vmem:[#allocation4 + $0x210] sm:$0xff]   ;;  %v3595_v58 = vld [vmem:[#allocation4 + $0x208] sm:$0xff]  }
  0xbe   : > { %2443 = vmatmul.mubr.msk.bf16.gmra.mxu0 %vm3864_vm4, %v4279_v29 }
  0xbf   : > { %2519 = vmatmul.mubr.msk.bf16.gmra.mxu1 %vm4054_vm6, %v4281_v0  ;;  %2587 = vmatprep.mubr.msk.bf16.mxu0 %vm4054_vm6, %v4062_v4  ;;  %v576_v4 = vsel %vm567_vm2, %v543_v21, %v559_v30  ;;  %v4366_v21 = vpack.c.bf16 %v594_v50, %v578_v44  ;;  %v3596_v30 = vld [vmem:[#allocation4 + $0x200] sm:$0xff]  }
  0xc0   : > { %2523 = vmatprep.mubr.msk.bf16.mxu1 %vm3864_vm4, %v4207_v23  ;;  %v4330_v1 = vpack.c.bf16 %v592_v39, %v576_v4  ;;  %v463_v4 = vrot.slane %v4275_v45, 7 }
  0xc6   : > { %1471 = vmatmul.mubr.bf16.vlgmr.msra.gmra.mxu0 %v3876_v46  ;;  %v544_v46 = vrot.slane %v4200_v7, 1 }
  0xc7   : > { %2527 = vmatmul.mubr.msk.bf16.gmra.mxu1 %vm4054_vm6, %v4311_v17  ;;  %3406 = vmatpush3.bf16.msra.mxu0 %v4070_v16  ;;  %v560_v16 = vrot.slane %v4203_v9, 1 }
  0xc8   : > { %2531 = vmatprep.mubr.msk.bf16.mxu1 %vm3864_vm4, %v4243_v24  ;;  %2591 = vmatprep.mubr.msk.bf16.mxu0 %vm4054_vm6, %v4101_v26 }
  0xc9   : > { %3407 = vmatprep.subr.bf16.mxu0 %v3585_v20  ;;  %v577_v7 = vsel %vm567_vm2, %v544_v46, %v560_v16  ;;  %v593_v9 = vsel %vm567_vm2, %v560_v16, %v544_v46 }
  0xca   : > { %v4348_v61 = vpack.c.bf16 %v593_v9, %v577_v7 }
  0xcb   : > { %3408 = vmatpush3.bf16.msra.mxu0 %v3585_v20  ;;  %v447_v20 = vrot.slane %v4272_v28, 7 }
  0xcc   : > { %3409 = vmatprep.subr.bf16.mxu0 %v3588_v62 }
  0xcd   : > { %v480_v39 = vsel %vm464_vm0, %v447_v20, %v463_v4  ;;  %v496_v28 = vsel %vm464_vm0, %v463_v4, %v447_v20  ;;  %v5055_v20 = vld [vmem:[#allocation9_spill] sm:$0xff] }
  0xce   : > { %1479 = vmatmul.mubr.bf16.gmra.mxu0 %v3914_v8  ;;  %v4404_v45 = vpack.c.bf16 %v480_v39, %v496_v28 }
  0xcf   : > { %2535 = vmatmul.mubr.msk.bf16.gmra.mxu1 %vm4054_vm6, %v4330_v1  ;;  %2595 = vmatprep.mubr.msk.bf16.mxu0 %vm4054_vm6, %v4137_v53 }
  0xd0   : > { %2539 = vmatprep.mubr.msk.bf16.mxu1 %vm3864_vm4, %v4279_v29  ;;  %3410 = vmatpush3.bf16.msra.mxu0 %v3588_v62 }
  0xd1   : > { %3411 = vmatprep.subr.bf16.mxu0 %v3591_v47 }
  0xd4   : > { %3412 = vmatpush3.bf16.msra.mxu0 %v3591_v47 }
  0xd5   : > { %3413 = vmatprep.subr.bf16.mxu0 %v3593_v38 }
  0xd6   : > { %1487 = vmatmul.mubr.bf16.gmra.mxu0 %v3958_v43 }
  0xd7   : > { %2543 = vmatmul.mubr.msk.bf16.gmra.mxu1 %vm4054_vm6, %v4348_v61  ;;  %2599 = vmatprep.mubr.msk.bf16.mxu0 %vm4054_vm6, %v4173_v19 }
  0xd8   : > { %2547 = vmatprep.mubr.msk.bf16.mxu1 %vm3864_vm4, %v3868_v37  ;;  %3414 = vmatpush3.bf16.msra.mxu0 %v3593_v38 }
  0xd9   : > { %3415 = vmatprep.subr.bf16.mxu0 %v3594_v57 }
  0xdc   : > { %3416 = vmatpush3.bf16.msra.mxu0 %v3594_v57 }
  0xdd   : > { %3417 = vmatprep.subr.bf16.mxu0 %v3595_v58 }
  0xde   : > { %1495 = vmatmul.mubr.bf16.gmra.mxu0 %v3996_v10 }
  0xdf   : > { %2551 = vmatmul.mubr.msk.bf16.gmra.mxu1 %vm4054_vm6, %v4366_v21  ;;  %2603 = vmatprep.mubr.msk.bf16.mxu0 %vm4054_vm6, %v4209_v60 }
  0xe0   : > { %2555 = vmatprep.mubr.msk.bf16.mxu1 %vm3864_vm4, %v3908_v3  ;;  %3418 = vmatpush3.bf16.msra.mxu0 %v3595_v58 }
  0xe1   : > { %3419 = vmatprep.subr.bf16.mxu0 %v3596_v30 }
  0xe4   : > { %3420 = vmatpush3.bf16.msra.mxu0 %v3596_v30  ;;  %v5054_v30 = vld [vmem:[#allocation8_spill] sm:$0xff] }
  0xe6   : > { %1503 = vmatmul.mubr.bf16.gmra.mxu0 %v4029_v42 }
  0xe7   : > { %2559 = vmatmul.mubr.msk.bf16.gmra.mxu1 %vm4054_vm6, %v3872_v40  ;;  %2607 = vmatprep.mubr.msk.bf16.mxu0 %vm4054_vm6, %v4245_v25 }
  0xe8   : > { %2563 = vmatprep.mubr.msk.bf16.mxu1 %vm3864_vm4, %v3950_v33 }
  0xee   : > { %1511 = vmatmul.mubr.bf16.gmra.mxu0 %v4068_v11 }
  0xef   : > { %2567 = vmatmul.mubr.msk.bf16.gmra.mxu1 %vm4054_vm6, %v3941_v27  ;;  %2611 = vmatprep.mubr.msk.bf16.mxu0 %vm4054_vm6, %v4281_v0 }
  0xf0   : > { %2571 = vmatprep.mubr.msk.bf16.mxu1 %vm3864_vm4, %v3990_v6 }
  0xf6   : > { %1519 = vmatmul.mubr.bf16.gmra.mxu0 %v4107_v49 }
  0xf7   : > { %2575 = vmatmul.mubr.msk.bf16.gmra.mxu1 %vm4054_vm6, %v3952_v35  ;;  %2615 = vmatprep.mubr.msk.bf16.mxu0 %vm4054_vm6, %v4311_v17 }
  0xf8   : > { %2579 = vmatprep.mubr.msk.bf16.mxu1 %vm3864_vm4, %v4404_v45 }
  0xfe   : > { %1527 = vmatmul.mubr.bf16.gmra.mxu0 %v4143_v22 }
  0xff   : > { %2583 = vmatmul.mubr.msk.bf16.gmra.mxu1 %vm4054_vm6, %v3998_v14  ;;  %2619 = vmatprep.mubr.msk.bf16.mxu0 %vm4054_vm6, %v4330_v1 }
 0x100   : > { %1631 = vmatprep.mubr.bf16.mxu1 %v3914_v8 }
 0x106   : > { %1535 = vmatmul.mubr.bf16.gmra.mxu0 %v4179_v56 }
 0x107   : > { %2651 = vmatmul.mubr.msk.bf16.vlgmr.msra.gmra.mxu1 %vm3864_vm4, %v3948_v32  ;;  %2623 = vmatprep.mubr.msk.bf16.mxu0 %vm4054_vm6, %v4348_v61 }
 0x108   : > { %1639 = vmatprep.mubr.bf16.mxu1 %v3958_v43 }
 0x10e   : > { %1543 = vmatmul.mubr.bf16.gmra.mxu0 %v4215_v31 }
 0x10f   : > { %2655 = vmatmul.mubr.msk.bf16.gmra.mxu1 %vm3864_vm4, %v3988_v5  ;;  %2627 = vmatprep.mubr.msk.bf16.mxu0 %vm4054_vm6, %v4366_v21 }
 0x110   : > { %1647 = vmatprep.mubr.bf16.mxu1 %v3996_v10 }
 0x116   : > { %1551 = vmatmul.mubr.bf16.gmra.mxu0 %v4251_v54 }
 0x117   : > { %2659 = vmatmul.mubr.msk.bf16.gmra.mxu1 %vm3864_vm4, %v4022_v34  ;;  %2631 = vmatprep.mubr.msk.bf16.mxu0 %vm4054_vm6, %v3872_v40 }
 0x118   : > { %1655 = vmatprep.mubr.bf16.mxu1 %v4029_v42 }
 0x11e   : > { %1559 = vmatmul.mubr.bf16.gmra.mxu0 %v3837_v15 }
 0x11f   : > { %2663 = vmatmul.mubr.msk.bf16.gmra.mxu1 %vm3864_vm4, %v4060_v2  ;;  %2635 = vmatprep.mubr.msk.bf16.mxu0 %vm4054_vm6, %v3941_v27 }
 0x120   : > { %1663 = vmatprep.mubr.bf16.mxu1 %v4068_v11 }
 0x126   : > { %v2949_v18 = vpop.f32.mrf.mxu0  ;;  %1567 = vmatmul.mubr.bf16.gmra.mxu0 %v3878_v51 }
 0x127   : > { %v3021_v8 = vpop.f32.mrf.mxu1  ;;  %2667 = vmatmul.mubr.msk.bf16.gmra.mxu1 %vm3864_vm4, %v4099_v41  ;;  %2639 = vmatprep.mubr.msk.bf16.mxu0 %vm4054_vm6, %v3952_v35 }
 0x128   : > { %1671 = vmatprep.mubr.bf16.mxu1 %v4107_v49  ;;  %v2950_v32 = vpop.f32.mrf.mxu0 }
 0x129   : > { %v3022_v43 = vpop.f32.mrf.mxu1  ;;  %v4464_v5 = vadd.f32 %v2950_v32, %v2949_v18 }
 0x12a   : > { %v4466_v10 = vadd.f32 %v3022_v43, %v3021_v8  ;;  %v2952_v34 = vpop.f32.mrf.mxu0 }
 0x12b   : > { %v3024_v42 = vpop.f32.mrf.mxu1 }
 0x12c   : > { %v2953_v2 = vpop.f32.mrf.mxu0 }
 0x12d   : > { %v3025_v11 = vpop.f32.mrf.mxu1  ;;  %v4468_v62 = vadd.f32 %v2953_v2, %v2952_v34 }
 0x12e   : > { %v4470_v46 = vadd.f32 %v3025_v11, %v3024_v42  ;;  %v2955_v41 = vpop.f32.mrf.mxu0  ;;  %1575 = vmatmul.mubr.bf16.gmra.mxu0 %v3916_v12 }
 0x12f   : > { %v3027_v16 = vpop.f32.mrf.mxu1  ;;  %2671 = vmatmul.mubr.msk.bf16.gmra.mxu1 %vm3864_vm4, %v4135_v13  ;;  %2643 = vmatprep.mubr.msk.bf16.mxu0 %vm4054_vm6, %v3998_v14 }
 0x130   : > { %1679 = vmatprep.mubr.bf16.mxu1 %v4143_v22  ;;  %v2956_v49 = vpop.f32.mrf.mxu0 }
 0x131   : > { %v3028_v47 = vpop.f32.mrf.mxu1  ;;  %v4480_v7 = vadd.f32 %v2956_v49, %v2955_v41 }
 0x132   : > { %v4482_v9 = vadd.f32 %v3028_v47, %v3027_v16  ;;  %v2958_v38 = vpop.f32.mrf.mxu0 }
 0x133   : > { %v3030_v52 = vpop.f32.mrf.mxu1 }
 0x134   : > { %v2959_v55 = vpop.f32.mrf.mxu0 }
 0x135   : > { %v3031_v57 = vpop.f32.mrf.mxu1  ;;  %v4484_v44 = vadd.f32 %v2959_v55, %v2958_v38 }
 0x136   : > { %v4486_v50 = vadd.f32 %v3031_v57, %v3030_v52  ;;  %v2961_v13 = vpop.f32.mrf.mxu0  ;;  %1583 = vmatmul.mubr.bf16.gmra.mxu0 %v5054_v30 }
 0x137   : > { %v3033_v58 = vpop.f32.mrf.mxu1  ;;  %2675 = vmatmul.mubr.msk.bf16.gmra.mxu1 %vm3864_vm4, %v5055_v20  ;;  %2647 = vmatprep.mubr.msk.bf16.mxu0 %vm4054_vm6, %v4289_v63 }
 0x138   : > { %1687 = vmatprep.mubr.bf16.mxu1 %v4179_v56  ;;  %v2962_v22 = vpop.f32.mrf.mxu0 }
 0x139   : > { %v3034_v4 = vpop.f32.mrf.mxu1  ;;  %v4496_v39 = vadd.f32 %v2962_v22, %v2961_v13 }
 0x13a   : > { %v4498_v28 = vadd.f32 %v3034_v4, %v3033_v58  ;;  %v2964_v18 = vpop.f32.mrf.mxu0 }
 0x13b   : > { %v3036_v8 = vpop.f32.mrf.mxu1 }
 0x13c   : > { %v2965_v32 = vpop.f32.mrf.mxu0 }
 0x13d   : > { %v3037_v43 = vpop.f32.mrf.mxu1  ;;  %v4500_v34 = vadd.f32 %v2965_v32, %v2964_v18 }
 0x13e   : > { %v4502_v42 = vadd.f32 %v3037_v43, %v3036_v8  ;;  %v2967_v2 = vpop.f32.mrf.mxu0  ;;  %1591 = vmatmul.mubr.bf16.gmra.mxu0 %v4293_v48 }
 0x13f   : > { %v3039_v11 = vpop.f32.mrf.mxu1  ;;  %2679 = vmatmul.mubr.msk.bf16.gmra.mxu1 %vm3864_vm4, %v4207_v23  ;;  %3421 = vmatprep.mubr.msk.bf16.mxu0 %vm4054_vm6, %v4101_v26 }
 0x140   : > { %1695 = vmatprep.mubr.bf16.mxu1 %v4215_v31  ;;  %v2968_v56 = vpop.f32.mrf.mxu0 }
 0x141   : > { %v3040_v41 = vpop.f32.mrf.mxu1  ;;  %v4512_v16 = vadd.f32 %v2968_v56, %v2967_v2 }
 0x142   : > { %v4514_v49 = vadd.f32 %v3040_v41, %v3039_v11  ;;  %v2970_v47 = vpop.f32.mrf.mxu0 }
 0x143   : > { %v3042_v38 = vpop.f32.mrf.mxu1 }
 0x144   : > { %v2971_v52 = vpop.f32.mrf.mxu0 }
 0x145   : > { %v3043_v55 = vpop.f32.mrf.mxu1  ;;  %v4516_v57 = vadd.f32 %v2971_v52, %v2970_v47 }
 0x146   : > { %v4518_v13 = vadd.f32 %v3043_v55, %v3042_v38  ;;  %v2973_v23 = vpop.f32.mrf.mxu0  ;;  %3422 = vmatmul.mubr.msk.bf16.vlgmr.msra.gmra.mxu0 %vm4054_vm6, %v4137_v53 }
 0x147   : > { %v3061_v31 = vpop.f32.mrf.mxu1  ;;  %2683 = vmatmul.mubr.msk.bf16.gmra.mxu1 %vm3864_vm4, %v4243_v24  ;;  %3425 = vmatprep.mubr.msk.bf16.mxu0 %vm4054_vm6, %v4173_v19 }
 0x148   : > { %1703 = vmatprep.mubr.bf16.mxu1 %v4251_v54  ;;  %v2974_v26 = vpop.f32.mrf.mxu0 }
 0x149   : > { %v3062_v58 = vpop.f32.mrf.mxu1  ;;  %v4530_v20 = vadd.f32 %v2974_v26, %v2973_v23 }
 0x14a   : > { %v3063_v22 = vadd.f32 %v3062_v58, %v3061_v31  ;;  %v2976_v4 = vpop.f32.mrf.mxu0 }
 0x14b   : > { %v3064_v18 = vpop.f32.mrf.mxu1 }
 0x14c   : > { %v4533_v8 = vadd.f32 %v3063_v22, %v4464_v5  ;;  %v2977_v24 = vpop.f32.mrf.mxu0 }
 0x14d   : > { %v3065_v32 = vpop.f32.mrf.mxu1  ;;  %v4535_v43 = vadd.f32 %v2977_v24, %v2976_v4 }
 0x14e   : > { %v3066_v53 = vadd.f32 %v3065_v32, %v3064_v18  ;;  %v2979_v54 = vpop.f32.mrf.mxu0  ;;  %3426 = vmatmul.mubr.msk.bf16.gmra.mxu0 %vm4054_vm6, %v4209_v60 }
 0x14f   : > { %v3067_v2 = vpop.f32.mrf.mxu1  ;;  %2687 = vmatmul.mubr.msk.bf16.gmra.mxu1 %vm3864_vm4, %v4279_v29  ;;  %3429 = vmatprep.mubr.msk.bf16.mxu0 %vm4054_vm6, %v4245_v25 }
 0x150   : > { %v4544_v19 = vadd.f32 %v3066_v53, %v4468_v62  ;;  %1711 = vmatprep.mubr.bf16.mxu1 %v3837_v15  ;;  %v2980_v5 = vpop.f32.mrf.mxu0 }
 0x151   : > { %v3068_v11 = vpop.f32.mrf.mxu1  ;;  %v4550_v56 = vadd.f32 %v2980_v5, %v2979_v54 }
 0x152   : > { %v3069_v41 = vadd.f32 %v3068_v11, %v3067_v2  ;;  %v2982_v47 = vpop.f32.mrf.mxu0 }
 0x153   : > { %v3070_v29 = vpop.f32.mrf.mxu1 }
 0x154   : > { %v4553_v38 = vadd.f32 %v3069_v41, %v4480_v7  ;;  %v2983_v60 = vpop.f32.mrf.mxu0 }
 0x155   : > { %v3071_v52 = vpop.f32.mrf.mxu1  ;;  %v4555_v62 = vadd.f32 %v2983_v60, %v2982_v47 }
 0x156   : > { %v3072_v55 = vadd.f32 %v3071_v52, %v3070_v29  ;;  %v2985_v15 = vpop.f32.mrf.mxu0  ;;  %3430 = vmatmul.mubr.msk.bf16.gmra.mxu0 %vm4054_vm6, %v4281_v0 }
 0x157   : > { %v3073_v23 = vpop.f32.mrf.mxu1  ;;  %2691 = vmatmul.mubr.msk.bf16.gmra.mxu1 %vm3864_vm4, %v3868_v37  ;;  %3433 = vmatprep.mubr.msk.bf16.mxu0 %vm4054_vm6, %v4311_v17 }
 0x158   : > { %v4564_v25 = vadd.f32 %v3072_v55, %v4484_v44  ;;  %1719 = vmatprep.mubr.bf16.mxu1 %v3878_v51  ;;  %v2986_v7 = vpop.f32.mrf.mxu0 }
 0x159   : > { %v3074_v31 = vpop.f32.mrf.mxu1  ;;  %v4570_v26 = vadd.f32 %v2986_v7, %v2985_v15 }
 0x15a   : > { %v3075_v58 = vadd.f32 %v3074_v31, %v3073_v23  ;;  %v2988_v22 = vpop.f32.mrf.mxu0 }
 0x15b   : > { %v3076_v37 = vpop.f32.mrf.mxu1 }
 0x15c   : > { %v4573_v4 = vadd.f32 %v3075_v58, %v4496_v39  ;;  %v2989_v0 = vpop.f32.mrf.mxu0 }
 0x15d   : > { %v3077_v18 = vpop.f32.mrf.mxu1  ;;  %v4575_v44 = vadd.f32 %v2989_v0, %v2988_v22 }
 0x15e   : > { %v3078_v24 = vadd.f32 %v3077_v18, %v3076_v37  ;;  %v2991_v51 = vpop.f32.mrf.mxu0  ;;  %3434 = vmatmul.mubr.msk.bf16.gmra.mxu0 %vm4054_vm6, %v4330_v1 }
 0x15f   : > { %v3079_v32 = vpop.f32.mrf.mxu1  ;;  %2695 = vmatmul.mubr.msk.bf16.gmra.mxu1 %vm3864_vm4, %v3908_v3  ;;  %3437 = vmatprep.mubr.msk.bf16.mxu0 %vm4054_vm6, %v4348_v61 }
 0x160   : > { %v4584_v17 = vadd.f32 %v3078_v24, %v4500_v34  ;;  %1727 = vmatprep.mubr.bf16.mxu1 %v3916_v12  ;;  %v2992_v39 = vpop.f32.mrf.mxu0 }
 0x161   : > { %v3080_v53 = vpop.f32.mrf.mxu1  ;;  %v4590_v54 = vadd.f32 %v2992_v39, %v2991_v51 }
 0x162   : > { %v3081_v2 = vadd.f32 %v3080_v53, %v3079_v32  ;;  %v2994_v5 = vpop.f32.mrf.mxu0 }
 0x163   : > { %v3082_v3 = vpop.f32.mrf.mxu1 }
 0x164   : > { %v4593_v11 = vadd.f32 %v3081_v2, %v4512_v16  ;;  %v2995_v1 = vpop.f32.mrf.mxu0 }
 0x165   : > { %v3083_v41 = vpop.f32.mrf.mxu1  ;;  %v4595_v34 = vadd.f32 %v2995_v1, %v2994_v5 }
 0x166   : > { %v3084_v47 = vadd.f32 %v3083_v41, %v3082_v3  ;;  %v2997_v12 = vpop.f32.mrf.mxu0  ;;  %3438 = vmatmul.mubr.msk.bf16.gmra.mxu0 %vm4054_vm6, %v4366_v21 }
 0x167   : > { %v3085_v29 = vpop.f32.mrf.mxu1  ;;  %2699 = vmatmul.mubr.msk.bf16.gmra.mxu1 %vm3864_vm4, %v3950_v33  ;;  %3441 = vmatprep.mubr.msk.bf16.mxu0 %vm4054_vm6, %v3872_v40 }
 0x168   : > { %v4604_v61 = vadd.f32 %v3084_v47, %v4516_v57  ;;  %1735 = vmatprep.mubr.bf16.mxu1 %v5054_v30  ;;  %v2998_v16 = vpop.f32.mrf.mxu0 }
 0x169   : > { %v3086_v60 = vpop.f32.mrf.mxu1  ;;  %v4610_v52 = vadd.f32 %v2998_v16, %v2997_v12 }
 0x16a   : > { %v3087_v55 = vadd.f32 %v3086_v60, %v3085_v29  ;;  %v3000_v15 = vpop.f32.mrf.mxu0 }
 0x16b   : > { %v3088_v33 = vpop.f32.mrf.mxu1 }
 0x16c   : > { %v4613_v23 = vadd.f32 %v3087_v55, %v4530_v20  ;;  %v3001_v21 = vpop.f32.mrf.mxu0 }
 0x16d   : > { %v3089_v7 = vpop.f32.mrf.mxu1  ;;  %v4615_v57 = vadd.f32 %v3001_v21, %v3000_v15 }
 0x16e   : > { %v3090_v31 = vadd.f32 %v3089_v7, %v3088_v33  ;;  %v3003_v30 = vpop.f32.mrf.mxu0  ;;  %3442 = vmatmul.mubr.msk.bf16.gmra.mxu0 %vm4054_vm6, %v3941_v27 }
 0x16f   : > { %v3091_v58 = vpop.f32.mrf.mxu1  ;;  %2703 = vmatmul.mubr.msk.bf16.gmra.mxu1 %vm3864_vm4, %v3990_v6  ;;  %3445 = vmatprep.mubr.msk.bf16.mxu0 %vm4054_vm6, %v3952_v35 }
 0x170   : > { %v4624_v40 = vadd.f32 %v3090_v31, %v4535_v43  ;;  %1743 = vmatprep.mubr.bf16.mxu1 %v4293_v48  ;;  %v3004_v20 = vpop.f32.mrf.mxu0 }
 0x171   : > { %v3092_v22 = vpop.f32.mrf.mxu1  ;;  %v4630_v37 = vadd.f32 %v3004_v20, %v3003_v30 }
 0x172   : > { %v3093_v0 = vadd.f32 %v3092_v22, %v3091_v58  ;;  %v3006_v18 = vpop.f32.mrf.mxu0 }
 0x173   : > { %v3094_v6 = vpop.f32.mrf.mxu1 }
 0x174   : > { %v4633_v24 = vadd.f32 %v3093_v0, %v4550_v56  ;;  %v3007_v27 = vpop.f32.mrf.mxu0  ;;  %v5056_v56 = vmov 0  }
 0x175   : > { %v3095_v51 = vpop.f32.mrf.mxu1  ;;  %v4635_v43 = vadd.f32 %v3007_v27, %v3006_v18 }
 0x176   : > { %v3096_v32 = vadd.f32 %v3095_v51, %v3094_v6  ;;  %v3009_v48 = vpop.f32.mrf.mxu0  ;;  %3446 = vmatmul.mubr.msk.bf16.gmra.mxu0 %vm4054_vm6, %v3998_v14 }
 0x177   : > { %v3097_v39 = vpop.f32.mrf.mxu1  ;;  %2707 = vmatmul.mubr.msk.bf16.gmra.mxu1 %vm3864_vm4, %v4404_v45  ;;  %3449 = vmatprep.mubr.msk.bf16.mxu0 %vm4054_vm6, %v4289_v63 }
 0x178   : > { %v4644_v35 = vadd.f32 %v3096_v32, %v4555_v62  ;;  %1751 = vmatprep.mubr.bf16.mxu1 %v5056_v56  ;;  %v3010_v53 = vpop.f32.mrf.mxu0 }
 0x179   : > { %v3098_v2 = vpop.f32.mrf.mxu1  ;;  %v4650_v5 = vadd.f32 %v3010_v53, %v3009_v48 }
 0x17a   : > { %v3099_v3 = vadd.f32 %v3098_v2, %v3097_v39  ;;  %v3012_v36 = vpop.f32.mrf.mxu0 }
 0x17b   : > { %v3100_v45 = vpop.f32.mrf.mxu1 }
 0x17c   : > { %v4653_v1 = vadd.f32 %v3099_v3, %v4570_v26  ;;  %v3013_v14 = vpop.f32.mrf.mxu0 }
 0x17d   : > { %v3101_v41 = vpop.f32.mrf.mxu1  ;;  %v4655_v62 = vadd.f32 %v3013_v14, %v3012_v36 }
 0x17e   : > { %v3102_v47 = vadd.f32 %v3101_v41, %v3100_v45  ;;  %v3015_v12 = vpop.f32.mrf.mxu0  ;;  %3450 = vmatmul.mubr.bf16.gmra.mxu0 %v5056_v56 }
 0x17f   : > { %v3103_v29 = vpop.f32.mrf.mxu1  ;;  %1752 = vmatmul.mubr.bf16.gmra.mxu1 %v5056_v56 }
 0x180   : > { %v4660_v59 = vadd.f32 %v3102_v47, %v4575_v44  ;;  %v3016_v63 = vpop.f32.mrf.mxu0 }
 0x181   : > { %v3104_v16 = vpop.f32.mrf.mxu1  ;;  %v4662_v60 = vadd.f32 %v3016_v63, %v3015_v12 }
 0x182   : > { %v3105_v26 = vadd.f32 %v3104_v16, %v3103_v29  ;;  %v3018_v55 = vpop.f32.mrf.mxu0 }
 0x183   : > { %v3106_v15 = vpop.f32.mrf.mxu1 }
 0x184   : > { %v4665_v33 = vadd.f32 %v3105_v26, %v4590_v54  ;;  %v3019_v21 = vpop.f32.mrf.mxu0 }
 0x185   : > { %v3107_v7 = vpop.f32.mrf.mxu1  ;;  %v4667_v31 = vadd.f32 %v3019_v21, %v3018_v55 }
 0x186   : > { %v3108_v30 = vadd.f32 %v3107_v7, %v3106_v15  ;;  %v3173_v20 = vpop.f32.mrf.mxu0 }
 0x187   : > { %v3109_v58 = vpop.f32.mrf.mxu1 }
 0x188   : > { %v4670_v44 = vadd.f32 %v3108_v30, %v4595_v34  ;;  %v3174_v0 = vpop.f32.mrf.mxu0 }
 0x189   : > { %v3110_v22 = vpop.f32.mrf.mxu1  ;;  %v3175_v6 = vadd.f32 %v3174_v0, %v3173_v20 }
 0x18a   : > { %v3111_v18 = vadd.f32 %v3110_v22, %v3109_v58  ;;  %v3176_v51 = vpop.f32.mrf.mxu0 }
 0x18b   : > { %v3112_v27 = vpop.f32.mrf.mxu1  ;;  %v4676_v54 = vadd.f32 %v3175_v6, %v4533_v8 }
 0x18c   : > { %v4673_v32 = vadd.f32 %v3111_v18, %v4610_v52  ;;  %v3177_v39 = vpop.f32.mrf.mxu0 }
 0x18d   : > { %v3113_v48 = vpop.f32.mrf.mxu1  ;;  %v3178_v53 = vadd.f32 %v3177_v39, %v3176_v51 }
 0x18e   : > { %v3114_v56 = vadd.f32 %v3113_v48, %v3112_v27  ;;  %v3179_v3 = vpop.f32.mrf.mxu0 }
 0x18f   : > { %v3115_v2 = vpop.f32.mrf.mxu1  ;;  %v4682_v36 = vadd.f32 %v3178_v53, %v4544_v19 }
 0x190   : > { %v4679_v34 = vadd.f32 %v3114_v56, %v4615_v57  ;;  %v3180_v14 = vpop.f32.mrf.mxu0 }
 0x191   : > { %v3116_v45 = vpop.f32.mrf.mxu1  ;;  %v3181_v52 = vadd.f32 %v3180_v14, %v3179_v3 }
 0x192   : > { %v3117_v41 = vadd.f32 %v3116_v45, %v3115_v2  ;;  %v3182_v12 = vpop.f32.mrf.mxu0 }
 0x193   : > { %v3118_v47 = vpop.f32.mrf.mxu1  ;;  %v4688_v29 = vadd.f32 %v3181_v52, %v4553_v38 }
 0x194   : > { %v4685_v8 = vadd.f32 %v3117_v41, %v4630_v37  ;;  %v3183_v16 = vpop.f32.mrf.mxu0 }
 0x195   : > { %v3119_v63 = vpop.f32.mrf.mxu1  ;;  %v3184_v57 = vadd.f32 %v3183_v16, %v3182_v12 }
 0x196   : > { %v3120_v26 = vadd.f32 %v3119_v63, %v3118_v47  ;;  %v3185_v15 = vpop.f32.mrf.mxu0 }
 0x197   : > { %v3121_v55 = vpop.f32.mrf.mxu1  ;;  %v4694_v21 = vadd.f32 %v3184_v57, %v4564_v25 }
 0x198   : > { %v4691_v19 = vadd.f32 %v3120_v26, %v4635_v43  ;;  %v3186_v30 = vpop.f32.mrf.mxu0 }
 0x199   : > { %v3122_v7 = vpop.f32.mrf.mxu1  ;;  %v3187_v37 = vadd.f32 %v3186_v30, %v3185_v15 }
 0x19a   : > { %v3123_v58 = vadd.f32 %v3122_v7, %v3121_v55  ;;  %v3188_v22 = vpop.f32.mrf.mxu0 }
 0x19b   : > { %v3124_v20 = vpop.f32.mrf.mxu1  ;;  %v4700_v0 = vadd.f32 %v3187_v37, %v4573_v4 }
 0x19c   : > { %v4697_v38 = vadd.f32 %v3123_v58, %v4650_v5  ;;  %v3189_v6 = vpop.f32.mrf.mxu0 }
 0x19d   : > { %v3125_v18 = vpop.f32.mrf.mxu1  ;;  %v3190_v43 = vadd.f32 %v3189_v6, %v3188_v22 }
 0x19e   : > { %v3126_v27 = vadd.f32 %v3125_v18, %v3124_v20  ;;  %v3191_v48 = vpop.f32.mrf.mxu0 }
 0x19f   : > { %v3127_v51 = vpop.f32.mrf.mxu1  ;;  %v4706_v39 = vadd.f32 %v3190_v43, %v4584_v17 }
 0x1a0   : > { %v4703_v25 = vadd.f32 %v3126_v27, %v4655_v62  ;;  %v3192_v53 = vpop.f32.mrf.mxu0 }
 0x1a1   : > { %v3128_v56 = vpop.f32.mrf.mxu1  ;;  %v3193_v5 = vadd.f32 %v3192_v53, %v3191_v48 }
 0x1a2   : > { %v3129_v2 = vadd.f32 %v3128_v56, %v3127_v51  ;;  %v3194_v45 = vpop.f32.mrf.mxu0 }
 0x1a3   : > { %v3130_v3 = vpop.f32.mrf.mxu1  ;;  %v4712_v14 = vadd.f32 %v3193_v5, %v4593_v11 }
 0x1a4   : > { %v4709_v4 = vadd.f32 %v3129_v2, %v4662_v60  ;;  %v3195_v52 = vpop.f32.mrf.mxu0 }
 0x1a5   : > { %v3131_v41 = vpop.f32.mrf.mxu1  ;;  %v3196_v62 = vadd.f32 %v3195_v52, %v3194_v45 }
 0x1a6   : > { %v3132_v47 = vadd.f32 %v3131_v41, %v3130_v3  ;;  %v3197_v63 = vpop.f32.mrf.mxu0 }
 0x1a7   : > { %v3133_v12 = vpop.f32.mrf.mxu1  ;;  %v4718_v16 = vadd.f32 %v3196_v62, %v4604_v61 }
 0x1a8   : > { %v4715_v17 = vadd.f32 %v3132_v47, %v4667_v31  ;;  %v3198_v57 = vpop.f32.mrf.mxu0 }
 0x1a9   : > { %v3134_v26 = vpop.f32.mrf.mxu1  ;;  %v3199_v60 = vadd.f32 %v3198_v57, %v3197_v63 }
 0x1aa   : > { %v3135_v55 = vadd.f32 %v3134_v26, %v3133_v12  ;;  %v3200_v7 = vpop.f32.mrf.mxu0 }
 0x1ab   : > { %v3136_v15 = vpop.f32.mrf.mxu1  ;;  %v4724_v30 = vadd.f32 %v3199_v60, %v4613_v23 }
 0x1ac   : > { %v4721_v11 = vadd.f32 %v3135_v55, %v4466_v10  ;;  %v3201_v37 = vpop.f32.mrf.mxu0 }
 0x1ad   : > { %v3137_v58 = vpop.f32.mrf.mxu1  ;;  %v3202_v31 = vadd.f32 %v3201_v37, %v3200_v7 }
 0x1ae   : > { %v3138_v20 = vadd.f32 %v3137_v58, %v3136_v15  ;;  %v3203_v18 = vpop.f32.mrf.mxu0 }
 0x1af   : > { %v3139_v22 = vpop.f32.mrf.mxu1  ;;  %v4730_v6 = vadd.f32 %v3202_v31, %v4624_v40 }
 0x1b0   : > { %v4727_v61 = vadd.f32 %v3138_v20, %v4470_v46  ;;  %v3204_v43 = vpop.f32.mrf.mxu0 }
 0x1b1   : > { %v3140_v27 = vpop.f32.mrf.mxu1  ;;  %v3205_v10 = vadd.f32 %v3204_v43, %v3203_v18 }
 0x1b2   : > { %v3141_v51 = vadd.f32 %v3140_v27, %v3139_v22  ;;  %v3206_v56 = vpop.f32.mrf.mxu0 }
 0x1b3   : > { %v3142_v48 = vpop.f32.mrf.mxu1  ;;  %v4736_v53 = vadd.f32 %v3205_v10, %v4633_v24 }
 0x1b4   : > { %v4733_v23 = vadd.f32 %v3141_v51, %v4482_v9  ;;  %v3207_v5 = vpop.f32.mrf.mxu0 }
 0x1b5   : > { %v3143_v2 = vpop.f32.mrf.mxu1  ;;  %v3208_v46 = vadd.f32 %v3207_v5, %v3206_v56 }
 0x1b6   : > { %v3144_v3 = vadd.f32 %v3143_v2, %v3142_v48  ;;  %v3209_v41 = vpop.f32.mrf.mxu0 }
 0x1b7   : > { %v3145_v45 = vpop.f32.mrf.mxu1  ;;  %v4742_v52 = vadd.f32 %v3208_v46, %v4644_v35 }
 0x1b8   : > { %v4739_v40 = vadd.f32 %v3144_v3, %v4486_v50  ;;  %v3210_v62 = vpop.f32.mrf.mxu0 }
 0x1b9   : > { %v3146_v47 = vpop.f32.mrf.mxu1  ;;  %v3211_v9 = vadd.f32 %v3210_v62, %v3209_v41 }
 0x1ba   : > { %v3147_v12 = vadd.f32 %v3146_v47, %v3145_v45  ;;  %v3212_v26 = vpop.f32.mrf.mxu0 }
 0x1bb   : > { %v3148_v63 = vpop.f32.mrf.mxu1  ;;  %v4748_v57 = vadd.f32 %v3211_v9, %v4653_v1 }
 0x1bc   : > { %v4745_v24 = vadd.f32 %v3147_v12, %v4498_v28  ;;  %v3213_v60 = vpop.f32.mrf.mxu0 }
 0x1bd   : > { %v3149_v55 = vpop.f32.mrf.mxu1  ;;  %v3214_v50 = vadd.f32 %v3213_v60, %v3212_v26 }
 0x1be   : > { %v3150_v15 = vadd.f32 %v3149_v55, %v3148_v63  ;;  %v3215_v58 = vpop.f32.mrf.mxu0 }
 0x1bf   : > { %v3151_v7 = vpop.f32.mrf.mxu1  ;;  %v4754_v37 = vadd.f32 %v3214_v50, %v4660_v59 }
 0x1c0   : > { %v4751_v35 = vadd.f32 %v3150_v15, %v4502_v42  ;;  %v3216_v31 = vpop.f32.mrf.mxu0 }
 0x1c1   : > { %v3152_v20 = vpop.f32.mrf.mxu1  ;;  %v3217_v28 = vadd.f32 %v3216_v31, %v3215_v58 }
 0x1c2   : > { %v3153_v22 = vadd.f32 %v3152_v20, %v3151_v7  ;;  %v3218_v27 = vpop.f32.mrf.mxu0 }
 0x1c3   : > { %v3154_v18 = vpop.f32.mrf.mxu1  ;;  %v4760_v43 = vadd.f32 %v3217_v28, %v4665_v33 }
 0x1c4   : > { %v4757_v1 = vadd.f32 %v3153_v22, %v4514_v49  ;;  %v3219_v10 = vpop.f32.mrf.mxu0 }
 0x1c5   : > { %v3155_v51 = vpop.f32.mrf.mxu1  ;;  %v3220_v42 = vadd.f32 %v3219_v10, %v3218_v27 }
 0x1c6   : > { %v3156_v48 = vadd.f32 %v3155_v51, %v3154_v18  ;;  %v3221_v56 = vpop.f32.mrf.mxu0 }
 0x1c7   : > { %v3285_v2 = vpop.f32.mrf.mxu1  ;;  %v4766_v5 = vadd.f32 %v3220_v42, %v4670_v44 }
 0x1c8   : > { %v4763_v59 = vadd.f32 %v3156_v48, %v4518_v13  ;;  %v3222_v3 = vpop.f32.mrf.mxu0 }
 0x1c9   : > { %v3286_v46 = vpop.f32.mrf.mxu1  ;;  %v3223_v45 = vadd.f32 %v3222_v3, %v3221_v56 }
 0x1ca   : > { %v3287_v49 = vadd.f32 %v3286_v46, %v3285_v2  ;;  %v3224_v41 = vpop.f32.mrf.mxu0 }
 0x1cb   : > { %v4768_v47 = vpop.f32.mrf.mxu1  ;;  %v4771_v33 = vadd.f32 %v3223_v45, %v4673_v32 }
 0x1cc   : > { %v4774_v62 = vadd.f32 %v3287_v49, %v4676_v54  ;;  %v3225_v12 = vpop.f32.mrf.mxu0 }
 0x1cd   : > { %v4776_v9 = vpop.f32.mrf.mxu1  ;;  %v3226_v13 = vadd.f32 %v3225_v12, %v3224_v41 }
 0x1ce   : > { %v3227_v63 = vpop.f32.mrf.mxu0 }
 0x1cf   : > { %v4778_v44 = vpop.f32.mrf.mxu1  ;;  %v4781_v26 = vadd.f32 %v3226_v13, %v4679_v34 }
 0x1d0   : > { %v3228_v55 = vpop.f32.mrf.mxu0 }
 0x1d1   : > { %v4783_v60 = vpop.f32.mrf.mxu1  ;;  %v3229_v15 = vadd.f32 %v3228_v55, %v3227_v63 }
 0x1d2   : > { %v3230_v50 = vpop.f32.mrf.mxu0 }
 0x1d3   : > { %v4785_v32 = vpop.f32.mrf.mxu1  ;;  %v4788_v54 = vadd.f32 %v3229_v15, %v4685_v8 }
 0x1d4   : > { %v3231_v7 = vpop.f32.mrf.mxu0 }
 0x1d5   : > { %v4790_v58 = vpop.f32.mrf.mxu1  ;;  %v3232_v20 = vadd.f32 %v3231_v7, %v3230_v50 }
 0x1d6   : > { %v3233_v31 = vpop.f32.mrf.mxu0 }
 0x1d7   : > { %v4792_v22 = vpop.f32.mrf.mxu1  ;;  %v4795_v34 = vadd.f32 %v3232_v20, %v4691_v19 }
 0x1d8   : > { %v3234_v28 = vpop.f32.mrf.mxu0 }
 0x1d9   : > { %v4797_v18 = vpop.f32.mrf.mxu1  ;;  %v3235_v27 = vadd.f32 %v3234_v28, %v3233_v31 }
 0x1da   : > { %v3236_v51 = vpop.f32.mrf.mxu0 }
 0x1db   : > { %v4799_v10 = vpop.f32.mrf.mxu1  ;;  %v4802_v8 = vadd.f32 %v3235_v27, %v4697_v38 }
 0x1dc   : > { %v3237_v48 = vpop.f32.mrf.mxu0 }
 0x1dd   : > { %v4804_v42 = vpop.f32.mrf.mxu1  ;;  %v3238_v56 = vadd.f32 %v3237_v48, %v3236_v51 }
 0x1de   : > { %v3239_v2 = vpop.f32.mrf.mxu0 }
 0x1df   : > { %v4806_v3 = vpop.f32.mrf.mxu1  ;;  %v4809_v19 = vadd.f32 %v3238_v56, %v4703_v25 }
 0x1e0   : > { %v3240_v46 = vpop.f32.mrf.mxu0 }
 0x1e1   : > { %5057 = vst [vmem:[#allocation8_spill] sm:$0xff] %v4809_v19  ;;  %v4811_v45 = vpop.f32.mrf.mxu1  ;;  %v3241_v49 = vadd.f32 %v3240_v46, %v3239_v2 }
 0x1e2   : > { %v3242_v41 = vpop.f32.mrf.mxu0 }
 0x1e3   : > { %v4813_v12 = vpop.f32.mrf.mxu1  ;;  %v4816_v38 = vadd.f32 %v3241_v49, %v4709_v4 }
 0x1e4   : > { %v3243_v13 = vpop.f32.mrf.mxu0 }
 0x1e5   : > { %5058 = vst [vmem:[#allocation9_spill] sm:$0xff] %v4816_v38  ;;  %v4818_v63 = vpop.f32.mrf.mxu1  ;;  %v3244_v55 = vadd.f32 %v3243_v13, %v3242_v41 }
 0x1e6   : > { %v3245_v15 = vpop.f32.mrf.mxu0 }
 0x1e7   : > { %v4820_v50 = vpop.f32.mrf.mxu1  ;;  %v4823_v25 = vadd.f32 %v3244_v55, %v4715_v17 }
 0x1e8   : > { %v3246_v7 = vpop.f32.mrf.mxu0 }
 0x1e9   : > { %5059 = vst [vmem:[#allocation10_spill] sm:$0xff] %v4823_v25  ;;  %v4825_v20 = vpop.f32.mrf.mxu1  ;;  %v3247_v31 = vadd.f32 %v3246_v7, %v3245_v15 }
 0x1ea   : > { %v3248_v28 = vpop.f32.mrf.mxu0 }
 0x1eb   : > { %v4827_v27 = vpop.f32.mrf.mxu1  ;;  %v4830_v4 = vadd.f32 %v3247_v31, %v4721_v11 }
 0x1ec   : > { %v3249_v51 = vpop.f32.mrf.mxu0 }
 0x1ed   : > { %5060 = vst [vmem:[#allocation11_spill] sm:$0xff] %v4830_v4  ;;  %v4832_v48 = vpop.f32.mrf.mxu1  ;;  %v3250_v56 = vadd.f32 %v3249_v51, %v3248_v28 }
 0x1ee   : > { %v3251_v2 = vpop.f32.mrf.mxu0 }
 0x1ef   : > { %v4834_v46 = vpop.f32.mrf.mxu1  ;;  %v4837_v17 = vadd.f32 %v3250_v56, %v4727_v61 }
 0x1f0   : > { %v3252_v49 = vpop.f32.mrf.mxu0 }
 0x1f1   : > { %5061 = vst [vmem:[#allocation12_spill] sm:$0xff] %v4837_v17  ;;  %v4839_v41 = vpop.f32.mrf.mxu1  ;;  %v3253_v13 = vadd.f32 %v3252_v49, %v3251_v2 }
 0x1f2   : > { %v3254_v55 = vpop.f32.mrf.mxu0 }
 0x1f3   : > { %v4841_v15 = vpop.f32.mrf.mxu1  ;;  %v4844_v11 = vadd.f32 %v3253_v13, %v4733_v23 }
 0x1f4   : > { %v3255_v7 = vpop.f32.mrf.mxu0 }
 0x1f5   : > { %5062 = vst [vmem:[#allocation13_spill] sm:$0xff] %v4844_v11  ;;  %v4846_v31 = vpop.f32.mrf.mxu1  ;;  %v3256_v28 = vadd.f32 %v3255_v7, %v3254_v55 }
 0x1f6   : > { %v3257_v51 = vpop.f32.mrf.mxu0 }
 0x1f7   : > { %v4848_v4 = vpop.f32.mrf.mxu1  ;;  %v4851_v61 = vadd.f32 %v3256_v28, %v4739_v40 }
 0x1f8   : > { %v3258_v56 = vpop.f32.mrf.mxu0 }
 0x1f9   : > { %5063 = vst [vmem:[#allocation14_spill] sm:$0xff] %v4851_v61  ;;  %v4853_v17 = vpop.f32.mrf.mxu1  ;;  %v3259_v2 = vadd.f32 %v3258_v56, %v3257_v51 }
 0x1fa   : > { %v3260_v49 = vpop.f32.mrf.mxu0 }
 0x1fb   : > { %v4855_v19 = vpop.f32.mrf.mxu1  ;;  %v4858_v23 = vadd.f32 %v3259_v2, %v4745_v24 }
 0x1fc   : > { %v3261_v13 = vpop.f32.mrf.mxu0 }
 0x1fd   : > { %5064 = vst [vmem:[#allocation15_spill] sm:$0xff] %v4858_v23  ;;  %v4860_v11 = vpop.f32.mrf.mxu1  ;;  %v3262_v55 = vadd.f32 %v3261_v13, %v3260_v49  ;;  %v3293_v13 = vadd.f32 %v4783_v60, %v4778_v44 }
 0x1fe   : > { %v3263_v7 = vpop.f32.mrf.mxu0 }
 0x1ff   : > { %v4862_v25 = vpop.f32.mrf.mxu1  ;;  %v4865_v40 = vadd.f32 %v3262_v55, %v4751_v35  ;;  %v3296_v35 = vadd.f32 %v4790_v58, %v4785_v32  ;;  %v1642_v44 = vadd.f32 %v3293_v13, %v4688_v29 }
 0x200   : > { %v3264_v28 = vpop.f32.mrf.mxu0 }
 0x201   : > { %5065 = vst [vmem:[#allocation16_spill] sm:$0xff] %v4865_v40  ;;  %v4867_v61 = vpop.f32.mrf.mxu1  ;;  %v3265_v51 = vadd.f32 %v3264_v28, %v3263_v7  ;;  %v1645_v60 = vadd.f32 %v3296_v35, %v4694_v21 }
 0x202   : > { %v3266_v56 = vpop.f32.mrf.mxu0 }
 0x203   : > { %v4870_v38 = vpop.f32.mrf.mxu1  ;;  %v4873_v24 = vadd.f32 %v3265_v51, %v4757_v1  ;;  %v3290_v1 = vadd.f32 %v4776_v9, %v4768_v47  ;;  %v3305_v9 = vadd.f32 %v4811_v45, %v4806_v3 }
 0x204   : > { %v3267_v2 = vpop.f32.mrf.mxu0 }
 0x205   : > { %5066 = vst [vmem:[#allocation17_spill] sm:$0xff] %v4873_v24  ;;  %v4875_v49 = vpop.f32.mrf.mxu1  ;;  %v3268_v55 = vadd.f32 %v3267_v2, %v3266_v56  ;;  %v1637_v47 = vadd.f32 %v3290_v1, %v4682_v36 }
 0x206   : > { %v3423_v28 = vpop.f32.mrf.mxu0 }
 0x207   : > { %v4884_v7 = vpop.f32.mrf.mxu1  ;;  %v4889_v51 = vadd.f32 %v3268_v55, %v4763_v59  ;;  %v1803_v56 = vadd.f32 %v3423_v28, %v1642_v44  ;;  %v3299_v59 = vadd.f32 %v4797_v18, %v4792_v22  ;;  %v3302_v55 = vadd.f32 %v4804_v42, %v4799_v10 }
 0x208   : > { %v1794_v24 = vpop.f32.mrf.mxu0  ;;  %v1658_v28 = vadd.f32 %v3305_v9, %v4712_v14 }
 0x209   : > { %5067 = vst [vmem:[#allocation18_spill] sm:$0xff] %v4889_v51  ;;  %v4891_v40 = vpop.f32.mrf.mxu1  ;;  %v1795_v2 = vadd.f32 %v1794_v24, %v4774_v62  ;;  %v3308_v62 = vadd.f32 %v4818_v63, %v4813_v12  ;;  %v1650_v12 = vadd.f32 %v3299_v59, %v4700_v0  ;;  %v2121_v44 = vmul.f32 %v1803_v56, %v1803_v56 }
 0x20a   : > { %v3424_v58 = vpop.f32.mrf.mxu0  ;;  %v3311_v0 = vadd.f32 %v4825_v20, %v4820_v50  ;;  %v3317_v59 = vadd.f32 %v4839_v41, %v4834_v46  ;;  %v1653_v9 = vadd.f32 %v3302_v55, %v4706_v39  ;;  %v3314_v20 = vadd.f32 %v4832_v48, %v4827_v27 }
 0x20b   : > { %v4896_v32 = vpop.f32.mrf.mxu1  ;;  %v1806_v23 = vadd.f32 %v3424_v58, %v1645_v60  ;;  %v2119_v18 = vmul.f32 %v1795_v2, %v1795_v2 }
 0x20c   : > { %v1797_v21 = vpop.f32.mrf.mxu0  ;;  %v1666_v39 = vadd.f32 %v3311_v0, %v4724_v30  ;;  %v3323_v30 = vadd.f32 %v4853_v17, %v4848_v4 }
 0x20d   : > { %v4909_v29 = vpop.f32.mrf.mxu1  ;;  %v2844_v36 = vpack.c.bf16 %v1806_v23, %v1803_v56  ;;  %v1798_v24 = vadd.f32 %v1797_v21, %v1637_v47  ;;  %v1661_v47 = vadd.f32 %v3308_v62, %v4718_v16  ;;  %v2122_v21 = vmul.f32 %v1806_v23, %v1806_v23 }
 0x20e   : > { %v3427_v22 = vpop.f32.mrf.mxu0 }
 0x20f   : > { %v4913_v13 = vpop.f32.mrf.mxu1  ;;  %2916 = vst [vmem:[%s4907_s15 + $0x8] sm:$0xff] %v2844_v36   ;;  %v2839_v3 = vpack.c.bf16 %v1798_v24, %v1795_v2  ;;  %v2081_v45 = vadd.f32 %v1798_v24, %v1795_v2  ;;  %v2120_v35 = vmul.f32 %v1798_v24, %v1798_v24  ;;  %v1819_v10 = vadd.f32 %v3427_v22, %v1658_v28 }
 0x210   : > { %v1810_v63 = vpop.f32.mrf.mxu0 }
 0x211   : > { %v4919_v1 = vpop.f32.mrf.mxu1  ;;  %2840 = vst [vmem:[%s4907_s15] sm:$0xff] %v2839_v3   ;;  %v2082_v60 = vadd.f32 %v2081_v45, %v1803_v56  ;;  %v2151_v58 = vadd.f32 %v2120_v35, %v2119_v18  ;;  %v1811_v36 = vadd.f32 %v1810_v63, %v1650_v12  ;;  %v3320_v56 = vadd.f32 %v4846_v31, %v4841_v15 }
 0x212   : > { %v3428_v24 = vpop.f32.mrf.mxu0  ;;  %v2125_v63 = vmul.f32 %v1819_v10, %v1819_v10 }
 0x213   : > { %v4924_v2 = vpop.f32.mrf.mxu1  ;;  %v2152_v51 = vadd.f32 %v2151_v58, %v2121_v44  ;;  %v2083_v42 = vadd.f32 %v2082_v60, %v1806_v23  ;;  %v1822_v14 = vadd.f32 %v3428_v24, %v1661_v47  ;;  %v2123_v3 = vmul.f32 %v1811_v36, %v1811_v36 }
 0x214   : > { %v1813_v62 = vpop.f32.mrf.mxu0  ;;  %v1677_v12 = vadd.f32 %v3320_v56, %v4742_v52 }
 0x215   : > { %v4932_v16 = vpop.f32.mrf.mxu1  ;;  %v2084_v18 = vadd.f32 %v2083_v42, %v1811_v36  ;;  %v2153_v22 = vadd.f32 %v2152_v51, %v2122_v21  ;;  %v2854_v23 = vpack.c.bf16 %v1822_v14, %v1819_v10  ;;  %v1814_v45 = vadd.f32 %v1813_v62, %v1653_v9 }
 0x216   : > { %v3431_v50 = vpop.f32.mrf.mxu0  ;;  %v1674_v51 = vadd.f32 %v3317_v59, %v4736_v53  ;;  %v2126_v24 = vmul.f32 %v1822_v14, %v1822_v14  ;;  %v3332_v59 = vadd.f32 %v4875_v49, %v4870_v38  ;;  %v1682_v38 = vadd.f32 %v3323_v30, %v4748_v57 }
 0x217   : > { %v4935_v35 = vpop.f32.mrf.mxu1  ;;  %v2154_v46 = vadd.f32 %v2153_v22, %v2123_v3  ;;  %2918 = vst [vmem:[%s4907_s15 + $0x18] sm:$0xff] %v2854_v23   ;;  %v2849_v41 = vpack.c.bf16 %v1814_v45, %v1811_v36  ;;  %v2085_v15 = vadd.f32 %v2084_v18, %v1814_v45  ;;  %v2124_v31 = vmul.f32 %v1814_v45, %v1814_v45 }
 0x218   : > { %v1826_v55 = vpop.f32.mrf.mxu0  ;;  %v1835_v47 = vadd.f32 %v3431_v50, %v1674_v51  ;;  %v1669_v36 = vadd.f32 %v3314_v20, %v4730_v6  ;;  %v1693_v50 = vadd.f32 %v3332_v59, %v4766_v5  ;;  %v3335_v51 = vadd.f32 %v4891_v40, %v4884_v7 }
 0x219   : > { %v4940_v28 = vpop.f32.mrf.mxu1  ;;  %2917 = vst [vmem:[%s4907_s15 + $0x10] sm:$0xff] %v2849_v41   ;;  %v2086_v44 = vadd.f32 %v2085_v15, %v1819_v10  ;;  %v2155_v60 = vadd.f32 %v2154_v46, %v2124_v31  ;;  %v1827_v58 = vadd.f32 %v1826_v55, %v1666_v39  ;;  %v3329_v10 = vadd.f32 %v4867_v61, %v4862_v25 }
 0x21a   : > { %v3432_v48 = vpop.f32.mrf.mxu0  ;;  %v2129_v20 = vmul.f32 %v1835_v47, %v1835_v47  ;;  %v3341_v5 = vadd.f32 %v4919_v1, %v4913_v13  ;;  %v3338_v7 = vadd.f32 %v4909_v29, %v4896_v32  ;;  %v1698_v1 = vadd.f32 %v3335_v51, %v4771_v33 }
 0x21b   : > { %v4946_v27 = vpop.f32.mrf.mxu1  ;;  %v1838_v21 = vadd.f32 %v3432_v48, %v1677_v12  ;;  %v2156_v53 = vadd.f32 %v2155_v60, %v2125_v63  ;;  %v2087_v42 = vadd.f32 %v2086_v44, %v1822_v14  ;;  %v2127_v62 = vmul.f32 %v1827_v58, %v1827_v58 }
 0x21c   : > { %v1829_v0 = vpop.f32.mrf.mxu0  ;;  %v3326_v14 = vadd.f32 %v4860_v11, %v4855_v19  ;;  %v1690_v45 = vadd.f32 %v3329_v10, %v4760_v43  ;;  %v3344_v60 = vadd.f32 %v4932_v16, %v4924_v2  ;;  %v1706_v16 = vadd.f32 %v3341_v5, %v4788_v54  ;;  %v5070_v5 = vld [vmem:[#allocation8_spill] sm:$0xff] }
 0x21d   : > { %v4951_v52 = vpop.f32.mrf.mxu1  ;;  %v2864_v56 = vpack.c.bf16 %v1838_v21, %v1835_v47  ;;  %v1830_v9 = vadd.f32 %v1829_v0, %v1669_v36  ;;  %v2088_v6 = vadd.f32 %v2087_v42, %v1827_v58  ;;  %v2157_v18 = vadd.f32 %v2156_v53, %v2126_v24 }
 0x21e   : > { %v3435_v17 = vpop.f32.mrf.mxu0  ;;  %v1685_v55 = vadd.f32 %v3326_v14, %v4754_v37  ;;  %v2130_v57 = vmul.f32 %v1838_v21, %v1838_v21  ;;  %v1709_v0 = vadd.f32 %v3344_v60, %v4795_v34 }
 0x21f   : > { %v4957_v4 = vpop.f32.mrf.mxu1  ;;  %2920 = vst [vmem:[%s4907_s15 + $0x28] sm:$0xff] %v2864_v56   ;;  %v2859_v3 = vpack.c.bf16 %v1830_v9, %v1827_v58  ;;  %v2128_v22 = vmul.f32 %v1830_v9, %v1830_v9  ;;  %v2158_v23 = vadd.f32 %v2157_v18, %v2127_v62  ;;  %v2089_v25 = vadd.f32 %v2088_v6, %v1830_v9 }
 0x220   : > { %v1842_v49 = vpop.f32.mrf.mxu0  ;;  %v1851_v11 = vadd.f32 %v3435_v17, %v1690_v45  ;;  %v1701_v18 = vadd.f32 %v3338_v7, %v4781_v26  ;;  %v3347_v17 = vadd.f32 %v4940_v28, %v4935_v35  ;;  %v3350_v35 = vadd.f32 %v4951_v52, %v4946_v27 }
 0x221   : > { %v3352_v61 = vpop.f32.mrf.mxu1  ;;  %2919 = vst [vmem:[%s4907_s15 + $0x20] sm:$0xff] %v2859_v3   ;;  %v2090_v46 = vadd.f32 %v2089_v25, %v1835_v47  ;;  %v2159_v41 = vadd.f32 %v2158_v23, %v2128_v22  ;;  %v1843_v15 = vadd.f32 %v1842_v49, %v1682_v38 }
 0x222   : > { %v3436_v19 = vpop.f32.mrf.mxu0  ;;  %v2133_v10 = vmul.f32 %v1851_v11, %v1851_v11  ;;  %v3353_v34 = vadd.f32 %v3352_v61, %v4957_v4  ;;  %v1714_v4 = vadd.f32 %v3347_v17, %v4802_v8  ;;  %v1717_v60 = vadd.f32 %v3350_v35, %v5070_v5  ;;  %v5073_v17 = vld [vmem:[#allocation14_spill] sm:$0xff] }
 0x223   : > { %v3354_v31 = vpop.f32.mrf.mxu1  ;;  %v1854_v39 = vadd.f32 %v3436_v19, %v1693_v50  ;;  %v2160_v12 = vadd.f32 %v2159_v41, %v2129_v20  ;;  %v2091_v63 = vadd.f32 %v2090_v46, %v1838_v21  ;;  %v2131_v37 = vmul.f32 %v1843_v15, %v1843_v15 }
 0x224   : > { %v1845_v44 = vpop.f32.mrf.mxu0 }
 0x225   : > { %v3355_v43 = vpop.f32.mrf.mxu1  ;;  %v2874_v58 = vpack.c.bf16 %v1854_v39, %v1851_v11  ;;  %v1846_v48 = vadd.f32 %v1845_v44, %v1685_v55  ;;  %v2092_v47 = vadd.f32 %v2091_v63, %v1843_v15  ;;  %v2161_v36 = vadd.f32 %v2160_v12, %v2130_v57 }
 0x226   : > { %v3439_v40 = vpop.f32.mrf.mxu0  ;;  %v2134_v33 = vmul.f32 %v1854_v39, %v1854_v39  ;;  %v3356_v23 = vadd.f32 %v3355_v43, %v3354_v31  ;;  %v5068_v31 = vld [vmem:[#allocation9_spill] sm:$0xff] }
 0x227   : > { %v3357_v30 = vpop.f32.mrf.mxu1  ;;  %2922 = vst [vmem:[%s4907_s15 + $0x38] sm:$0xff] %v2874_v58   ;;  %v2869_v21 = vpack.c.bf16 %v1846_v48, %v1843_v15  ;;  %v2132_v24 = vmul.f32 %v1846_v48, %v1846_v48  ;;  %v2162_v53 = vadd.f32 %v2161_v36, %v2131_v37  ;;  %v2093_v42 = vadd.f32 %v2092_v47, %v1846_v48 }
 0x228   : > { %v1858_v2 = vpop.f32.mrf.mxu0  ;;  %v1867_v29 = vadd.f32 %v3439_v40, %v1706_v16 }
 0x229   : > { %v3358_v13 = vpop.f32.mrf.mxu1  ;;  %2921 = vst [vmem:[%s4907_s15 + $0x30] sm:$0xff] %v2869_v21   ;;  %v2094_v59 = vadd.f32 %v2093_v42, %v1851_v11  ;;  %v2163_v56 = vadd.f32 %v2162_v53, %v2132_v24  ;;  %v1859_v9 = vadd.f32 %v1858_v2, %v1698_v1  ;;  %v1722_v11 = vadd.f32 %v3353_v34, %v5068_v31 }
 0x22a   : > { %v3440_v32 = vpop.f32.mrf.mxu0  ;;  %v2137_v51 = vmul.f32 %v1867_v29, %v1867_v29  ;;  %v3359_v58 = vadd.f32 %v3358_v13, %v3357_v30 }
 0x22b   : > { %v3360_v6 = vpop.f32.mrf.mxu1  ;;  %v1870_v62 = vadd.f32 %v3440_v32, %v1709_v0  ;;  %v2164_v14 = vadd.f32 %v2163_v56, %v2133_v10  ;;  %v2095_v3 = vadd.f32 %v2094_v59, %v1854_v39  ;;  %v2135_v45 = vmul.f32 %v1859_v9, %v1859_v9  ;;  %v5069_v39 = vld [vmem:[#allocation10_spill] sm:$0xff] }
 0x22c   : > { %v1861_v22 = vpop.f32.mrf.mxu0  ;;  %v1725_v55 = vadd.f32 %v3356_v23, %v5069_v39 }
 0x22d   : > { %v3361_v54 = vpop.f32.mrf.mxu1  ;;  %v2884_v25 = vpack.c.bf16 %v1870_v62, %v1867_v29  ;;  %v1862_v38 = vadd.f32 %v1861_v22, %v1701_v18  ;;  %v2096_v49 = vadd.f32 %v2095_v3, %v1859_v9  ;;  %v2165_v50 = vadd.f32 %v2164_v14, %v2134_v33 }
 0x22e   : > { %v3443_v26 = vpop.f32.mrf.mxu0  ;;  %v2138_v48 = vmul.f32 %v1870_v62, %v1870_v62  ;;  %v3362_v0 = vadd.f32 %v3361_v54, %v3360_v6 }
 0x22f   : > { %v3363_v20 = vpop.f32.mrf.mxu1  ;;  %2924 = vst [vmem:[%s4907_s15 + $0x48] sm:$0xff] %v2884_v25   ;;  %v2879_v28 = vpack.c.bf16 %v1862_v38, %v1859_v9  ;;  %v2136_v46 = vmul.f32 %v1862_v38, %v1862_v38  ;;  %v2166_v41 = vadd.f32 %v2165_v50, %v2135_v45  ;;  %v2097_v15 = vadd.f32 %v2096_v49, %v1862_v38  ;;  %v5071_v9 = vld [vmem:[#allocation11_spill] sm:$0xff]  ;;  %v5074_v38 = vld [vmem:[#allocation12_spill] sm:$0xff] }
 0x230   : > { %v1874_v61 = vpop.f32.mrf.mxu0  ;;  %v1883_v52 = vadd.f32 %v3443_v26, %v1722_v11  ;;  %v1730_v32 = vadd.f32 %v3359_v58, %v5071_v9  ;;  %v1733_v49 = vadd.f32 %v3362_v0, %v5074_v38 }
 0x231   : > { %v3364_v19 = vpop.f32.mrf.mxu1  ;;  %2923 = vst [vmem:[%s4907_s15 + $0x40] sm:$0xff] %v2879_v28   ;;  %v2098_v57 = vadd.f32 %v2097_v15, %v1867_v29  ;;  %v2167_v12 = vadd.f32 %v2166_v41, %v2136_v46  ;;  %v1875_v63 = vadd.f32 %v1874_v61, %v1714_v4 }
 0x232   : > { %v3444_v27 = vpop.f32.mrf.mxu0  ;;  %v3365_v40 = vadd.f32 %v3364_v19, %v3363_v20  ;;  %v2141_v14 = vmul.f32 %v1883_v52, %v1883_v52 }
 0x233   : > { %v3366_v43 = vpop.f32.mrf.mxu1  ;;  %v1886_v44 = vadd.f32 %v3444_v27, %v1725_v55  ;;  %v2168_v8 = vadd.f32 %v2167_v12, %v2137_v51  ;;  %v2099_v47 = vadd.f32 %v2098_v57, %v1870_v62  ;;  %v2139_v42 = vmul.f32 %v1875_v63, %v1875_v63  ;;  %v5072_v62 = vld [vmem:[#allocation13_spill] sm:$0xff] }
 0x234   : > { %v1877_v36 = vpop.f32.mrf.mxu0  ;;  %v1738_v18 = vadd.f32 %v3365_v40, %v5072_v62 }
 0x235   : > { %v3367_v37 = vpop.f32.mrf.mxu1  ;;  %v2894_v7 = vpack.c.bf16 %v1886_v44, %v1883_v52  ;;  %v1878_v24 = vadd.f32 %v1877_v36, %v1717_v60  ;;  %v2100_v53 = vadd.f32 %v2099_v47, %v1875_v63  ;;  %v2169_v1 = vadd.f32 %v2168_v8, %v2138_v48  ;;  %v5076_v47 = vld [vmem:[#allocation17_spill] sm:$0xff]  ;;  %v5077_v36 = vld [vmem:[#allocation16_spill] sm:$0xff] }
 0x236   : > { %v3368_v21 = vadd.f32 %v3367_v37, %v3366_v43  ;;  %v3447_v16 = vpop.f32.mrf.mxu0  ;;  %v2142_v45 = vmul.f32 %v1886_v44, %v1886_v44 }
 0x237   : > { %v3369_v2 = vpop.f32.mrf.mxu1  ;;  %2926 = vst [vmem:[%s4907_s15 + $0x58] sm:$0xff] %v2894_v7   ;;  %v2889_v10 = vpack.c.bf16 %v1878_v24, %v1875_v63  ;;  %v2140_v30 = vmul.f32 %v1878_v24, %v1878_v24  ;;  %v2170_v13 = vadd.f32 %v2169_v1, %v2139_v42  ;;  %v2101_v59 = vadd.f32 %v2100_v53, %v1878_v24  ;;  %v5075_v63 = vld [vmem:[#allocation15_spill] sm:$0xff] }
 0x238   : > { %v1890_v29 = vpop.f32.mrf.mxu0  ;;  %v1741_v33 = vadd.f32 %v3368_v21, %v5073_v17  ;;  %v1899_v54 = vadd.f32 %v3447_v16, %v1738_v18 }
 0x239   : > { %v3370_v56 = vpop.f32.mrf.mxu1  ;;  %2925 = vst [vmem:[%s4907_s15 + $0x50] sm:$0xff] %v2889_v10   ;;  %v2102_v3 = vadd.f32 %v2101_v59, %v1883_v52  ;;  %v2171_v22 = vadd.f32 %v2170_v13, %v2140_v30  ;;  %v1891_v34 = vadd.f32 %v1890_v29, %v1730_v32  ;;  %v5078_v13 = vld [vmem:[#allocation18_spill] sm:$0xff] }
 0x23a   : > { %v3448_v6 = vpop.f32.mrf.mxu0  ;;  %v3371_v20 = vadd.f32 %v3370_v56, %v3369_v2 }
 0x23b   : > { %v3372_v23 = vpop.f32.mrf.mxu1  ;;  %v1902_v25 = vadd.f32 %v3448_v6, %v1741_v33  ;;  %v2172_v50 = vadd.f32 %v2171_v22, %v2141_v14  ;;  %v2103_v26 = vadd.f32 %v2102_v3, %v1886_v44  ;;  %v2143_v19 = vmul.f32 %v1891_v34, %v1891_v34 }
 0x23c   : > { %v1893_v28 = vpop.f32.mrf.mxu0  ;;  %v1746_v43 = vadd.f32 %v3371_v20, %v5075_v63  ;;  %v2145_v44 = vmul.f32 %v1899_v54, %v1899_v54 }
 0x23d   : > { %v3373_v35 = vpop.f32.mrf.mxu1  ;;  %v2904_v46 = vpack.c.bf16 %v1902_v25, %v1899_v54  ;;  %v1894_v41 = vadd.f32 %v1893_v28, %v1733_v49  ;;  %v2104_v15 = vadd.f32 %v2103_v26, %v1891_v34  ;;  %v2173_v4 = vadd.f32 %v2172_v50, %v2142_v45 }
 0x23e   : > { %v3451_v31 = vpop.f32.mrf.mxu0  ;;  %v3374_v11 = vadd.f32 %v3373_v35, %v3372_v23  ;;  %v2146_v7 = vmul.f32 %v1902_v25, %v1902_v25 }
 0x23f   : > { %v3375_v61 = vpop.f32.mrf.mxu1  ;;  %2928 = vst [vmem:[%s4907_s15 + $0x68] sm:$0xff] %v2904_v46   ;;  %v2899_v39 = vpack.c.bf16 %v1894_v41, %v1891_v34  ;;  %v2144_v55 = vmul.f32 %v1894_v41, %v1894_v41  ;;  %v2174_v51 = vadd.f32 %v2173_v4, %v2143_v19  ;;  %v2105_v57 = vadd.f32 %v2104_v15, %v1894_v41 }
 0x240   : > { %v1906_v27 = vpop.f32.mrf.mxu0  ;;  %v1749_v40 = vadd.f32 %v3374_v11, %v5077_v36 }
 0x241   : > { %v3376_v12 = vpop.f32.mrf.mxu1  ;;  %2927 = vst [vmem:[%s4907_s15 + $0x60] sm:$0xff] %v2899_v39   ;;  %v2106_v5 = vadd.f32 %v2105_v57, %v1899_v54  ;;  %v2175_v60 = vadd.f32 %v2174_v51, %v2144_v55  ;;  %v1907_v58 = vadd.f32 %v1906_v27, %v1746_v43 }
 0x242   : > { %v3377_v52 = vadd.f32 %v3376_v12, %v3375_v61  ;;  %v3452_v8 = vpop.f32.mrf.mxu0 }
 0x243   : > { %v3378_v48 = vpop.f32.mrf.mxu1  ;;  %v2176_v21 = vadd.f32 %v2175_v60, %v2145_v44  ;;  %v2107_v24 = vadd.f32 %v2106_v5, %v1902_v25  ;;  %v2147_v10 = vmul.f32 %v1907_v58, %v1907_v58 }
 0x244   : > { %v1754_v37 = vadd.f32 %v3377_v52, %v5076_v47  ;;  %v1909_v42 = vpop.f32.mrf.mxu0 }
 0x245   : > { %v3379_v53 = vpop.f32.mrf.mxu1  ;;  %v1910_v2 = vadd.f32 %v1909_v42, %v1749_v40  ;;  %v2108_v0 = vadd.f32 %v2107_v24, %v1907_v58  ;;  %v2177_v30 = vadd.f32 %v2176_v21, %v2146_v7 }
 0x246   : > { %v3380_v1 = vadd.f32 %v3379_v53, %v3378_v48  ;;  %v1915_v16 = vadd.f32 %v3451_v31, %v1754_v37 }
 0x247   : > { %v2909_v56 = vpack.c.bf16 %v1910_v2, %v1907_v58  ;;  %v2148_v9 = vmul.f32 %v1910_v2, %v1910_v2  ;;  %v2178_v32 = vadd.f32 %v2177_v30, %v2147_v10  ;;  %v2109_v29 = vadd.f32 %v2108_v0, %v1910_v2 }
 0x248   : > { %v1757_v59 = vadd.f32 %v3380_v1, %v5078_v13  ;;  %v2149_v18 = vmul.f32 %v1915_v16, %v1915_v16 }
 0x249   : > { %2929 = vst [vmem:[%s4907_s15 + $0x70] sm:$0xff] %v2909_v56   ;;  %v2110_v17 = vadd.f32 %v2109_v29, %v1915_v16  ;;  %v2179_v33 = vadd.f32 %v2178_v32, %v2148_v9 }
 0x24a   : > { %v1918_v62 = vadd.f32 %v3452_v8, %v1757_v59 }
 0x24b   : > { %v2180_v34 = vadd.f32 %v2179_v33, %v2149_v18 }
 0x24c   : > { %v2914_v14 = vpack.c.bf16 %v1918_v62, %v1915_v16  ;;  %v2150_v3 = vmul.f32 %v1918_v62, %v1918_v62  ;;  %v2111_v22 = vadd.f32 %v2110_v17, %v1918_v62 }
 0x24e   : > { %2930 = vst [vmem:[%s4907_s15 + $0x78] sm:$0xff] %v2914_v14   ;;  %v2112_v23 = vrot.slane %v2111_v22, 4  ;;  %v2181_v6 = vadd.f32 %v2180_v34, %v2150_v3 }
 0x250   : > { %v2113_v54 = vadd.f32 %v2112_v23, %v2111_v22  ;;  %v2182_v25 = vrot.slane %v2181_v6, 4 }
 0x252   : > { %v2114_v38 = vrot.slane %v2113_v54, 2  ;;  %v2183_v49 = vadd.f32 %v2182_v25, %v2181_v6 }
 0x254   : > { %v2115_v45 = vadd.f32 %v2114_v38, %v2113_v54  ;;  %v2184_v50 = vrot.slane %v2183_v49, 2 }
 0x256   : > { %v2116_v20 = vrot.slane %v2115_v45, 1  ;;  %v2185_v26 = vadd.f32 %v2184_v50, %v2183_v49 }
 0x258   : > { %v2117_v35 = vadd.f32 %v2116_v20, %v2115_v45  ;;  %v2186_v28 = vrot.slane %v2185_v26, 1 }
 0x25a   : > { %2118 = vst [vmem:[%s246_s24] sm:$0x1] %v2117_v35  ;;  %v2187_v46 = vadd.f32 %v2186_v28, %v2185_v26 }
 0x25c   : > { %2188 = vst [vmem:[%s249_s28] sm:$0x1] %v2187_v46 }
 0x25d PF: > { %p16_p0 = scmp.ge.s32.totalorder %s3768_s25, 4   ;;  %s5079_s15 = smov %s3681_s16 }
 0x25e   : > { %s5080_s16 = smov %s3685_s17  ;;  %s5081_s17 = smov %s3785_s7 }
 0x25f   : > { %s5082_s18 = smov %s3768_s25  ;;  %18 = sbr.rel (!%p16_p0) target bundleno = 4 (0x4), region = 96 }
 0x264   :  { %2234 = vsyncpa [#allocation3], 1 }
 0x265   :  { %2236 = vsyncpa [#allocation3 + $0x1], 1 }
 0x266   :  { %2237 = vsyncpa [#allocation5], 1 }

// kernel: first_res_block.3
= control target key start
LH: loop header
LB: loop body
LE: loop exit
PB: predicated region body
PF: predicated region fallthrough
CT: control target
= control target key end

     0   :  { %s5502_s0 = inlined_call_operand.vmem [shape: f32[2,1,128], index: 0, kind: input, shape index: {}]   ;;  %s5503_s1 = inlined_call_operand.vmem [shape: f32[2,1,128], index: 1, kind: input, shape index: {}]   ;;  %s5504_s2 = inlined_call_operand.vmem [shape: f32[1,128], index: 2, kind: input, shape index: {}]   ;;  %s5505_s3 = inlined_call_operand.vmem [shape: f32[1,128], index: 3, kind: input, shape index: {}]   ;;  %s5506_s4 = inlined_call_operand.vmem [shape: bf16[2,16,16,128], index: 4, kind: input, shape index: {}]   ;;  %s5507_s5 = inlined_call_operand.vmem [shape: f32[2,16,16,128], index: 5, kind: input, shape index: {}]   ;;  %s5508_s6 = inlined_call_operand.vmem [shape: bf16[1152,128], index: 6, kind: input, shape index: {}]   ;;  %s5509_s7 = inlined_call_operand.hbm [shape: f32[2,16,16,128], index: 7, kind: output, shape index: {0}]   ;;  %s5510_s8 = inlined_call_operand.hbm [shape: f32[2,16,16,128], index: 8, kind: output, shape index: {1}]  }
   0x1   :  { %5524 = sst [smem:[#allocation14_spill]] %s5502_s0 }
   0x2   :  { %14 = vsyncpa [#allocation3], 0 }
   0x3   :  { %16 = vsyncpa [#allocation3 + $0x1], 0 }
   0x4   :  { %17 = vsyncpa [#allocation5], 0 }
   0x5   :  { %19 = vsyncpa [#allocation5 + $0x1], 0  ;;  %s3783_s27 = smov 0   ;;  %s3785_s28 = smov 0  }
   0x6   :  { %s3787_s29 = smov 0   ;;  %s3789_s30 = smov 0  }
   0x7 LB: > { %s3804_s9 = sadd.s32 4294967295, %s3730_s30   ;;  %s2439_s10 = sadd.s32 4294967294, %s3730_s30   ;;  %s3730_s30 = sphi %s3789_s30, %s5562_s30   ;;  %s3726_s29 = sphi %s3787_s29, %s5561_s29   ;;  %s3722_s28 = sphi %s3785_s28, %s5560_s28   ;;  %s3718_s27 = sphi %s3783_s27, %s5559_s27  }
   0x8   : > { %s3808_s11 = sadd.s32 1, %s3730_s30   ;;  %s189_s12 = sadd.s32 1, %s3726_s29 }
   0x9   : > { %s186_s13 = ssub.s32 %s3730_s30, %s3808_s11  ;;  %p199_p0 = scmp.ne.s32.totalorder %s3726_s29, %s3722_s28 }
   0xa   : > { %p187_p1 = scmp.eq.s32.totalorder %s186_s13, 0  ;;  %p200_p2 = scmp.eq.s32.totalorder %s3804_s9, 1 }
   0xb   : > { %p205_p3 = scmp.ne.s32.totalorder %s3722_s28, %s3718_s27  ;;  %p206_p4 = scmp.eq.s32.totalorder %s2439_s10, 1 }
   0xc   : > { %s3819_s14 = scalar_select %p187_p1, %s3726_s29, %s189_s12  }
   0xd   : > { %p3821_p5 = por %p200_p2, %p199_p0  ;;  %p3825_p6 = por %p206_p4, %p205_p3 }
   0xe   : > { %p2442_p7 = scmp.ge.s32.totalorder %s3730_s30, 1  ;;  %p281_p8 = scmp.lt.s32.totalorder %s3730_s30, 3 }
  0x10   : > { %p282_p9 = pnand %p2442_p7, %p281_p8 }
  0x12   : > { %285 = sbr.rel (%p282_p9) target bundleno = 596 (0x254), region = 48 }
  0x17   : > { %v3566_v0 = vld [vmem:[%s5508_s6 + $0x78] sm:$0xff]   ;;  %v5511_v2 = vmov 0   ;;  %v3568_v3 = vld [vmem:[%s5508_s6 + $0x70] sm:$0xff]   ;;  %v3570_v5 = vld [vmem:[%s5508_s6 + $0x68] sm:$0xff]   ;;  %vm338_vm0 = vcmask 1040384   ;;  %s5527_s0 = sld [smem:[#allocation14_spill]]  ;;  %v425_v37 = vlaneseq }
  0x18   : > { %v3567_v1 = vld [vmem:[%s5508_s6 + $0x38] sm:$0xff]   ;;  %1397 = vmatprep.mubr.bf16.mxu0 %v5511_v2  ;;  %2982 = vmatprep.subr.bf16.mxu0 %v3566_v0  ;;  %v3569_v4 = vld [vmem:[%s5508_s6 + $0x30] sm:$0xff]   ;;  %v3571_v6 = vld [vmem:[%s5508_s6 + $0x28] sm:$0xff]   ;;  %p325_p10 = scmp.lt.s32.totalorder %s3804_s9, 1  ;;  %vm3733_vm3 = vmmov 1   ;;  %s5216_s10 = sand.u32 1, %s3722_s28  }
  0x19   : > { %3502 = vmatprep.subr.bf16.mxu1 %v3566_v0  ;;  %2983 = vmatpush3.bf16.msra.mxu0 %v3567_v1  ;;  %v3572_v7 = vld [vmem:[%s5508_s6 + $0x60] sm:$0xff]   ;;  %v3574_v9 = vld [vmem:[%s5508_s6 + $0x58] sm:$0xff]   ;;  %v3576_v11 = vld [vmem:[%s5508_s6 + $0x50] sm:$0xff]   ;;  %v3919_v40 = vshrl.u32 %v425_v37, 7  ;;  %s2899_s22 = sshll.u32 %s3804_s9, 12 }
  0x1a   : > { %3510 = vmatpush3.bf16.msra.mxu1 %v3567_v1  ;;  %2984 = vmatprep.subr.bf16.mxu0 %v3568_v3  ;;  %v3573_v8 = vld [vmem:[%s5508_s6 + $0x20] sm:$0xff]   ;;  %v3575_v10 = vld [vmem:[%s5508_s6 + $0x18] sm:$0xff]   ;;  %v3577_v21 = vld [vmem:[%s5508_s6 + $0x10] sm:$0xff]   ;;  %s3894_s18 = scalar_select %p325_p10, %s3804_s9, 1 }
  0x1b   : > { %3503 = vmatprep.subr.bf16.mxu1 %v3568_v3  ;;  %v344_v14 = vld [vmem:[%s5503_s1] sm:$0x1]  ;;  %v345_v17 = vld [vmem:[%s5503_s1 + $0x1] sm:$0x1]  ;;  %v3578_v23 = vld [vmem:[%s5508_s6 + $0x48] sm:$0xff]   ;;  %v427_v47 = vsub.s32 0, %v3919_v40  ;;  %s5430_s13 = scalar_lea.hbm %s5509_s7, %s2899_s22 }
  0x1c   : > { %v346_v18 = vsel %vm338_vm0, %v344_v14, 0.0  ;;  %v347_v20 = vsel %vm338_vm0, %v345_v17, 0.0  ;;  %v3579_v27 = vld [vmem:[%s5508_s6 + $0x8] sm:$0xff]   ;;  %v3580_v28 = vld [vmem:[%s5508_s6 + $0x40] sm:$0xff]   ;;  %v3582_v33 = vld [vmem:[%s5508_s6 + $0xf8] sm:$0xff]   ;;  %s2897_s25 = sshll.u32 %s3894_s18, 7 }
  0x1d   : > { %2985 = vmatpush3.bf16.msra.mxu0 %v3569_v4  ;;  %v336_v12 = vld [vmem:[%s5527_s0] sm:$0x1]  ;;  %v337_v13 = vld [vmem:[%s5527_s0 + $0x1] sm:$0x1]  ;;  %v348_v22 = vadd.f32 %v347_v20, %v346_v18  ;;  %v3585_v34 = vld [vmem:[%s5508_s6 + $0x178] sm:$0xff]   ;;  %s3913_s17 = scalar_lea.vmem %s5506_s4, %s2897_s25  ;;  %vm2980_vm1 = vcmp.ne.s32.totalorder %v3919_v40, 0 }
  0x1e   : > { %3511 = vmatpush3.bf16.msra.mxu1 %v3569_v4  ;;  %2986 = vmatprep.subr.bf16.mxu0 %v3570_v5  ;;  %v339_v15 = vsel %vm338_vm0, %v336_v12, 0.0  ;;  %v340_v16 = vsel %vm338_vm0, %v337_v13, 0.0  ;;  %v3581_v31 = vld [vmem:[%s5508_s6] sm:$0xff]   ;;  %v3587_v35 = vld [vmem:[%s5508_s6 + $0x138] sm:$0xff]   ;;  %v3593_v36 = vld [vmem:[%s5508_s6 + $0x170] sm:$0xff]   ;;  %vm713_vm2 = vcmp.lt.s32.totalorder %v3919_v40, 1 }
  0x1f   : > { %3504 = vmatprep.subr.bf16.mxu1 %v3570_v5  ;;  %v341_v19 = vadd.f32 %v340_v16, %v339_v15  ;;  %v349_v25 = vmul.f32 0.001953125, %v348_v22  ;;  %v3595_v38 = vld [vmem:[%s5508_s6 + $0x130] sm:$0xff]   ;;  %v2902_v39 = vld [vmem:[%s3913_s17] sm:$0xff]   ;;  %v2975_v42 = vld [vmem:[%s3913_s17 + $0x58] sm:$0xff]   ;;  %vm816_vm5 = vcmp.lt.s32.totalorder %v3919_v40, 7  ;;  %s2898_s26 = sshll.u32 %s3894_s18, 8 }
  0x20   : > { %v353_v41 = vld [vmem:[%s5504_s2] sm:$0x1]  ;;  %v2965_v43 = vld [vmem:[%s3913_s17 + $0x8] sm:$0xff]   ;;  %v2966_v46 = vld [vmem:[%s3913_s17 + $0x10] sm:$0xff]   ;;  %v2903_v50 = vunpack.c.l.bf16 %v2902_v39  ;;  %v2904_v53 = vunpack.c.h.bf16 %v2902_v39  ;;  %v2947_v54 = vunpack.c.l.bf16 %v2975_v42  ;;  %v2948_v55 = vunpack.c.h.bf16 %v2975_v42  ;;  %s5224_s19 = scalar_lea.vmem %s5507_s5, %s2898_s26  ;;  %s2443_s18 = sshll.u32 %s5216_s10, 8 }
  0x21   : > { %2987 = vmatpush3.bf16.msra.mxu0 %v3571_v6  ;;  %v343_v24 = vmul.f32 0.001953125, %v341_v19  ;;  %v2976_v44 = vld [vmem:[%s3913_s17 + $0x60] sm:$0xff]   ;;  %v3601_v45 = vld [vmem:[%s5508_s6 + $0x168] sm:$0xff]   ;;  %v3937_v56 = vld [vmem:[%s3913_s17 + $0x18] sm:$0xff]   ;;  %v2907_v58 = vunpack.c.l.bf16 %v2965_v43  ;;  %v2908_v59 = vunpack.c.h.bf16 %v2965_v43  ;;  %v2911_v0 = vunpack.c.l.bf16 %v2966_v46  ;;  %s5250_s20 = scalar_lea.vmem [#allocation4], %s2443_s18  ;;  %s5259_s21 = scalar_lea.vmem [#allocation2], %s2443_s18 }
  0x22   : > { %3512 = vmatpush3.bf16.msra.mxu1 %v3571_v6  ;;  %2988 = vmatprep.subr.bf16.mxu0 %v3572_v7  ;;  %v3603_v48 = vld [vmem:[%s5508_s6 + $0x128] sm:$0xff]   ;;  %v357_v57 = vld [vmem:[%s5505_s3] sm:$0x1]  ;;  %v2951_v60 = vunpack.c.l.bf16 %v2976_v44  ;;  %v2952_v61 = vunpack.c.h.bf16 %v2976_v44  ;;  %v2912_v1 = vunpack.c.h.bf16 %v2966_v46  ;;  %v3946_v3 = vld [vmem:[%s3913_s17 + $0x70] sm:$0xff]   ;;  %s2333_s23 = sshll.u32 %s5250_s20, 4  ;;  %s2317_s24 = sshll.u32 %s5259_s21, 4  ;;  %s5424_s23 = int_to_ptr.vmem [resolvable:$true] %s2333_s23  ;;  %s5432_s24 = int_to_ptr.vmem [resolvable:$true] %s2317_s24 }
  0x23   : > { %3505 = vmatprep.subr.bf16.mxu1 %v3572_v7  ;;  %v350_v26 = vmul.f32 %v343_v24, %v343_v24  ;;  %v2977_v51 = vld [vmem:[%s3913_s17 + $0x68] sm:$0xff]   ;;  %v3606_v4 = vld [vmem:[%s5508_s6 + $0x160] sm:$0xff]   ;;  %v2915_v7 = vunpack.c.l.bf16 %v3937_v56  ;;  %v2959_v20 = vunpack.c.l.bf16 %v3946_v3  ;;  %vm4024_vm4 = vmpackc.low %vm3733_vm3, %vm2980_vm1  ;;  %s5422_s26 = scalar_lea.hbm %s5510_s8, %s2899_s22  ;;  %s3640_s18 = scalar_lea.vmem %s5424_s23, 4096 }
  0x24   : > { %v2955_v5 = vunpack.c.l.bf16 %v2977_v51  ;;  %v2956_v6 = vunpack.c.h.bf16 %v2977_v51  ;;  %p3641_p11 = scmp.ne.s32.totalorder %s5424_s23, %s3640_s18 }
  0x25   : > { %2989 = vmatpush3.bf16.msra.mxu0 %v3573_v8  ;;  %v351_v29 = vsub.f32 %v349_v25, %v350_v26  ;;  %v3610_v26 = vld [vmem:[%s5508_s6 + $0x158] sm:$0xff]  }
  0x26   : > { %3513 = vmatpush3.bf16.msra.mxu1 %v3573_v8  ;;  %2990 = vmatprep.subr.bf16.mxu0 %v3574_v9  ;;  %v2916_v8 = vunpack.c.h.bf16 %v3937_v56  ;;  %v3617_v56 = vld [vmem:[%s5508_s6 + $0x108] sm:$0xff]   ;;  %p3642_p12 = pnand %p3641_p11, %p3821_p5 }
  0x27   : > { %3506 = vmatprep.subr.bf16.mxu1 %v3574_v9  ;;  %v352_v30 = vmax.f32 %v351_v29, 0.0  ;;  %v3607_v9 = vld [vmem:[%s5508_s6 + $0x120] sm:$0xff]  }
  0x28   : > { %p3643_p13 = pneg %p3642_p12 }
  0x29   : > { %2991 = vmatpush3.bf16.msra.mxu0 %v3575_v10  ;;  %v354_v32 = vadd.f32 1e-05, %v352_v30 }
  0x2a   : > { %3514 = vmatpush3.bf16.msra.mxu1 %v3575_v10  ;;  %2992 = vmatprep.subr.bf16.mxu0 %v3576_v11 }
  0x2b   : > { %3507 = vmatprep.subr.bf16.mxu1 %v3576_v11  ;;  %3638 = vrsqrt.f32 %v354_v32 }
  0x2d   : > { %2993 = vmatpush3.bf16.msra.mxu0 %v3577_v21 }
  0x2e   : > { %3515 = vmatpush3.bf16.msra.mxu1 %v3577_v21  ;;  %2994 = vmatprep.subr.bf16.mxu0 %v3578_v23  ;;  %v2960_v21 = vunpack.c.h.bf16 %v3946_v3 }
  0x2f   : > { %3508 = vmatprep.subr.bf16.mxu1 %v3578_v23 }
  0x31   : > { %2995 = vmatpush3.bf16.msra.mxu0 %v3579_v27 }
  0x32   : > { %3516 = vmatpush3.bf16.msra.mxu1 %v3579_v27  ;;  %2996 = vmatprep.subr.bf16.mxu0 %v3580_v28 }
  0x33   : > { %3509 = vmatprep.subr.bf16.mxu1 %v3580_v28 }
  0x35   : > { %2997 = vmatpush3.bf16.msra.mxu0 %v3581_v31 }
  0x36   : > { %3517 = vmatpush3.bf16.msra.mxu1 %v3581_v31  ;;  %3206 = vmatprep.subr.bf16.mxu0 %v3585_v34  ;;  %v3611_v31 = vld [vmem:[%s5508_s6 + $0x118] sm:$0xff]  }
  0x37   : > { %3094 = vmatprep.subr.bf16.mxu1 %v3582_v33 }
  0x38   : > { %1398 = vmatmul.mubr.bf16.vlgmr.msra.gmra.mxu0 %v5511_v2  ;;  %v3639_v49 = vpop.eup %3638 }
  0x39   : > { %3207 = vmatpush3.bf16.msra.mxu0 %v3587_v35  ;;  %v356_v52 = vmul.f32 %v3639_v49, %v353_v41 }
  0x3a   : > { %3208 = vmatprep.subr.bf16.mxu0 %v3593_v36  ;;  %v3612_v36 = vld [vmem:[%s5508_s6 + $0x150] sm:$0xff]  }
  0x3b   : > { %v358_v62 = vmul.f32 %v356_v52, %v343_v24  ;;  %v3942_v63 = vrot.slane %v356_v52, %v427_v47 }
  0x3d   : > { %3209 = vmatpush3.bf16.msra.mxu0 %v3595_v38  ;;  %v359_v10 = vsub.f32 %v357_v57, %v358_v62  ;;  %v430_v11 = vmul.f32 %v2903_v50, %v3942_v63  ;;  %v431_v12 = vmul.f32 %v2904_v53, %v3942_v63  ;;  %v452_v13 = vmul.f32 %v2947_v54, %v3942_v63  ;;  %v3614_v50 = vld [vmem:[%s5508_s6 + $0x110] sm:$0xff]  }
  0x3e   : > { %3210 = vmatprep.subr.bf16.mxu0 %v3601_v45  ;;  %v453_v14 = vmul.f32 %v2948_v55, %v3942_v63  ;;  %v432_v15 = vmul.f32 %v2907_v58, %v3942_v63  ;;  %v433_v16 = vmul.f32 %v2908_v59, %v3942_v63  ;;  %v454_v17 = vmul.f32 %v2951_v60, %v3942_v63  ;;  %v3583_v59 = vld [vmem:[%s5508_s6 + $0xb8] sm:$0xff]   ;;  %v3584_v60 = vld [vmem:[%s5508_s6 + $0xf0] sm:$0xff]  }
  0x3f   : > { %v3964_v18 = vrot.slane %v359_v10, %v427_v47  ;;  %v455_v19 = vmul.f32 %v2952_v61, %v3942_v63  ;;  %v434_v22 = vmul.f32 %v2911_v0, %v3942_v63  ;;  %v435_v23 = vmul.f32 %v2912_v1, %v3942_v63 }
  0x40   : > { %v456_v24 = vmul.f32 %v2955_v5, %v3942_v63  ;;  %v3973_v25 = vmul.f32 %v2956_v6, %v3942_v63  ;;  %v4060_v6 = vld [vmem:[%s3913_s17 + $0x20] sm:$0xff]  }
  0x41   : > { %3211 = vmatpush3.bf16.msra.mxu0 %v3603_v48  ;;  %v468_v27 = vadd.f32 %v3964_v18, %v430_v11  ;;  %v469_v28 = vadd.f32 %v3964_v18, %v431_v12  ;;  %v490_v29 = vadd.f32 %v3964_v18, %v452_v13  ;;  %v491_v30 = vadd.f32 %v3964_v18, %v453_v14  ;;  %v3616_v13 = vld [vmem:[%s5508_s6 + $0x148] sm:$0xff]  }
  0x42   : > { %3212 = vmatprep.subr.bf16.mxu0 %v3606_v4  ;;  %v470_v32 = vadd.f32 %v3964_v18, %v432_v15  ;;  %v471_v33 = vadd.f32 %v3964_v18, %v433_v16  ;;  %v492_v34 = vadd.f32 %v3964_v18, %v454_v17  ;;  %v493_v35 = vadd.f32 %v3964_v18, %v455_v19 }
  0x43   : > { %v3992_v37 = vmax.f32 %v468_v27, 0.0  ;;  %v3994_v38 = vmax.f32 %v469_v28, 0.0  ;;  %v3996_v39 = vmax.f32 %v490_v29, 0.0  ;;  %v3998_v41 = vmax.f32 %v491_v30, 0.0 }
  0x44   : > { %v4000_v42 = vmax.f32 %v470_v32, 0.0  ;;  %v4002_v43 = vmax.f32 %v471_v33, 0.0  ;;  %v4004_v44 = vmax.f32 %v492_v34, 0.0  ;;  %v4006_v45 = vmax.f32 %v493_v35, 0.0  ;;  %v3620_v33 = vld [vmem:[%s5508_s6 + $0x140] sm:$0xff]  }
  0x45   : > { %3213 = vmatpush3.bf16.msra.mxu0 %v3607_v9  ;;  %v4010_v46 = vpack.c.bf16 %v3994_v38, %v3992_v37  ;;  %v4014_v47 = vpack.c.bf16 %v3998_v41, %v3996_v39  ;;  %v681_v48 = vrot.slane %v3992_v37, 7  ;;  %v697_v49 = vrot.slane %v3994_v38, 7 }
  0x46   : > { %3214 = vmatprep.subr.bf16.mxu0 %v3610_v26  ;;  %v692_v52 = vrot.slane %v3996_v39, 7  ;;  %v708_v53 = vrot.slane %v3998_v41, 7  ;;  %v4032_v54 = vpack.c.bf16 %v4002_v43, %v4000_v42  ;;  %v4036_v55 = vpack.c.bf16 %v4006_v45, %v4004_v44 }
  0x47   : > { %5528 = vst [vmem:[#allocation8_spill] sm:$0xff] %v4014_v47  ;;  %1405 = vmatprep.mubr.bf16.mxu0 %v4010_v46  ;;  %1493 = vmatprep.mubr.bf16.mxu1 %v4014_v47  ;;  %v714_v57 = vsel %vm713_vm2, %v681_v48, %v697_v49  ;;  %v730_v58 = vsel %vm713_vm2, %v697_v49, %v681_v48  ;;  %v682_v61 = vrot.slane %v4000_v42, 7  ;;  %v698_v62 = vrot.slane %v4002_v43, 7 }
  0x48   : > { %5531 = vst [vmem:[#allocation9_spill] sm:$0xff] %v4036_v55  ;;  %v4052_v0 = vpack.c.bf16 %v714_v57, %v730_v58  ;;  %v725_v1 = vsel %vm713_vm2, %v692_v52, %v708_v53  ;;  %v741_v4 = vsel %vm713_vm2, %v708_v53, %v692_v52  ;;  %v693_v5 = vrot.slane %v4004_v44, 7 }
  0x49   : > { %3215 = vmatpush3.bf16.msra.mxu0 %v3611_v31  ;;  %v4062_v9 = vpack.c.bf16 %v725_v1, %v741_v4  ;;  %v709_v10 = vrot.slane %v4006_v45, 7  ;;  %v436_v11 = vmul.f32 %v2915_v7, %v3942_v63  ;;  %v437_v12 = vmul.f32 %v2916_v8, %v3942_v63  ;;  %v3586_v8 = vld [vmem:[%s5508_s6 + $0xb0] sm:$0xff]  }
  0x4a   : > { %3216 = vmatprep.subr.bf16.mxu0 %v3612_v36  ;;  %2524 = vmatmul.mubr.msk.bf16.gmra.mxu0 %vm4024_vm4, %v4052_v0  ;;  %v715_v14 = vsel %vm713_vm2, %v682_v61, %v698_v62  ;;  %v472_v15 = vadd.f32 %v3964_v18, %v434_v22  ;;  %v473_v16 = vadd.f32 %v3964_v18, %v435_v23  ;;  %v2919_v23 = vunpack.c.l.bf16 %v4060_v6 }
  0x4b   : > { %v494_v7 = vadd.f32 %v3964_v18, %v456_v24  ;;  %2568 = vmatmul.mubr.msk.bf16.vlgmr.msra.gmra.mxu1 %vm4024_vm4, %v4062_v9  ;;  %1413 = vmatprep.mubr.bf16.mxu0 %v4032_v54  ;;  %v731_v17 = vsel %vm713_vm2, %v698_v62, %v682_v61  ;;  %v726_v19 = vsel %vm713_vm2, %v693_v5, %v709_v10  ;;  %v3588_v24 = vld [vmem:[%s5508_s6 + $0xe8] sm:$0xff]   ;;  %v2920_v32 = vunpack.c.h.bf16 %v4060_v6  ;;  %v3591_v62 = vld [vmem:[%s5508_s6 + $0xa0] sm:$0xff]  }
  0x4c   : > { %v495_v22 = vadd.f32 %v3964_v18, %v3973_v25  ;;  %3095 = vmatpush3.bf16.msra.mxu1 %v3583_v59  ;;  %1501 = vmatprep.mubr.bf16.mxu1 %v4036_v55  ;;  %v742_v26 = vsel %vm713_vm2, %v709_v10, %v693_v5  ;;  %v4105_v27 = vmax.f32 %v472_v15, 0.0  ;;  %v4107_v28 = vmax.f32 %v473_v16, 0.0  ;;  %v3621_v5 = vld [vmem:[%s5508_s6 + $0x100] sm:$0xff]  }
  0x4d   : > { %3217 = vmatpush3.bf16.msra.mxu0 %v3614_v50  ;;  %v4109_v29 = vmax.f32 %v494_v7, 0.0  ;;  %3096 = vmatprep.subr.bf16.mxu1 %v3584_v60  ;;  %v474_v30 = vadd.f32 %v3964_v18, %v436_v11  ;;  %v458_v31 = vmul.f32 %v2959_v20, %v3942_v63  ;;  %v4121_v34 = vpack.c.bf16 %v715_v14, %v731_v17  ;;  %v3589_v20 = vld [vmem:[%s5508_s6 + $0xa8] sm:$0xff]   ;;  %v3590_v60 = vld [vmem:[%s5508_s6 + $0xe0] sm:$0xff]   ;;  %v4175_v11 = vld [vmem:[%s5508_s6 + $0x238] sm:$0xff]  }
  0x4e   : > { %v4111_v25 = vmax.f32 %v495_v22, 0.0  ;;  %3218 = vmatprep.subr.bf16.mxu0 %v3616_v13  ;;  %v683_v35 = vrot.slane %v4105_v27, 7  ;;  %v699_v36 = vrot.slane %v4107_v28, 7  ;;  %v475_v48 = vadd.f32 %v3964_v18, %v437_v12  ;;  %v3592_v12 = vld [vmem:[%s5508_s6 + $0xd8] sm:$0xff]   ;;  %v2969_v7 = vld [vmem:[%s3913_s17 + $0x28] sm:$0xff]  }
  0x4f   : > { %5532 = vst [vmem:[#allocation10_spill] sm:$0xff] %v4121_v34  ;;  %v4126_v49 = vpack.c.bf16 %v726_v19, %v742_v26  ;;  %v4133_v50 = vpack.c.bf16 %v4107_v28, %v4105_v27  ;;  %v694_v52 = vrot.slane %v4109_v29, 7  ;;  %v459_v58 = vmul.f32 %v2960_v21, %v3942_v63 }
  0x50   : > { %v710_v53 = vrot.slane %v4111_v25, 7  ;;  %3097 = vmatpush3.bf16.msra.mxu1 %v3586_v8  ;;  %v4139_v57 = vpack.c.bf16 %v4111_v25, %v4109_v29  ;;  %v496_v59 = vadd.f32 %v3964_v18, %v458_v31  ;;  %v4148_v61 = vmax.f32 %v474_v30, 0.0 }
  0x51   : > { %3219 = vmatpush3.bf16.msra.mxu0 %v3617_v56  ;;  %3098 = vmatprep.subr.bf16.mxu1 %v3588_v24  ;;  %v716_v3 = vsel %vm713_vm2, %v683_v35, %v699_v36  ;;  %v732_v21 = vsel %vm713_vm2, %v699_v36, %v683_v35  ;;  %v4160_v1 = vmax.f32 %v475_v48, 0.0  ;;  %v497_v4 = vadd.f32 %v3964_v18, %v459_v58  ;;  %v3594_v24 = vld [vmem:[%s5508_s6 + $0x98] sm:$0xff]   ;;  %v3596_v36 = vld [vmem:[%s5508_s6 + $0xd0] sm:$0xff]  }
  0x52   : > { %3220 = vmatprep.subr.bf16.mxu0 %v3620_v33  ;;  %5533 = vst [vmem:[#allocation11_spill] sm:$0xff] %v4139_v57  ;;  %2528 = vmatmul.mubr.msk.bf16.gmra.mxu0 %vm4024_vm4, %v4121_v34  ;;  %v438_v6 = vmul.f32 %v2919_v23, %v3942_v63  ;;  %v439_v10 = vmul.f32 %v2920_v32, %v3942_v63  ;;  %v4185_v15 = vmax.f32 %v496_v59, 0.0  ;;  %v684_v8 = vrot.slane %v4148_v61, 7 }
  0x53   : > { %2572 = vmatmul.mubr.msk.bf16.gmra.mxu1 %vm4024_vm4, %v4126_v49  ;;  %1421 = vmatprep.mubr.bf16.mxu0 %v4133_v50  ;;  %v727_v13 = vsel %vm713_vm2, %v694_v52, %v710_v53  ;;  %v743_v14 = vsel %vm713_vm2, %v710_v53, %v694_v52  ;;  %v4187_v16 = vmax.f32 %v497_v4, 0.0  ;;  %v4190_v56 = vpack.c.bf16 %v716_v3, %v732_v21  ;;  %v3598_v3 = vld [vmem:[%s5508_s6 + $0xc8] sm:$0xff]  }
  0x54   : > { %3099 = vmatpush3.bf16.msra.mxu1 %v3589_v20  ;;  %1509 = vmatprep.mubr.bf16.mxu1 %v4139_v57  ;;  %v700_v17 = vrot.slane %v4160_v1, 7  ;;  %v476_v19 = vadd.f32 %v3964_v18, %v438_v6  ;;  %v477_v22 = vadd.f32 %v3964_v18, %v439_v10  ;;  %v4196_v23 = vpack.c.bf16 %v727_v13, %v743_v14  ;;  %v2971_v6 = vld [vmem:[%s3913_s17 + $0x38] sm:$0xff]  }
  0x55   : > { %3100 = vmatprep.subr.bf16.mxu1 %v3590_v60  ;;  %3221 = vmatpush3.bf16.msra.mxu0 %v3621_v5  ;;  %v4203_v26 = vpack.c.bf16 %v4160_v1, %v4148_v61  ;;  %v2923_v30 = vunpack.c.l.bf16 %v2969_v7  ;;  %v2924_v31 = vunpack.c.h.bf16 %v2969_v7  ;;  %v4208_v32 = vpack.c.bf16 %v4187_v16, %v4185_v15  ;;  %v2970_v60 = vld [vmem:[%s3913_s17 + $0x30] sm:$0xff]  }
  0x56   : > { %3454 = vmatprep.subr.bf16.mxu0 %v4175_v11  ;;  %v695_v33 = vrot.slane %v4185_v15, 7  ;;  %v711_v35 = vrot.slane %v4187_v16, 7  ;;  %v717_v48 = vsel %vm713_vm2, %v684_v8, %v700_v17  ;;  %v733_v20 = vsel %vm713_vm2, %v700_v17, %v684_v8 }
  0x57   : > { %5534 = vst [vmem:[#allocation12_spill] sm:$0xff] %v4208_v32  ;;  %v4222_v52 = vmax.f32 %v476_v19, 0.0  ;;  %v4224_v53 = vmax.f32 %v477_v22, 0.0  ;;  %v440_v58 = vmul.f32 %v2923_v30, %v3942_v63  ;;  %v441_v59 = vmul.f32 %v2924_v31, %v3942_v63  ;;  %v3599_v22 = vld [vmem:[%s5508_s6 + $0x88] sm:$0xff]  }
  0x58   : > { %3101 = vmatpush3.bf16.msra.mxu1 %v3591_v62  ;;  %v3597_v62 = vld [vmem:[%s5508_s6 + $0x90] sm:$0xff]   ;;  %v728_v21 = vsel %vm713_vm2, %v695_v33, %v711_v35  ;;  %v744_v4 = vsel %vm713_vm2, %v711_v35, %v695_v33  ;;  %v4244_v5 = vpack.c.bf16 %v717_v48, %v733_v20  ;;  %v2927_v13 = vunpack.c.l.bf16 %v2970_v60 }
  0x59   : > { %3102 = vmatprep.subr.bf16.mxu1 %v3592_v12  ;;  %v685_v10 = vrot.slane %v4222_v52, 7  ;;  %v701_v12 = vrot.slane %v4224_v53, 7  ;;  %v2928_v14 = vunpack.c.h.bf16 %v2970_v60  ;;  %v4249_v7 = vpack.c.bf16 %v728_v21, %v744_v4 }
  0x5a   : > { %2532 = vmatmul.mubr.msk.bf16.gmra.mxu0 %vm4024_vm4, %v4190_v56  ;;  %v4253_v8 = vpack.c.bf16 %v4224_v53, %v4222_v52  ;;  %v478_v17 = vadd.f32 %v3964_v18, %v440_v58  ;;  %v479_v19 = vadd.f32 %v3964_v18, %v441_v59  ;;  %v2931_v30 = vunpack.c.l.bf16 %v2971_v6  ;;  %v3602_v59 = vld [vmem:[%s5508_s6 + $0x80] sm:$0xff]  }
  0x5b   : > { %2576 = vmatmul.mubr.msk.bf16.gmra.mxu1 %vm4024_vm4, %v4196_v23  ;;  %1429 = vmatprep.mubr.bf16.mxu0 %v4203_v26  ;;  %5535 = vst [vmem:[#allocation13_spill] sm:$0xff] %v4249_v7  ;;  %v2932_v31 = vunpack.c.h.bf16 %v2971_v6  ;;  %v442_v33 = vmul.f32 %v2927_v13, %v3942_v63  ;;  %v443_v35 = vmul.f32 %v2928_v14, %v3942_v63  ;;  %v678_v60 = vadd.s32 8, %v3919_v40  ;;  %v5540_v40 = vld [vmem:[#allocation10_spill] sm:$0xff] }
  0x5c   : > { %3103 = vmatpush3.bf16.msra.mxu1 %v3594_v24  ;;  %1517 = vmatprep.mubr.bf16.mxu1 %v4208_v32  ;;  %v3600_v24 = vld [vmem:[%s5508_s6 + $0xc0] sm:$0xff]   ;;  %v734_v48 = vsel %vm713_vm2, %v701_v12, %v685_v10  ;;  %v4276_v20 = vmax.f32 %v478_v17, 0.0  ;;  %v4278_v58 = vmax.f32 %v479_v19, 0.0  ;;  %v800_v21 = vrot.slane %v3994_v38, 1  ;;  %v3605_v17 = vld [vmem:[%s5508_s6 + $0x1b8] sm:$0xff]  }
  0x5d   : > { %3104 = vmatprep.subr.bf16.mxu1 %v3596_v36  ;;  %v718_v36 = vsel %vm713_vm2, %v685_v10, %v701_v12  ;;  %v444_v4 = vmul.f32 %v2931_v30, %v3942_v63  ;;  %v445_v6 = vmul.f32 %v2932_v31, %v3942_v63  ;;  %v2973_v10 = vld [vmem:[%s3913_s17 + $0x48] sm:$0xff]   ;;  %v481_v13 = vadd.f32 %v3964_v18, %v443_v35  ;;  %v3608_v30 = vld [vmem:[%s5508_s6 + $0x1f0] sm:$0xff]   ;;  %v2972_v35 = vld [vmem:[%s3913_s17 + $0x40] sm:$0xff]  }
  0x5e   : > { %v4295_v12 = vpack.c.bf16 %v718_v36, %v734_v48  ;;  %v686_v38 = vrot.slane %v4276_v20, 7  ;;  %v702_v14 = vrot.slane %v4278_v58, 7  ;;  %vm2981_vm6 = vcmp.ne.s32.totalorder %v678_v60, 15 }
  0x5f   : > { %v2939_v19 = vunpack.c.l.bf16 %v2973_v10  ;;  %v482_v31 = vadd.f32 %v3964_v18, %v444_v4  ;;  %v2940_v36 = vunpack.c.h.bf16 %v2973_v10  ;;  %v785_v2 = vrot.slane %v4000_v42, 1  ;;  %v3609_v42 = vld [vmem:[%s5508_s6 + $0x1b0] sm:$0xff]   ;;  %vm4366_vm7 = vmpackc.low %vm2981_vm6, %vm3733_vm3 }
  0x60   : > { %3105 = vmatpush3.bf16.msra.mxu1 %v3597_v62  ;;  %v3604_v62 = vld [vmem:[%s5508_s6 + $0x1f8] sm:$0xff]   ;;  %v5536_v32 = vmov 0   ;;  %v719_v4 = vsel %vm713_vm2, %v686_v38, %v702_v14  ;;  %v801_v10 = vrot.slane %v4002_v43, 1 }
  0x61   : > { %3106 = vmatprep.subr.bf16.mxu1 %v3598_v3  ;;  %v784_v3 = vrot.slane %v3992_v37, 1  ;;  %v4302_v37 = vpack.c.bf16 %v4278_v58, %v4276_v20 }
  0x62   : > { %2536 = vmatmul.mubr.msk.bf16.gmra.mxu0 %vm4024_vm4, %v4244_v5 }
  0x63   : > { %2580 = vmatmul.mubr.msk.bf16.gmra.mxu1 %vm4024_vm4, %v4249_v7  ;;  %1437 = vmatprep.mubr.bf16.mxu0 %v4253_v8  ;;  %v833_v48 = vsel %vm816_vm5, %v800_v21, %v784_v3 }
  0x64   : > { %3107 = vmatpush3.bf16.msra.mxu1 %v3599_v22  ;;  %2584 = vmatprep.mubr.msk.bf16.mxu1 %vm4024_vm4, %v4052_v0  ;;  %v480_v0 = vadd.f32 %v3964_v18, %v442_v33  ;;  %v2974_v22 = vld [vmem:[%s3913_s17 + $0x50] sm:$0xff]   ;;  %v483_v33 = vadd.f32 %v3964_v18, %v445_v6  ;;  %v735_v6 = vsel %vm713_vm2, %v702_v14, %v686_v38  ;;  %v4343_v38 = vmax.f32 %v482_v31, 0.0 }
  0x65   : > { %3108 = vmatprep.subr.bf16.mxu1 %v3600_v24  ;;  %v817_v24 = vsel %vm816_vm5, %v784_v3, %v800_v21  ;;  %v2943_v57 = vunpack.c.l.bf16 %v2974_v22  ;;  %v2935_v3 = vunpack.c.l.bf16 %v2972_v35  ;;  %v448_v21 = vmul.f32 %v2939_v19, %v3942_v63 }
  0x66   : > { %v4345_v43 = vmax.f32 %v483_v33, 0.0  ;;  %v786_v14 = vrot.slane %v4105_v27, 1  ;;  %v4351_v55 = vpack.c.bf16 %v719_v4, %v735_v6  ;;  %v3618_v6 = vld [vmem:[%s5508_s6 + $0x1e0] sm:$0xff]  }
  0x67   : > { %v450_v27 = vmul.f32 %v2943_v57, %v3942_v63  ;;  %v688_v57 = vrot.slane %v4343_v38, 7 }
  0x68   : > { %3109 = vmatpush3.bf16.msra.mxu1 %v3602_v59  ;;  %v4323_v59 = vmax.f32 %v480_v0, 0.0  ;;  %v449_v0 = vmul.f32 %v2940_v36, %v3942_v63  ;;  %v446_v36 = vmul.f32 %v2935_v3, %v3942_v63  ;;  %v704_v4 = vrot.slane %v4345_v43, 7 }
  0x69   : > { %3318 = vmatprep.subr.bf16.mxu1 %v3604_v62  ;;  %v4325_v62 = vmax.f32 %v481_v13, 0.0  ;;  %v2944_v13 = vunpack.c.h.bf16 %v2974_v22  ;;  %v802_v22 = vrot.slane %v4107_v28, 1  ;;  %v3615_v28 = vld [vmem:[%s5508_s6 + $0x1a8] sm:$0xff]   ;;  %v818_v3 = vsel %vm816_vm5, %v785_v2, %v801_v10 }
  0x6a   : > { %2540 = vmatmul.mubr.msk.bf16.gmra.mxu0 %vm4024_vm4, %v4295_v12  ;;  %v687_v47 = vrot.slane %v4323_v59, 7 }
  0x6b   : > { %1559 = vmatmul.mubr.bf16.vlgmr.msra.gmra.mxu1 %v5536_v32  ;;  %1445 = vmatprep.mubr.bf16.mxu0 %v4302_v37  ;;  %v3613_v32 = vld [vmem:[%s5508_s6 + $0x1e8] sm:$0xff]   ;;  %v703_v19 = vrot.slane %v4325_v62, 7  ;;  %v4360_v31 = vpack.c.bf16 %v4325_v62, %v4323_v59  ;;  %v451_v33 = vmul.f32 %v2944_v13, %v3942_v63  ;;  %v488_v13 = vadd.f32 %v3964_v18, %v450_v27 }
  0x6c   : > { %3319 = vmatpush3.bf16.msra.mxu1 %v3605_v17  ;;  %2588 = vmatprep.mubr.msk.bf16.mxu1 %vm4024_vm4, %v4121_v34  ;;  %v2936_v17 = vunpack.c.h.bf16 %v2972_v35  ;;  %v737_v27 = vsel %vm713_vm2, %v704_v4, %v688_v57 }
  0x6d   : > { %3320 = vmatprep.subr.bf16.mxu1 %v3608_v30  ;;  %v4356_v30 = vpack.c.bf16 %v833_v48, %v817_v24  ;;  %v486_v24 = vadd.f32 %v3964_v18, %v448_v21  ;;  %v487_v48 = vadd.f32 %v3964_v18, %v449_v0  ;;  %v834_v21 = vsel %vm816_vm5, %v801_v10, %v785_v2 }
  0x6e   : > { %v447_v60 = vmul.f32 %v2936_v17, %v3942_v63  ;;  %v736_v0 = vsel %vm713_vm2, %v703_v19, %v687_v47  ;;  %v489_v17 = vadd.f32 %v3964_v18, %v451_v33  ;;  %v835_v2 = vsel %vm816_vm5, %v802_v22, %v786_v14 }
  0x6f   : > { %v484_v10 = vadd.f32 %v3964_v18, %v446_v36  ;;  %v4407_v34 = vmax.f32 %v486_v24, 0.0  ;;  %v4409_v7 = vmax.f32 %v487_v48, 0.0  ;;  %v4424_v36 = vpack.c.bf16 %v834_v21, %v818_v3  ;;  %v3623_v3 = vld [vmem:[%s5508_s6 + $0x198] sm:$0xff]  }
  0x70   : > { %3321 = vmatpush3.bf16.msra.mxu1 %v3609_v42  ;;  %v720_v42 = vsel %vm713_vm2, %v687_v47, %v703_v19  ;;  %v3619_v47 = vld [vmem:[%s5508_s6 + $0x1a0] sm:$0xff]   ;;  %v721_v19 = vsel %vm713_vm2, %v688_v57, %v704_v4  ;;  %v485_v33 = vadd.f32 %v3964_v18, %v447_v60  ;;  %v4430_v48 = vpack.c.bf16 %v4345_v43, %v4343_v38 }
  0x71   : > { %3322 = vmatprep.subr.bf16.mxu1 %v3613_v32  ;;  %v819_v32 = vsel %vm816_vm5, %v786_v14, %v802_v22  ;;  %v3622_v14 = vld [vmem:[%s5508_s6 + $0x1d8] sm:$0xff]   ;;  %v4422_v22 = vpack.c.bf16 %v720_v42, %v736_v0  ;;  %v809_v24 = vrot.slane %v4409_v7, 1  ;;  %v4434_v4 = vmax.f32 %v488_v13, 0.0  ;;  %v3625_v13 = vld [vmem:[%s5508_s6 + $0x1d0] sm:$0xff]  }
  0x72   : > { %2544 = vmatmul.mubr.msk.bf16.gmra.mxu0 %vm4024_vm4, %v4351_v55  ;;  %v4432_v57 = vpack.c.bf16 %v835_v2, %v819_v32  ;;  %v4436_v60 = vmax.f32 %v489_v17, 0.0  ;;  %v4440_v42 = vmax.f32 %v484_v10, 0.0  ;;  %v4449_v0 = vmax.f32 %v485_v33, 0.0 }
  0x73   : > { %2592 = vmatmul.mubr.msk.bf16.gmra.mxu1 %vm4366_vm7, %v4356_v30  ;;  %1453 = vmatprep.mubr.bf16.mxu0 %v4360_v31  ;;  %v794_v2 = vrot.slane %v4434_v4, 1  ;;  %v812_v33 = vrot.slane %v4006_v45, 1 }
  0x74   : > { %2596 = vmatprep.mubr.msk.bf16.mxu1 %vm4024_vm4, %v4190_v56  ;;  %3323 = vmatpush3.bf16.msra.mxu1 %v3615_v28  ;;  %v793_v28 = vrot.slane %v4407_v34, 1  ;;  %v810_v10 = vrot.slane %v4436_v60, 1 }
  0x75   : > { %3324 = vmatprep.subr.bf16.mxu1 %v3618_v6  ;;  %v4438_v6 = vpack.c.bf16 %v721_v19, %v737_v27  ;;  %v811_v19 = vrot.slane %v3998_v41, 1  ;;  %v796_v27 = vrot.slane %v4004_v44, 1  ;;  %v813_v41 = vrot.slane %v4111_v25, 1  ;;  %v3626_v44 = vld [vmem:[%s5508_s6 + $0x190] sm:$0xff]  }
  0x76   : > { %v826_v21 = vsel %vm816_vm5, %v793_v28, %v809_v24  ;;  %v842_v32 = vsel %vm816_vm5, %v809_v24, %v793_v28  ;;  %v843_v28 = vsel %vm816_vm5, %v810_v10, %v794_v2 }
  0x77   : > { %v4454_v17 = vpack.c.bf16 %v842_v32, %v826_v21  ;;  %v845_v32 = vsel %vm816_vm5, %v812_v33, %v796_v27 }
  0x78   : > { %3325 = vmatpush3.bf16.msra.mxu1 %v3619_v47  ;;  %v795_v47 = vrot.slane %v3996_v39, 1  ;;  %v797_v39 = vrot.slane %v4109_v29, 1  ;;  %v3628_v29 = vld [vmem:[%s5508_s6 + $0x1c8] sm:$0xff]  }
  0x79   : > { %3326 = vmatprep.subr.bf16.mxu1 %v3622_v14  ;;  %v827_v14 = vsel %vm816_vm5, %v794_v2, %v810_v10  ;;  %v4500_v10 = vpack.c.bf16 %v4449_v0, %v4440_v42 }
  0x7a   : > { %2548 = vmatmul.mubr.msk.bf16.gmra.mxu0 %vm4024_vm4, %v4422_v22  ;;  %v4481_v45 = vpack.c.bf16 %v843_v28, %v827_v14  ;;  %v828_v24 = vsel %vm816_vm5, %v795_v47, %v811_v19  ;;  %v844_v21 = vsel %vm816_vm5, %v811_v19, %v795_v47  ;;  %v830_v2 = vsel %vm816_vm5, %v797_v39, %v813_v41 }
  0x7b   : > { %2600 = vmatmul.mubr.msk.bf16.gmra.mxu1 %vm4366_vm7, %v4424_v36  ;;  %1461 = vmatprep.mubr.bf16.mxu0 %v4430_v48  ;;  %v4490_v25 = vpack.c.bf16 %v844_v21, %v828_v24  ;;  %v846_v19 = vsel %vm816_vm5, %v813_v41, %v797_v39  ;;  %v705_v14 = vrot.slane %v4449_v0, 7  ;;  %v787_v24 = vrot.slane %v4148_v61, 1  ;;  %v3631_v39 = vld [vmem:[%s5508_s6 + $0x1c0] sm:$0xff]  }
  0x7c   : > { %2604 = vmatprep.mubr.msk.bf16.mxu1 %vm4024_vm4, %v4244_v5  ;;  %3327 = vmatpush3.bf16.msra.mxu1 %v3623_v3  ;;  %v829_v3 = vsel %vm816_vm5, %v796_v27, %v812_v33  ;;  %v4508_v28 = vpack.c.bf16 %v846_v19, %v830_v2  ;;  %v798_v27 = vrot.slane %v4185_v15, 1  ;;  %v814_v33 = vrot.slane %v4187_v16, 1  ;;  %v2979_v2 = vld [vmem:[%s3913_s17 + $0x78] sm:$0xff]   ;;  %s3734_s17 = smov [#allocation4]  }
  0x7d   : > { %3328 = vmatprep.subr.bf16.mxu1 %v3625_v13  ;;  %v689_v13 = vrot.slane %v4440_v42, 7  ;;  %v4503_v47 = vpack.c.bf16 %v845_v32, %v829_v3  ;;  %v803_v21 = vrot.slane %v4160_v1, 1  ;;  %v3629_v3 = vld [vmem:[%s5508_s6 + $0x188] sm:$0xff]   ;;  %v3632_v32 = vld [vmem:[%s5508_s6 + $0x180] sm:$0xff]   ;;  %v788_v19 = vrot.slane %v4222_v52, 1  ;;  %s3644_s25 = sshll.u32 %s3734_s17, 4  ;;  %s3645_s25 = int_to_ptr.vmem [resolvable:$false] %s3644_s25 }
  0x7e   : > { %v831_v15 = vsel %vm816_vm5, %v798_v27, %v814_v33  ;;  %v847_v16 = vsel %vm816_vm5, %v814_v33, %v798_v27  ;;  %v706_v27 = vrot.slane %v4409_v7, 7  ;;  %v804_v33 = vrot.slane %v4224_v53, 1  ;;  %s3646_s0 = scalar_lea.vmem %s3645_s25, 8192  ;;  %p3647_p0 = scmp.lt.s32.totalorder %s5424_s23, %s3645_s25 }
  0x7f   : > { %v4527_v61 = vpack.c.bf16 %v847_v16, %v831_v15  ;;  %v722_v1 = vsel %vm713_vm2, %v689_v13, %v705_v14  ;;  %v738_v41 = vsel %vm713_vm2, %v705_v14, %v689_v13  ;;  %v690_v14 = vrot.slane %v4407_v34, 7  ;;  %p3648_p1 = scmp.lt.s32.totalorder %s3646_s0, %s3640_s18 }
  0x80   : > { %3329 = vmatpush3.bf16.msra.mxu1 %v3626_v44  ;;  %v820_v44 = vsel %vm816_vm5, %v787_v24, %v803_v21  ;;  %v4549_v13 = vpack.c.bf16 %v722_v1, %v738_v41  ;;  %v837_v53 = vsel %vm816_vm5, %v804_v33, %v788_v19 }
  0x81   : > { %3330 = vmatprep.subr.bf16.mxu1 %v3628_v29  ;;  %v836_v29 = vsel %vm816_vm5, %v803_v21, %v787_v24  ;;  %v4558_v24 = vpack.c.bf16 %v4409_v7, %v4407_v34  ;;  %v2963_v21 = vunpack.c.l.bf16 %v2979_v2  ;;  %v723_v52 = vsel %vm713_vm2, %v690_v14, %v706_v27  ;;  %p3649_p2 = por %p3648_p1, %p3647_p0 }
  0x82   : > { %2552 = vmatmul.mubr.msk.bf16.gmra.mxu0 %vm4024_vm4, %v4438_v6  ;;  %v4554_v15 = vpack.c.bf16 %v836_v29, %v820_v44  ;;  %v739_v34 = vsel %vm713_vm2, %v706_v27, %v690_v14  ;;  %v4586_v44 = vpack.c.bf16 %v4436_v60, %v4434_v4  ;;  %v691_v29 = vrot.slane %v4434_v4, 7 }
  0x83   : > { %2608 = vmatmul.mubr.msk.bf16.gmra.mxu1 %vm4366_vm7, %v4432_v57  ;;  %1469 = vmatprep.mubr.bf16.mxu0 %v4500_v10  ;;  %v460_v7 = vmul.f32 %v2963_v21, %v3942_v63  ;;  %v4580_v1 = vpack.c.bf16 %v723_v52, %v739_v34  ;;  %v805_v14 = vrot.slane %v4278_v58, 1  ;;  %v790_v34 = vrot.slane %v4323_v59, 1  ;;  %p3650_p3 = pnand %p3649_p2, %p3643_p13 }
  0x84   : > { %2612 = vmatprep.mubr.msk.bf16.mxu1 %vm4024_vm4, %v4295_v12  ;;  %3331 = vmatpush3.bf16.msra.mxu1 %v3629_v3  ;;  %v2964_v3 = vunpack.c.h.bf16 %v2979_v2 }
  0x85   : > { %3332 = vmatprep.subr.bf16.mxu1 %v3631_v39  ;;  %v821_v39 = vsel %vm816_vm5, %v788_v19, %v804_v33  ;;  %v498_v2 = vadd.f32 %v3964_v18, %v460_v7  ;;  %v789_v19 = vrot.slane %v4276_v20, 1  ;;  %v806_v7 = vrot.slane %v4325_v62, 1 }
  0x86   : > { %v461_v16 = vmul.f32 %v2964_v3, %v3942_v63  ;;  %v4582_v41 = vpack.c.bf16 %v837_v53, %v821_v39 }
  0x87   : > { %v822_v58 = vsel %vm816_vm5, %v789_v19, %v805_v14  ;;  %v838_v27 = vsel %vm816_vm5, %v805_v14, %v789_v19  ;;  %v823_v59 = vsel %vm816_vm5, %v790_v34, %v806_v7  ;;  %v839_v62 = vsel %vm816_vm5, %v806_v7, %v790_v34  ;;  %v5539_v34 = vld [vmem:[#allocation13_spill] sm:$0xff] }
  0x88   : > { %3333 = vmatpush3.bf16.msra.mxu1 %v3632_v32  ;;  %v707_v32 = vrot.slane %v4436_v60, 7  ;;  %v499_v63 = vadd.f32 %v3964_v18, %v461_v16  ;;  %v4605_v60 = vmax.f32 %v498_v2, 0.0  ;;  %v4620_v52 = vpack.c.bf16 %v838_v27, %v822_v58  ;;  %v3635_v27 = vld [vmem:[%s5508_s6 + $0x210] sm:$0xff]  }
  0x89   : > { %v791_v2 = vrot.slane %v4343_v38, 1  ;;  %v792_v14 = vrot.slane %v4440_v42, 1 }
  0x8a   : > { %2556 = vmatmul.mubr.msk.bf16.gmra.mxu0 %vm4024_vm4, %v4549_v13  ;;  %v724_v4 = vsel %vm713_vm2, %v691_v29, %v707_v32  ;;  %v740_v18 = vsel %vm713_vm2, %v707_v32, %v691_v29  ;;  %v4607_v20 = vmax.f32 %v499_v63, 0.0  ;;  %v799_v33 = vrot.slane %v4605_v60, 1 }
  0x8b   : > { %2616 = vmatmul.mubr.msk.bf16.gmra.mxu1 %vm4366_vm7, %v4554_v15  ;;  %1477 = vmatprep.mubr.bf16.mxu0 %v4558_v24  ;;  %v4618_v3 = vpack.c.bf16 %v724_v4, %v740_v18  ;;  %v4650_v32 = vpack.c.bf16 %v839_v62, %v823_v59  ;;  %v807_v63 = vrot.slane %v4345_v43, 1  ;;  %v808_v4 = vrot.slane %v4449_v0, 1  ;;  %v3633_v18 = vld [vmem:[%s5508_s6 + $0x220] sm:$0xff]   ;;  %v3634_v0 = vld [vmem:[%s5508_s6 + $0x218] sm:$0xff]  }
  0x8c   : > { %2620 = vmatprep.mubr.msk.bf16.mxu1 %vm4024_vm4, %v4351_v55  ;;  %v815_v21 = vrot.slane %v4607_v20, 1  ;;  %v4632_v29 = vpack.c.bf16 %v4607_v20, %v4605_v60 }
  0x8d   : > { %v824_v38 = vsel %vm816_vm5, %v791_v2, %v807_v63  ;;  %v840_v43 = vsel %vm816_vm5, %v807_v63, %v791_v2  ;;  %v841_v42 = vsel %vm816_vm5, %v808_v4, %v792_v14 }
  0x8e   : > { %v832_v39 = vsel %vm816_vm5, %v799_v33, %v815_v21  ;;  %v848_v53 = vsel %vm816_vm5, %v815_v21, %v799_v33  ;;  %v4675_v19 = vpack.c.bf16 %v840_v43, %v824_v38  ;;  %v3636_v33 = vld [vmem:[%s5508_s6 + $0x208] sm:$0xff]   ;;  %v3637_v21 = vld [vmem:[%s5508_s6 + $0x200] sm:$0xff]  }
  0x8f   : > { %v4628_v16 = vpack.c.bf16 %v848_v53, %v832_v39  ;;  %v696_v39 = vrot.slane %v4605_v60, 7  ;;  %v712_v53 = vrot.slane %v4607_v20, 7 }
  0x91   : > { %v729_v7 = vsel %vm713_vm2, %v696_v39, %v712_v53  ;;  %v745_v60 = vsel %vm713_vm2, %v712_v53, %v696_v39 }
  0x92   : > { %2560 = vmatmul.mubr.msk.bf16.gmra.mxu0 %vm4024_vm4, %v4580_v1  ;;  %v4766_v20 = vpack.c.bf16 %v729_v7, %v745_v60 }
  0x93   : > { %2624 = vmatmul.mubr.msk.bf16.gmra.mxu1 %vm4366_vm7, %v4582_v41  ;;  %1485 = vmatprep.mubr.bf16.mxu0 %v4586_v44 }
  0x94   : > { %2628 = vmatprep.mubr.msk.bf16.mxu1 %vm4024_vm4, %v4422_v22 }
  0x9a   : > { %2564 = vmatmul.mubr.msk.bf16.gmra.mxu0 %vm4024_vm4, %v4618_v3 }
  0x9b   : > { %2632 = vmatmul.mubr.msk.bf16.gmra.mxu1 %vm4366_vm7, %v4620_v52  ;;  %2708 = vmatprep.mubr.msk.bf16.mxu0 %vm4366_vm7, %v4356_v30  ;;  %v3627_v30 = vld [vmem:[%s5508_s6 + $0x230] sm:$0xff]  }
  0x9c   : > { %2636 = vmatprep.mubr.msk.bf16.mxu1 %vm4024_vm4, %v4438_v6 }
  0xa2   : > { %1720 = vmatmul.mubr.bf16.vlgmr.msra.gmra.mxu0 %v4010_v46  ;;  %v3630_v46 = vld [vmem:[%s5508_s6 + $0x228] sm:$0xff]  }
  0xa3   : > { %2640 = vmatmul.mubr.msk.bf16.gmra.mxu1 %vm4366_vm7, %v4650_v32  ;;  %2712 = vmatprep.mubr.msk.bf16.mxu0 %vm4366_vm7, %v4424_v36 }
  0xa4   : > { %2644 = vmatprep.mubr.msk.bf16.mxu1 %vm4024_vm4, %v4549_v13  ;;  %3455 = vmatpush3.bf16.msra.mxu0 %v4175_v11  ;;  %v825_v11 = vsel %vm816_vm5, %v792_v14, %v808_v4 }
  0xa5   : > { %3456 = vmatprep.subr.bf16.mxu0 %v3627_v30  ;;  %v4699_v58 = vpack.c.bf16 %v841_v42, %v825_v11 }
  0xa8   : > { %3457 = vmatpush3.bf16.msra.mxu0 %v3627_v30 }
  0xa9   : > { %3458 = vmatprep.subr.bf16.mxu0 %v3630_v46 }
  0xaa   : > { %1728 = vmatmul.mubr.bf16.gmra.mxu0 %v4032_v54 }
  0xab   : > { %2648 = vmatmul.mubr.msk.bf16.gmra.mxu1 %vm4366_vm7, %v4675_v19  ;;  %2716 = vmatprep.mubr.msk.bf16.mxu0 %vm4366_vm7, %v4432_v57 }
  0xac   : > { %2652 = vmatprep.mubr.msk.bf16.mxu1 %vm4024_vm4, %v4580_v1  ;;  %3459 = vmatpush3.bf16.msra.mxu0 %v3630_v46 }
  0xad   : > { %3460 = vmatprep.subr.bf16.mxu0 %v3633_v18 }
  0xb0   : > { %3461 = vmatpush3.bf16.msra.mxu0 %v3633_v18 }
  0xb1   : > { %3462 = vmatprep.subr.bf16.mxu0 %v3634_v0 }
  0xb2   : > { %1736 = vmatmul.mubr.bf16.gmra.mxu0 %v4133_v50 }
  0xb3   : > { %2656 = vmatmul.mubr.msk.bf16.gmra.mxu1 %vm4366_vm7, %v4699_v58  ;;  %2720 = vmatprep.mubr.msk.bf16.mxu0 %vm4366_vm7, %v4554_v15 }
  0xb4   : > { %2660 = vmatprep.mubr.msk.bf16.mxu1 %vm4024_vm4, %v4618_v3  ;;  %3463 = vmatpush3.bf16.msra.mxu0 %v3634_v0  ;;  %v5544_v0 = vld [vmem:[#allocation12_spill] sm:$0xff] }
  0xb5   : > { %3464 = vmatprep.subr.bf16.mxu0 %v3635_v27 }
  0xb8   : > { %3465 = vmatpush3.bf16.msra.mxu0 %v3635_v27 }
  0xb9   : > { %3466 = vmatprep.subr.bf16.mxu0 %v3636_v33 }
  0xba   : > { %1744 = vmatmul.mubr.bf16.gmra.mxu0 %v4203_v26 }
  0xbb   : > { %2664 = vmatmul.mubr.msk.bf16.gmra.mxu1 %vm4366_vm7, %v4454_v17  ;;  %2724 = vmatprep.mubr.msk.bf16.mxu0 %vm4366_vm7, %v4582_v41 }
  0xbc   : > { %2668 = vmatprep.mubr.msk.bf16.mxu1 %vm4024_vm4, %v4062_v9  ;;  %3467 = vmatpush3.bf16.msra.mxu0 %v3636_v33 }
  0xbd   : > { %3468 = vmatprep.subr.bf16.mxu0 %v3637_v21 }
  0xc0   : > { %3469 = vmatpush3.bf16.msra.mxu0 %v3637_v21 }
  0xc2   : > { %1752 = vmatmul.mubr.bf16.gmra.mxu0 %v4253_v8 }
  0xc3   : > { %2672 = vmatmul.mubr.msk.bf16.gmra.mxu1 %vm4366_vm7, %v4481_v45  ;;  %2728 = vmatprep.mubr.msk.bf16.mxu0 %vm4366_vm7, %v4620_v52 }
  0xc4   : > { %2676 = vmatprep.mubr.msk.bf16.mxu1 %vm4024_vm4, %v4126_v49 }
  0xca   : > { %1760 = vmatmul.mubr.bf16.gmra.mxu0 %v4302_v37 }
  0xcb   : > { %2680 = vmatmul.mubr.msk.bf16.gmra.mxu1 %vm4366_vm7, %v4490_v25  ;;  %2732 = vmatprep.mubr.msk.bf16.mxu0 %vm4366_vm7, %v4650_v32 }
  0xcc   : > { %2684 = vmatprep.mubr.msk.bf16.mxu1 %vm4024_vm4, %v4196_v23 }
  0xd2   : > { %1768 = vmatmul.mubr.bf16.gmra.mxu0 %v4360_v31 }
  0xd3   : > { %2688 = vmatmul.mubr.msk.bf16.gmra.mxu1 %vm4366_vm7, %v4503_v47  ;;  %2736 = vmatprep.mubr.msk.bf16.mxu0 %vm4366_vm7, %v4675_v19 }
  0xd4   : > { %2692 = vmatprep.mubr.msk.bf16.mxu1 %vm4024_vm4, %v5539_v34 }
  0xda   : > { %1776 = vmatmul.mubr.bf16.gmra.mxu0 %v4430_v48 }
  0xdb   : > { %2696 = vmatmul.mubr.msk.bf16.gmra.mxu1 %vm4366_vm7, %v4508_v28  ;;  %2740 = vmatprep.mubr.msk.bf16.mxu0 %vm4366_vm7, %v4699_v58 }
  0xdc   : > { %2700 = vmatprep.mubr.msk.bf16.mxu1 %vm4024_vm4, %v4766_v20 }
  0xe2   : > { %1784 = vmatmul.mubr.bf16.gmra.mxu0 %v4500_v10 }
  0xe3   : > { %2704 = vmatmul.mubr.msk.bf16.gmra.mxu1 %vm4366_vm7, %v4527_v61  ;;  %2744 = vmatprep.mubr.msk.bf16.mxu0 %vm4366_vm7, %v4454_v17 }
  0xe4   : > { %1880 = vmatprep.mubr.bf16.mxu1 %v4032_v54 }
  0xea   : > { %1792 = vmatmul.mubr.bf16.gmra.mxu0 %v4558_v24 }
  0xeb   : > { %2772 = vmatmul.mubr.msk.bf16.vlgmr.msra.gmra.mxu1 %vm4024_vm4, %v5540_v40  ;;  %2748 = vmatprep.mubr.msk.bf16.mxu0 %vm4366_vm7, %v4481_v45 }
  0xec   : > { %1888 = vmatprep.mubr.bf16.mxu1 %v4133_v50  ;;  %v5541_v50 = vld [vmem:[#allocation8_spill] sm:$0xff] }
  0xf2   : > { %1800 = vmatmul.mubr.bf16.gmra.mxu0 %v4586_v44 }
  0xf3   : > { %2776 = vmatmul.mubr.msk.bf16.gmra.mxu1 %vm4024_vm4, %v4190_v56  ;;  %2752 = vmatprep.mubr.msk.bf16.mxu0 %vm4366_vm7, %v4490_v25  ;;  %v5542_v56 = vld [vmem:[#allocation9_spill] sm:$0xff] }
  0xf4   : > { %1896 = vmatprep.mubr.bf16.mxu1 %v4203_v26 }
  0xf8   : > { %v2998_v59 = vpop.f32.mrf.mxu0 }
  0xfa   : > { %v2999_v62 = vpop.f32.mrf.mxu0  ;;  %1808 = vmatmul.mubr.bf16.gmra.mxu0 %v5541_v50 }
  0xfb   : > { %v4795_v2 = vadd.f32 %v2999_v62, %v2998_v59  ;;  %2780 = vmatmul.mubr.msk.bf16.gmra.mxu1 %vm4024_vm4, %v4244_v5  ;;  %2756 = vmatprep.mubr.msk.bf16.mxu0 %vm4366_vm7, %v4503_v47  ;;  %v5543_v5 = vld [vmem:[#allocation11_spill] sm:$0xff] }
  0xfc   : > { %v3001_v54 = vpop.f32.mrf.mxu0  ;;  %1904 = vmatprep.mubr.bf16.mxu1 %v4253_v8 }
  0xfe   : > { %v3002_v63 = vpop.f32.mrf.mxu0 }
  0xff   : > { %v4804_v30 = vadd.f32 %v3002_v63, %v3001_v54 }
 0x102   : > { %1816 = vmatmul.mubr.bf16.gmra.mxu0 %v5542_v56 }
 0x103   : > { %2784 = vmatmul.mubr.msk.bf16.gmra.mxu1 %vm4024_vm4, %v4295_v12  ;;  %2760 = vmatprep.mubr.msk.bf16.mxu0 %vm4366_vm7, %v4508_v28 }
 0x104   : > { %1912 = vmatprep.mubr.bf16.mxu1 %v4302_v37 }
 0x10a   : > { %v3004_v26 = vpop.f32.mrf.mxu0  ;;  %1824 = vmatmul.mubr.bf16.gmra.mxu0 %v5543_v5 }
 0x10b   : > { %v3070_v38 = vpop.f32.mrf.mxu1  ;;  %2788 = vmatmul.mubr.msk.bf16.gmra.mxu1 %vm4024_vm4, %v4351_v55  ;;  %2764 = vmatprep.mubr.msk.bf16.mxu0 %vm4366_vm7, %v4527_v61 }
 0x10c   : > { %v3005_v8 = vpop.f32.mrf.mxu0  ;;  %1920 = vmatprep.mubr.bf16.mxu1 %v4360_v31 }
 0x10d   : > { %v4830_v12 = vadd.f32 %v3005_v8, %v3004_v26  ;;  %v3071_v43 = vpop.f32.mrf.mxu1 }
 0x10e   : > { %v4832_v46 = vadd.f32 %v3071_v43, %v3070_v38  ;;  %v3007_v37 = vpop.f32.mrf.mxu0 }
 0x10f   : > { %v3073_v14 = vpop.f32.mrf.mxu1 }
 0x110   : > { %v3008_v4 = vpop.f32.mrf.mxu0 }
 0x111   : > { %v4834_v18 = vadd.f32 %v3008_v4, %v3007_v37  ;;  %v3074_v11 = vpop.f32.mrf.mxu1 }
 0x112   : > { %v4836_v42 = vadd.f32 %v3074_v11, %v3073_v14  ;;  %v3010_v55 = vpop.f32.mrf.mxu0  ;;  %1832 = vmatmul.mubr.bf16.gmra.mxu0 %v5544_v0 }
 0x113   : > { %v3076_v27 = vpop.f32.mrf.mxu1  ;;  %2792 = vmatmul.mubr.msk.bf16.gmra.mxu1 %vm4024_vm4, %v4422_v22  ;;  %2768 = vmatprep.mubr.msk.bf16.mxu0 %vm4366_vm7, %v4628_v16 }
 0x114   : > { %v3011_v31 = vpop.f32.mrf.mxu0  ;;  %1928 = vmatprep.mubr.bf16.mxu1 %v4430_v48 }
 0x115   : > { %v4846_v33 = vadd.f32 %v3011_v31, %v3010_v55  ;;  %v3077_v21 = vpop.f32.mrf.mxu1 }
 0x116   : > { %v4848_v39 = vadd.f32 %v3077_v21, %v3076_v27  ;;  %v3013_v53 = vpop.f32.mrf.mxu0 }
 0x117   : > { %v3079_v7 = vpop.f32.mrf.mxu1 }
 0x118   : > { %v3014_v60 = vpop.f32.mrf.mxu0 }
 0x119   : > { %v4850_v40 = vadd.f32 %v3014_v60, %v3013_v53  ;;  %v3080_v59 = vpop.f32.mrf.mxu1 }
 0x11a   : > { %v4852_v62 = vadd.f32 %v3080_v59, %v3079_v7  ;;  %v3016_v22 = vpop.f32.mrf.mxu0  ;;  %1840 = vmatmul.mubr.bf16.gmra.mxu0 %v4632_v29 }
 0x11b   : > { %v3082_v54 = vpop.f32.mrf.mxu1  ;;  %2796 = vmatmul.mubr.msk.bf16.gmra.mxu1 %vm4024_vm4, %v4438_v6  ;;  %3470 = vmatprep.mubr.msk.bf16.mxu0 %vm4366_vm7, %v4424_v36 }
 0x11c   : > { %v3017_v48 = vpop.f32.mrf.mxu0  ;;  %1936 = vmatprep.mubr.bf16.mxu1 %v4500_v10 }
 0x11d   : > { %v4862_v63 = vadd.f32 %v3017_v48, %v3016_v22  ;;  %v3083_v26 = vpop.f32.mrf.mxu1 }
 0x11e   : > { %v4864_v38 = vadd.f32 %v3083_v26, %v3082_v54  ;;  %v3019_v8 = vpop.f32.mrf.mxu0 }
 0x11f   : > { %v3085_v43 = vpop.f32.mrf.mxu1 }
 0x120   : > { %v3020_v37 = vpop.f32.mrf.mxu0 }
 0x121   : > { %v4866_v14 = vadd.f32 %v3020_v37, %v3019_v8  ;;  %v3086_v4 = vpop.f32.mrf.mxu1 }
 0x122   : > { %v4868_v11 = vadd.f32 %v3086_v4, %v3085_v43  ;;  %v3022_v6 = vpop.f32.mrf.mxu0  ;;  %3471 = vmatmul.mubr.msk.bf16.vlgmr.msra.gmra.mxu0 %vm4366_vm7, %v4432_v57 }
 0x123   : > { %v3088_v36 = vpop.f32.mrf.mxu1  ;;  %2800 = vmatmul.mubr.msk.bf16.gmra.mxu1 %vm4024_vm4, %v4549_v13  ;;  %3474 = vmatprep.mubr.msk.bf16.mxu0 %vm4366_vm7, %v4554_v15 }
 0x124   : > { %v3023_v10 = vpop.f32.mrf.mxu0  ;;  %1944 = vmatprep.mubr.bf16.mxu1 %v4558_v24 }
 0x125   : > { %v4880_v55 = vadd.f32 %v3023_v10, %v3022_v6  ;;  %v3089_v27 = vpop.f32.mrf.mxu1 }
 0x126   : > { %v4882_v31 = vadd.f32 %v3089_v27, %v3088_v36  ;;  %v3025_v21 = vpop.f32.mrf.mxu0 }
 0x127   : > { %v3091_v53 = vpop.f32.mrf.mxu1 }
 0x128   : > { %v3026_v57 = vpop.f32.mrf.mxu0 }
 0x129   : > { %v4884_v7 = vadd.f32 %v3026_v57, %v3025_v21  ;;  %v3092_v60 = vpop.f32.mrf.mxu1 }
 0x12a   : > { %v4886_v59 = vadd.f32 %v3092_v60, %v3091_v53  ;;  %v3028_v13 = vpop.f32.mrf.mxu0  ;;  %3475 = vmatmul.mubr.msk.bf16.gmra.mxu0 %vm4366_vm7, %v4582_v41 }
 0x12b   : > { %v3110_v15 = vpop.f32.mrf.mxu1  ;;  %2804 = vmatmul.mubr.msk.bf16.gmra.mxu1 %vm4024_vm4, %v4580_v1  ;;  %3478 = vmatprep.mubr.msk.bf16.mxu0 %vm4366_vm7, %v4620_v52 }
 0x12c   : > { %v3029_v24 = vpop.f32.mrf.mxu0  ;;  %1952 = vmatprep.mubr.bf16.mxu1 %v4586_v44 }
 0x12d   : > { %v4898_v22 = vadd.f32 %v3029_v24, %v3028_v13  ;;  %v3111_v54 = vpop.f32.mrf.mxu1 }
 0x12e   : > { %v3112_v48 = vadd.f32 %v3111_v54, %v3110_v15  ;;  %v3031_v26 = vpop.f32.mrf.mxu0 }
 0x12f   : > { %v3113_v8 = vpop.f32.mrf.mxu1 }
 0x130   : > { %v4901_v41 = vadd.f32 %v3112_v48, %v4795_v2  ;;  %v3032_v43 = vpop.f32.mrf.mxu0 }
 0x131   : > { %v4903_v37 = vadd.f32 %v3032_v43, %v3031_v26  ;;  %v3114_v1 = vpop.f32.mrf.mxu1 }
 0x132   : > { %v3115_v4 = vadd.f32 %v3114_v1, %v3113_v8  ;;  %v3034_v6 = vpop.f32.mrf.mxu0  ;;  %3479 = vmatmul.mubr.msk.bf16.gmra.mxu0 %vm4366_vm7, %v4650_v32 }
 0x133   : > { %v3116_v44 = vpop.f32.mrf.mxu1  ;;  %2808 = vmatmul.mubr.msk.bf16.gmra.mxu1 %vm4024_vm4, %v4618_v3  ;;  %3482 = vmatprep.mubr.msk.bf16.mxu0 %vm4366_vm7, %v4675_v19 }
 0x134   : > { %v4915_v52 = vadd.f32 %v3115_v4, %v4804_v30  ;;  %v3035_v2 = vpop.f32.mrf.mxu0  ;;  %1960 = vmatprep.mubr.bf16.mxu1 %v5541_v50 }
 0x135   : > { %v4918_v36 = vadd.f32 %v3035_v2, %v3034_v6  ;;  %v3117_v10 = vpop.f32.mrf.mxu1 }
 0x136   : > { %v3118_v27 = vadd.f32 %v3117_v10, %v3116_v44  ;;  %v3037_v32 = vpop.f32.mrf.mxu0 }
 0x137   : > { %v3119_v21 = vpop.f32.mrf.mxu1 }
 0x138   : > { %v4921_v53 = vadd.f32 %v3118_v27, %v4830_v12  ;;  %v3038_v3 = vpop.f32.mrf.mxu0 }
 0x139   : > { %v4923_v57 = vadd.f32 %v3038_v3, %v3037_v32  ;;  %v3120_v60 = vpop.f32.mrf.mxu1 }
 0x13a   : > { %v3121_v19 = vadd.f32 %v3120_v60, %v3119_v21  ;;  %v3040_v13 = vpop.f32.mrf.mxu0  ;;  %3483 = vmatmul.mubr.msk.bf16.gmra.mxu0 %vm4366_vm7, %v4699_v58 }
 0x13b   : > { %v3122_v30 = vpop.f32.mrf.mxu1  ;;  %2812 = vmatmul.mubr.msk.bf16.gmra.mxu1 %vm4024_vm4, %v4062_v9  ;;  %3486 = vmatprep.mubr.msk.bf16.mxu0 %vm4366_vm7, %v4454_v17 }
 0x13c   : > { %v4935_v50 = vadd.f32 %v3121_v19, %v4834_v18  ;;  %v3041_v12 = vpop.f32.mrf.mxu0  ;;  %1968 = vmatprep.mubr.bf16.mxu1 %v5542_v56 }
 0x13d   : > { %v4938_v15 = vadd.f32 %v3041_v12, %v3040_v13  ;;  %v3123_v24 = vpop.f32.mrf.mxu1 }
 0x13e   : > { %v3124_v54 = vadd.f32 %v3123_v24, %v3122_v30  ;;  %v3043_v58 = vpop.f32.mrf.mxu0 }
 0x13f   : > { %v3125_v48 = vpop.f32.mrf.mxu1 }
 0x140   : > { %v4941_v26 = vadd.f32 %v3124_v54, %v4846_v33  ;;  %v3044_v9 = vpop.f32.mrf.mxu0 }
 0x141   : > { %v4943_v8 = vadd.f32 %v3044_v9, %v3043_v58  ;;  %v3126_v43 = vpop.f32.mrf.mxu1 }
 0x142   : > { %v3127_v17 = vadd.f32 %v3126_v43, %v3125_v48  ;;  %v3046_v1 = vpop.f32.mrf.mxu0  ;;  %3487 = vmatmul.mubr.msk.bf16.gmra.mxu0 %vm4366_vm7, %v4481_v45 }
 0x143   : > { %v3128_v56 = vpop.f32.mrf.mxu1  ;;  %2816 = vmatmul.mubr.msk.bf16.gmra.mxu1 %vm4024_vm4, %v4126_v49  ;;  %3490 = vmatprep.mubr.msk.bf16.mxu0 %vm4366_vm7, %v4490_v25 }
 0x144   : > { %v4955_v18 = vadd.f32 %v3127_v17, %v4850_v40  ;;  %v3047_v33 = vpop.f32.mrf.mxu0  ;;  %1976 = vmatprep.mubr.bf16.mxu1 %v5543_v5 }
 0x145   : > { %v4958_v4 = vadd.f32 %v3047_v33, %v3046_v1  ;;  %v3129_v6 = vpop.f32.mrf.mxu1 }
 0x146   : > { %v3130_v44 = vadd.f32 %v3129_v6, %v3128_v56  ;;  %v3049_v45 = vpop.f32.mrf.mxu0 }
 0x147   : > { %v3131_v2 = vpop.f32.mrf.mxu1 }
 0x148   : > { %v4961_v10 = vadd.f32 %v3130_v44, %v4862_v63  ;;  %v3050_v49 = vpop.f32.mrf.mxu0 }
 0x149   : > { %v4963_v27 = vadd.f32 %v3050_v49, %v3049_v45  ;;  %v3132_v32 = vpop.f32.mrf.mxu1 }
 0x14a   : > { %v3133_v25 = vadd.f32 %v3132_v32, %v3131_v2  ;;  %v3052_v21 = vpop.f32.mrf.mxu0  ;;  %3491 = vmatmul.mubr.msk.bf16.gmra.mxu0 %vm4366_vm7, %v4503_v47 }
 0x14b   : > { %v3134_v5 = vpop.f32.mrf.mxu1  ;;  %2820 = vmatmul.mubr.msk.bf16.gmra.mxu1 %vm4024_vm4, %v4196_v23  ;;  %3494 = vmatprep.mubr.msk.bf16.mxu0 %vm4366_vm7, %v4508_v28 }
 0x14c   : > { %v4975_v40 = vadd.f32 %v3133_v25, %v4866_v14  ;;  %v3053_v63 = vpop.f32.mrf.mxu0  ;;  %1984 = vmatprep.mubr.bf16.mxu1 %v5544_v0 }
 0x14d   : > { %v4978_v3 = vadd.f32 %v3053_v63, %v3052_v21  ;;  %v3135_v60 = vpop.f32.mrf.mxu1 }
 0x14e   : > { %v3136_v19 = vadd.f32 %v3135_v60, %v3134_v5  ;;  %v3055_v47 = vpop.f32.mrf.mxu0 }
 0x14f   : > { %v3137_v13 = vpop.f32.mrf.mxu1 }
 0x150   : > { %v4981_v30 = vadd.f32 %v3136_v19, %v4880_v55  ;;  %v3056_v23 = vpop.f32.mrf.mxu0 }
 0x151   : > { %v4983_v12 = vadd.f32 %v3056_v23, %v3055_v47  ;;  %v3138_v24 = vpop.f32.mrf.mxu1 }
 0x152   : > { %v3139_v28 = vadd.f32 %v3138_v24, %v3137_v13  ;;  %v3058_v54 = vpop.f32.mrf.mxu0  ;;  %3495 = vmatmul.mubr.msk.bf16.gmra.mxu0 %vm4366_vm7, %v4527_v61 }
 0x153   : > { %v3140_v0 = vpop.f32.mrf.mxu1  ;;  %2824 = vmatmul.mubr.msk.bf16.gmra.mxu1 %vm4024_vm4, %v5539_v34  ;;  %3498 = vmatprep.mubr.msk.bf16.mxu0 %vm4366_vm7, %v4628_v16 }
 0x154   : > { %v4995_v14 = vadd.f32 %v3139_v28, %v4884_v7  ;;  %v3059_v55 = vpop.f32.mrf.mxu0  ;;  %1992 = vmatprep.mubr.bf16.mxu1 %v4632_v29  ;;  %v5545_v7 = vmov 0  }
 0x155   : > { %v4998_v58 = vadd.f32 %v3059_v55, %v3058_v54  ;;  %v3141_v48 = vpop.f32.mrf.mxu1 }
 0x156   : > { %v3142_v9 = vadd.f32 %v3141_v48, %v3140_v0  ;;  %v3061_v61 = vpop.f32.mrf.mxu0 }
 0x157   : > { %v3143_v43 = vpop.f32.mrf.mxu1 }
 0x158   : > { %v5001_v17 = vadd.f32 %v3142_v9, %v4898_v22  ;;  %v3062_v34 = vpop.f32.mrf.mxu0 }
 0x159   : > { %v5003_v1 = vadd.f32 %v3062_v34, %v3061_v61  ;;  %v3144_v35 = vpop.f32.mrf.mxu1 }
 0x15a   : > { %v3145_v16 = vadd.f32 %v3144_v35, %v3143_v43  ;;  %v3064_v56 = vpop.f32.mrf.mxu0  ;;  %3499 = vmatmul.mubr.bf16.gmra.mxu0 %v5545_v7 }
 0x15b   : > { %v3146_v33 = vpop.f32.mrf.mxu1  ;;  %2828 = vmatmul.mubr.msk.bf16.gmra.mxu1 %vm4024_vm4, %v4766_v20 }
 0x15c   : > { %v5010_v29 = vadd.f32 %v3145_v16, %v4903_v37  ;;  %v3065_v6 = vpop.f32.mrf.mxu0  ;;  %2000 = vmatprep.mubr.bf16.mxu1 %v5545_v7 }
 0x15d   : > { %v5013_v22 = vadd.f32 %v3065_v6, %v3064_v56  ;;  %v3147_v44 = vpop.f32.mrf.mxu1 }
 0x15e   : > { %v3148_v45 = vadd.f32 %v3147_v44, %v3146_v33  ;;  %v3067_v2 = vpop.f32.mrf.mxu0 }
 0x15f   : > { %v3149_v49 = vpop.f32.mrf.mxu1 }
 0x160   : > { %v5016_v32 = vadd.f32 %v3148_v45, %v4918_v36  ;;  %v3068_v25 = vpop.f32.mrf.mxu0 }
 0x161   : > { %v5018_v21 = vadd.f32 %v3068_v25, %v3067_v2  ;;  %v3150_v51 = vpop.f32.mrf.mxu1 }
 0x162   : > { %v3151_v20 = vadd.f32 %v3150_v51, %v3149_v49  ;;  %v3222_v5 = vpop.f32.mrf.mxu0 }
 0x163   : > { %v3152_v37 = vpop.f32.mrf.mxu1  ;;  %2001 = vmatmul.mubr.bf16.gmra.mxu1 %v5545_v7 }
 0x164   : > { %v5022_v63 = vadd.f32 %v3151_v20, %v4923_v57  ;;  %v3223_v60 = vpop.f32.mrf.mxu0 }
 0x165   : > { %v3153_v19 = vpop.f32.mrf.mxu1  ;;  %v3224_v47 = vadd.f32 %v3223_v60, %v3222_v5 }
 0x166   : > { %v3154_v13 = vadd.f32 %v3153_v19, %v3152_v37  ;;  %v3225_v23 = vpop.f32.mrf.mxu0 }
 0x167   : > { %v5025_v36 = vadd.f32 %v3224_v47, %v4901_v41  ;;  %v3155_v24 = vpop.f32.mrf.mxu1 }
 0x168   : > { %v5028_v28 = vadd.f32 %v3154_v13, %v4938_v15  ;;  %v3226_v54 = vpop.f32.mrf.mxu0 }
 0x169   : > { %v3156_v0 = vpop.f32.mrf.mxu1  ;;  %v3227_v55 = vadd.f32 %v3226_v54, %v3225_v23 }
 0x16a   : > { %v3157_v48 = vadd.f32 %v3156_v0, %v3155_v24  ;;  %v3228_v9 = vpop.f32.mrf.mxu0 }
 0x16b   : > { %v5031_v57 = vadd.f32 %v3227_v55, %v4915_v52  ;;  %v3158_v61 = vpop.f32.mrf.mxu1 }
 0x16c   : > { %v5034_v43 = vadd.f32 %v3157_v48, %v4943_v8  ;;  %v3229_v34 = vpop.f32.mrf.mxu0 }
 0x16d   : > { %v3159_v35 = vpop.f32.mrf.mxu1  ;;  %v3230_v41 = vadd.f32 %v3229_v34, %v3228_v9 }
 0x16e   : > { %v3160_v16 = vadd.f32 %v3159_v35, %v3158_v61  ;;  %v3231_v56 = vpop.f32.mrf.mxu0 }
 0x16f   : > { %v5037_v15 = vadd.f32 %v3230_v41, %v4921_v53  ;;  %v3161_v7 = vpop.f32.mrf.mxu1 }
 0x170   : > { %v5040_v33 = vadd.f32 %v3160_v16, %v4958_v4  ;;  %v3232_v6 = vpop.f32.mrf.mxu0 }
 0x171   : > { %v3162_v44 = vpop.f32.mrf.mxu1  ;;  %v3233_v52 = vadd.f32 %v3232_v6, %v3231_v56 }
 0x172   : > { %v3163_v45 = vadd.f32 %v3162_v44, %v3161_v7  ;;  %v3234_v2 = vpop.f32.mrf.mxu0 }
 0x173   : > { %v5043_v8 = vadd.f32 %v3233_v52, %v4935_v50  ;;  %v3164_v49 = vpop.f32.mrf.mxu1 }
 0x174   : > { %v5046_v25 = vadd.f32 %v3163_v45, %v4963_v27  ;;  %v3235_v51 = vpop.f32.mrf.mxu0 }
 0x175   : > { %v3165_v20 = vpop.f32.mrf.mxu1  ;;  %v3236_v53 = vadd.f32 %v3235_v51, %v3234_v2 }
 0x176   : > { %v3166_v5 = vadd.f32 %v3165_v20, %v3164_v49  ;;  %v3237_v37 = vpop.f32.mrf.mxu0 }
 0x177   : > { %v5049_v4 = vadd.f32 %v3236_v53, %v4941_v26  ;;  %v3167_v60 = vpop.f32.mrf.mxu1 }
 0x178   : > { %v5052_v19 = vadd.f32 %v3166_v5, %v4978_v3  ;;  %v3238_v47 = vpop.f32.mrf.mxu0 }
 0x179   : > { %v3168_v13 = vpop.f32.mrf.mxu1  ;;  %v3239_v50 = vadd.f32 %v3238_v47, %v3237_v37 }
 0x17a   : > { %v3169_v23 = vadd.f32 %v3168_v13, %v3167_v60  ;;  %v3240_v24 = vpop.f32.mrf.mxu0 }
 0x17b   : > { %v5055_v27 = vadd.f32 %v3239_v50, %v4955_v18  ;;  %v3170_v54 = vpop.f32.mrf.mxu1 }
 0x17c   : > { %v5058_v0 = vadd.f32 %v3169_v23, %v4983_v12  ;;  %v3241_v55 = vpop.f32.mrf.mxu0 }
 0x17d   : > { %v3171_v48 = vpop.f32.mrf.mxu1  ;;  %v3242_v26 = vadd.f32 %v3241_v55, %v3240_v24 }
 0x17e   : > { %v3172_v9 = vadd.f32 %v3171_v48, %v3170_v54  ;;  %v3243_v61 = vpop.f32.mrf.mxu0 }
 0x17f   : > { %v5061_v3 = vadd.f32 %v3242_v26, %v4961_v10  ;;  %v3173_v34 = vpop.f32.mrf.mxu1 }
 0x180   : > { %v5064_v35 = vadd.f32 %v3172_v9, %v4998_v58  ;;  %v3244_v41 = vpop.f32.mrf.mxu0 }
 0x181   : > { %v3174_v16 = vpop.f32.mrf.mxu1  ;;  %v3245_v18 = vadd.f32 %v3244_v41, %v3243_v61 }
 0x182   : > { %v3175_v56 = vadd.f32 %v3174_v16, %v3173_v34  ;;  %v3246_v7 = vpop.f32.mrf.mxu0 }
 0x183   : > { %v5067_v12 = vadd.f32 %v3245_v18, %v4975_v40  ;;  %v3176_v6 = vpop.f32.mrf.mxu1 }
 0x184   : > { %v5070_v44 = vadd.f32 %v3175_v56, %v5003_v1  ;;  %v3247_v52 = vpop.f32.mrf.mxu0 }
 0x185   : > { %v3177_v45 = vpop.f32.mrf.mxu1  ;;  %v3248_v10 = vadd.f32 %v3247_v52, %v3246_v7 }
 0x186   : > { %v3178_v2 = vadd.f32 %v3177_v45, %v3176_v6  ;;  %v3249_v49 = vpop.f32.mrf.mxu0 }
 0x187   : > { %v5073_v58 = vadd.f32 %v3248_v10, %v4981_v30  ;;  %v3179_v51 = vpop.f32.mrf.mxu1 }
 0x188   : > { %v5076_v20 = vadd.f32 %v3178_v2, %v5013_v22  ;;  %v3250_v53 = vpop.f32.mrf.mxu0 }
 0x189   : > { %v3180_v5 = vpop.f32.mrf.mxu1  ;;  %v3251_v40 = vadd.f32 %v3250_v53, %v3249_v49 }
 0x18a   : > { %v3181_v37 = vadd.f32 %v3180_v5, %v3179_v51  ;;  %v3252_v60 = vpop.f32.mrf.mxu0 }
 0x18b   : > { %v5079_v1 = vadd.f32 %v3251_v40, %v4995_v14  ;;  %v3182_v47 = vpop.f32.mrf.mxu1 }
 0x18c   : > { %v5082_v13 = vadd.f32 %v3181_v37, %v5018_v21  ;;  %v3253_v50 = vpop.f32.mrf.mxu0 }
 0x18d   : > { %v3183_v23 = vpop.f32.mrf.mxu1  ;;  %v3254_v30 = vadd.f32 %v3253_v50, %v3252_v60 }
 0x18e   : > { %v3184_v24 = vadd.f32 %v3183_v23, %v3182_v47  ;;  %v3255_v54 = vpop.f32.mrf.mxu0 }
 0x18f   : > { %v5085_v22 = vadd.f32 %v3254_v30, %v5001_v17  ;;  %v3185_v55 = vpop.f32.mrf.mxu1 }
 0x190   : > { %v5088_v48 = vadd.f32 %v3184_v24, %v4832_v46  ;;  %v3256_v26 = vpop.f32.mrf.mxu0 }
 0x191   : > { %v3186_v9 = vpop.f32.mrf.mxu1  ;;  %v3257_v14 = vadd.f32 %v3256_v26, %v3255_v54 }
 0x192   : > { %v3187_v61 = vadd.f32 %v3186_v9, %v3185_v55  ;;  %v3258_v34 = vpop.f32.mrf.mxu0 }
 0x193   : > { %v5091_v21 = vadd.f32 %v3257_v14, %v5010_v29  ;;  %v3188_v41 = vpop.f32.mrf.mxu1 }
 0x194   : > { %v5094_v16 = vadd.f32 %v3187_v61, %v4836_v42  ;;  %v3259_v18 = vpop.f32.mrf.mxu0 }
 0x195   : > { %v3189_v56 = vpop.f32.mrf.mxu1  ;;  %v3260_v17 = vadd.f32 %v3259_v18, %v3258_v34 }
 0x196   : > { %v3190_v7 = vadd.f32 %v3189_v56, %v3188_v41  ;;  %v3261_v6 = vpop.f32.mrf.mxu0 }
 0x197   : > { %v5097_v46 = vadd.f32 %v3260_v17, %v5016_v32  ;;  %v3191_v52 = vpop.f32.mrf.mxu1 }
 0x198   : > { %v5100_v45 = vadd.f32 %v3190_v7, %v4848_v39  ;;  %v3262_v10 = vpop.f32.mrf.mxu0 }
 0x199   : > { %v3192_v2 = vpop.f32.mrf.mxu1  ;;  %v3263_v29 = vadd.f32 %v3262_v10, %v3261_v6 }
 0x19a   : > { %v3193_v49 = vadd.f32 %v3192_v2, %v3191_v52  ;;  %v3264_v51 = vpop.f32.mrf.mxu0 }
 0x19b   : > { %v5103_v42 = vadd.f32 %v3263_v29, %v5022_v63  ;;  %v3194_v53 = vpop.f32.mrf.mxu1 }
 0x19c   : > { %v5106_v5 = vadd.f32 %v3193_v49, %v4852_v62  ;;  %v3265_v40 = vpop.f32.mrf.mxu0 }
 0x19d   : > { %v3195_v37 = vpop.f32.mrf.mxu1  ;;  %v3266_v32 = vadd.f32 %v3265_v40, %v3264_v51 }
 0x19e   : > { %v3196_v60 = vadd.f32 %v3195_v37, %v3194_v53  ;;  %v3267_v47 = vpop.f32.mrf.mxu0 }
 0x19f   : > { %v5109_v39 = vadd.f32 %v3266_v32, %v5028_v28  ;;  %v3197_v50 = vpop.f32.mrf.mxu1 }
 0x1a0   : > { %v5112_v23 = vadd.f32 %v3196_v60, %v4864_v38  ;;  %v3268_v30 = vpop.f32.mrf.mxu0 }
 0x1a1   : > { %v3198_v24 = vpop.f32.mrf.mxu1  ;;  %v3269_v63 = vadd.f32 %v3268_v30, %v3267_v47 }
 0x1a2   : > { %v3199_v54 = vadd.f32 %v3198_v24, %v3197_v50  ;;  %v3270_v55 = vpop.f32.mrf.mxu0 }
 0x1a3   : > { %v5115_v62 = vadd.f32 %v3269_v63, %v5034_v43  ;;  %v3200_v26 = vpop.f32.mrf.mxu1 }
 0x1a4   : > { %v5118_v9 = vadd.f32 %v3199_v54, %v4868_v11  ;;  %v3271_v14 = vpop.f32.mrf.mxu0 }
 0x1a5   : > { %v3201_v61 = vpop.f32.mrf.mxu1  ;;  %v3272_v28 = vadd.f32 %v3271_v14, %v3270_v55 }
 0x1a6   : > { %v3202_v34 = vadd.f32 %v3201_v61, %v3200_v26  ;;  %v3273_v41 = vpop.f32.mrf.mxu0 }
 0x1a7   : > { %v5121_v38 = vadd.f32 %v3272_v28, %v5040_v33  ;;  %v3203_v18 = vpop.f32.mrf.mxu1 }
 0x1a8   : > { %v5124_v56 = vadd.f32 %v3202_v34, %v4882_v31  ;;  %v3274_v17 = vpop.f32.mrf.mxu0 }
 0x1a9   : > { %v3204_v7 = vpop.f32.mrf.mxu1  ;;  %v3275_v43 = vadd.f32 %v3274_v17, %v3273_v41 }
 0x1aa   : > { %v3205_v6 = vadd.f32 %v3204_v7, %v3203_v18  ;;  %v3276_v52 = vpop.f32.mrf.mxu0 }
 0x1ab   : > { %v5127_v11 = vadd.f32 %v3275_v43, %v5046_v25  ;;  %v5129_v10 = vpop.f32.mrf.mxu1 }
 0x1ac   : > { %v5132_v2 = vadd.f32 %v3205_v6, %v4886_v59  ;;  %v3277_v29 = vpop.f32.mrf.mxu0 }
 0x1ad   : > { %v3278_v33 = vadd.f32 %v3277_v29, %v3276_v52  ;;  %v5134_v49 = vpop.f32.mrf.mxu1 }
 0x1ae   : > { %v3279_v51 = vpop.f32.mrf.mxu0 }
 0x1af   : > { %v5137_v31 = vadd.f32 %v3278_v33, %v5052_v19  ;;  %v5139_v53 = vpop.f32.mrf.mxu1 }
 0x1b0   : > { %v3280_v40 = vpop.f32.mrf.mxu0 }
 0x1b1   : > { %v3281_v37 = vadd.f32 %v3280_v40, %v3279_v51  ;;  %v5141_v32 = vpop.f32.mrf.mxu1 }
 0x1b2   : > { %v3282_v25 = vpop.f32.mrf.mxu0 }
 0x1b3   : > { %v5144_v60 = vadd.f32 %v3281_v37, %v5058_v0  ;;  %v5146_v59 = vpop.f32.mrf.mxu1 }
 0x1b4   : > { %v3283_v47 = vpop.f32.mrf.mxu0 }
 0x1b5   : > { %v3284_v50 = vadd.f32 %v3283_v47, %v3282_v25  ;;  %v3341_v30 = vpop.f32.mrf.mxu1 }
 0x1b6   : > { %v3285_v24 = vpop.f32.mrf.mxu0 }
 0x1b7   : > { %v5149_v63 = vadd.f32 %v3284_v50, %v5064_v35  ;;  %v5151_v19 = vpop.f32.mrf.mxu1 }
 0x1b8   : > { %v3286_v54 = vpop.f32.mrf.mxu0 }
 0x1b9   : > { %v3287_v55 = vadd.f32 %v3286_v54, %v3285_v24  ;;  %v5153_v26 = vpop.f32.mrf.mxu1 }
 0x1ba   : > { %v3288_v14 = vpop.f32.mrf.mxu0 }
 0x1bb   : > { %v5156_v61 = vadd.f32 %v3287_v55, %v5070_v44  ;;  %v5158_v0 = vpop.f32.mrf.mxu1 }
 0x1bc   : > { %v3289_v28 = vpop.f32.mrf.mxu0 }
 0x1bd   : > { %v3290_v34 = vadd.f32 %v3289_v28, %v3288_v14  ;;  %v5160_v41 = vpop.f32.mrf.mxu1 }
 0x1be   : > { %v3291_v18 = vpop.f32.mrf.mxu0 }
 0x1bf   : > { %v5163_v35 = vadd.f32 %v3290_v34, %v5076_v20  ;;  %v5165_v17 = vpop.f32.mrf.mxu1 }
 0x1c0   : > { %v3292_v7 = vpop.f32.mrf.mxu0 }
 0x1c1   : > { %v3293_v43 = vadd.f32 %v3292_v7, %v3291_v18  ;;  %v5167_v6 = vpop.f32.mrf.mxu1 }
 0x1c2   : > { %v3294_v52 = vpop.f32.mrf.mxu0 }
 0x1c3   : > { %v5170_v44 = vadd.f32 %v3293_v43, %v5082_v13  ;;  %v5172_v29 = vpop.f32.mrf.mxu1 }
 0x1c4   : > { %v3295_v33 = vpop.f32.mrf.mxu0 }
 0x1c5   : > { %v3296_v51 = vadd.f32 %v3295_v33, %v3294_v52  ;;  %v3353_v40 = vpop.f32.mrf.mxu1 }
 0x1c6   : > { %v3297_v37 = vpop.f32.mrf.mxu0 }
 0x1c7   : > { %v5175_v25 = vadd.f32 %v3296_v51, %v5088_v48  ;;  %v5177_v20 = vpop.f32.mrf.mxu1 }
 0x1c8   : > { %v3298_v47 = vpop.f32.mrf.mxu0 }
 0x1c9   : > { %v3299_v50 = vadd.f32 %v3298_v47, %v3297_v37  ;;  %v5179_v24 = vpop.f32.mrf.mxu1 }
 0x1ca   : > { %v3300_v54 = vpop.f32.mrf.mxu0 }
 0x1cb   : > { %v5182_v55 = vadd.f32 %v3299_v50, %v5094_v16  ;;  %v5184_v13 = vpop.f32.mrf.mxu1 }
 0x1cc   : > { %v3301_v14 = vpop.f32.mrf.mxu0 }
 0x1cd   : > { %5546 = vst [vmem:[#allocation13_spill] sm:$0xff] %v5182_v55  ;;  %v3302_v28 = vadd.f32 %v3301_v14, %v3300_v54  ;;  %v5186_v34 = vpop.f32.mrf.mxu1 }
 0x1ce   : > { %v3303_v18 = vpop.f32.mrf.mxu0 }
 0x1cf   : > { %v5189_v48 = vadd.f32 %v3302_v28, %v5100_v45  ;;  %v5191_v7 = vpop.f32.mrf.mxu1 }
 0x1d0   : > { %v3304_v43 = vpop.f32.mrf.mxu0 }
 0x1d1   : > { %5547 = vst [vmem:[#allocation10_spill] sm:$0xff] %v5189_v48  ;;  %v3305_v52 = vadd.f32 %v3304_v43, %v3303_v18  ;;  %v5193_v33 = vpop.f32.mrf.mxu1 }
 0x1d2   : > { %v3306_v51 = vpop.f32.mrf.mxu0 }
 0x1d3   : > { %v5196_v16 = vadd.f32 %v3305_v52, %v5106_v5  ;;  %v5198_v37 = vpop.f32.mrf.mxu1 }
 0x1d4   : > { %v3307_v47 = vpop.f32.mrf.mxu0 }
 0x1d5   : > { %5548 = vst [vmem:[#allocation8_spill] sm:$0xff] %v5196_v16  ;;  %v3308_v50 = vadd.f32 %v3307_v47, %v3306_v51  ;;  %v5200_v54 = vpop.f32.mrf.mxu1  ;;  %v2204_v16 = vld [vmem:[%s5224_s19 + $0x10] sm:$0xff] }
 0x1d6   : > { %v3309_v45 = vpop.f32.mrf.mxu0 }
 0x1d7   : > { %v5203_v14 = vadd.f32 %v3308_v50, %v5112_v23  ;;  %v5205_v28 = vpop.f32.mrf.mxu1  ;;  %v3342_v23 = vadd.f32 %v3341_v30, %v5146_v59  ;;  %v3345_v30 = vadd.f32 %v5153_v26, %v5151_v19  ;;  %v2202_v26 = vld [vmem:[%s5224_s19] sm:$0xff] }
 0x1d8   : > { %v3310_v18 = vpop.f32.mrf.mxu0 }
 0x1d9   : > { %5549 = vst [vmem:[#allocation9_spill] sm:$0xff] %v5203_v14  ;;  %v3311_v43 = vadd.f32 %v3310_v18, %v3309_v45  ;;  %v5207_v48 = vpop.f32.mrf.mxu1 }
 0x1da   : > { %v3312_v55 = vpop.f32.mrf.mxu0 }
 0x1db   : > { %v5210_v5 = vadd.f32 %v3311_v43, %v5118_v9  ;;  %v5212_v52 = vpop.f32.mrf.mxu1  ;;  %v3336_v9 = vadd.f32 %v5134_v49, %v5129_v10 }
 0x1dc   : > { %v3313_v51 = vpop.f32.mrf.mxu0 }
 0x1dd   : > { %5550 = vst [vmem:[#allocation11_spill] sm:$0xff] %v5210_v5  ;;  %v3314_v47 = vadd.f32 %v3313_v51, %v3312_v55  ;;  %v5219_v50 = vpop.f32.mrf.mxu1  ;;  %v1891_v51 = vadd.f32 %v3342_v23, %v5037_v15  ;;  %v2205_v23 = vld [vmem:[%s5224_s19 + $0x18] sm:$0xff] }
 0x1de   : > { %v3315_v14 = vpop.f32.mrf.mxu0 }
 0x1df   : > { %v5229_v45 = vadd.f32 %v3314_v47, %v5124_v56  ;;  %v5231_v18 = vpop.f32.mrf.mxu1  ;;  %v3339_v56 = vadd.f32 %v5141_v32, %v5139_v53  ;;  %v1894_v32 = vadd.f32 %v3345_v30, %v5043_v8 }
 0x1e0   : > { %v3316_v59 = vpop.f32.mrf.mxu0 }
 0x1e1   : > { %5551 = vst [vmem:[#allocation12_spill] sm:$0xff] %v5229_v45  ;;  %v3317_v55 = vadd.f32 %v3316_v59, %v3315_v14  ;;  %v5236_v43 = vpop.f32.mrf.mxu1  ;;  %v1883_v45 = vadd.f32 %v3336_v9, %v5025_v36  ;;  %v3354_v14 = vadd.f32 %v3353_v40, %v5172_v29  ;;  %v3348_v36 = vadd.f32 %v5160_v41, %v5158_v0 }
 0x1e2   : > { %v3472_v5 = vpop.f32.mrf.mxu0  ;;  %v1886_v8 = vadd.f32 %v3339_v56, %v5031_v57  ;;  %v3357_v0 = vadd.f32 %v5179_v24, %v5177_v20  ;;  %v3351_v57 = vadd.f32 %v5167_v6, %v5165_v17 }
 0x1e3   : > { %v5243_v10 = vadd.f32 %v3317_v55, %v5132_v2  ;;  %v5245_v49 = vpop.f32.mrf.mxu1  ;;  %v2052_v47 = vadd.f32 %v3472_v5, %v1891_v51  ;;  %v1907_v55 = vadd.f32 %v3354_v14, %v5061_v3  ;;  %v3366_v3 = vadd.f32 %v5200_v54, %v5198_v37 }
 0x1e4   : > { %v2043_v19 = vpop.f32.mrf.mxu0 }
 0x1e5   : > { %2172 = vst [vmem:[%s5250_s20 + $0x10] sm:$0xff] %v2052_v47  ;;  %v2236_v15 = vadd.f32 %v2204_v16, %v2052_v47  ;;  %v5253_v53 = vpop.f32.mrf.mxu1  ;;  %v2044_v2 = vadd.f32 %v2043_v19, %v1883_v45  ;;  %v2203_v45 = vld [vmem:[%s5224_s19 + $0x8] sm:$0xff]  ;;  %v2208_v47 = vld [vmem:[%s5224_s19 + $0x30] sm:$0xff]  ;;  %v1899_v19 = vadd.f32 %v3348_v36, %v5049_v4  ;;  %v3360_v4 = vadd.f32 %v5186_v34, %v5184_v13 }
 0x1e6   : > { %v3473_v5 = vpop.f32.mrf.mxu0  ;;  %v1902_v36 = vadd.f32 %v3351_v57, %v5055_v27  ;;  %v3363_v27 = vadd.f32 %v5193_v33, %v5191_v7 }
 0x1e7   : > { %2268 = vst [vmem:[%s5259_s21 + $0x10] sm:$0xff] %v2236_v15  ;;  %2170 = vst [vmem:[%s5250_s20] sm:$0xff] %v2044_v2  ;;  %v2234_v29 = vadd.f32 %v2202_v26, %v2044_v2  ;;  %v5263_v40 = vpop.f32.mrf.mxu1  ;;  %v2055_v16 = vadd.f32 %v3473_v5, %v1894_v32  ;;  %v2206_v15 = vld [vmem:[%s5224_s19 + $0x20] sm:$0xff]  ;;  %v1910_v2 = vadd.f32 %v3357_v0, %v5067_v12  ;;  %v2209_v5 = vld [vmem:[%s5224_s19 + $0x38] sm:$0xff] }
 0x1e8   : > { %v2046_v9 = vpop.f32.mrf.mxu0  ;;  %v3369_v12 = vadd.f32 %v5207_v48, %v5205_v28  ;;  %v2212_v0 = vld [vmem:[%s5224_s19 + $0x50] sm:$0xff] }
 0x1e9   : > { %2266 = vst [vmem:[%s5259_s21] sm:$0xff] %v2234_v29  ;;  %2173 = vst [vmem:[%s5250_s20 + $0x18] sm:$0xff] %v2055_v16  ;;  %v2237_v41 = vadd.f32 %v2205_v23, %v2055_v16  ;;  %v5271_v59 = vpop.f32.mrf.mxu1  ;;  %v2047_v30 = vadd.f32 %v2046_v9, %v1886_v8  ;;  %v2207_v16 = vld [vmem:[%s5224_s19 + $0x28] sm:$0xff]  ;;  %v1923_v9 = vadd.f32 %v3366_v3, %v5085_v22 }
 0x1ea   : > { %v3476_v51 = vpop.f32.mrf.mxu0  ;;  %v3378_v22 = vadd.f32 %v5253_v53, %v5245_v49  ;;  %v1926_v57 = vadd.f32 %v3369_v12, %v5091_v21  ;;  %v2211_v3 = vld [vmem:[%s5224_s19 + $0x48] sm:$0xff]  ;;  %v3381_v21 = vadd.f32 %v5271_v59, %v5263_v40  ;;  %v2217_v12 = vld [vmem:[%s5224_s19 + $0x78] sm:$0xff] }
 0x1eb   : > { %2269 = vst [vmem:[%s5259_s21 + $0x18] sm:$0xff] %v2237_v41  ;;  %2171 = vst [vmem:[%s5250_s20 + $0x8] sm:$0xff] %v2047_v30  ;;  %v2235_v20 = vadd.f32 %v2203_v45, %v2047_v30  ;;  %v5279_v24 = vpop.f32.mrf.mxu1  ;;  %v2068_v56 = vadd.f32 %v3476_v51, %v1907_v55  ;;  %v1915_v30 = vadd.f32 %v3360_v4, %v5073_v58  ;;  %v2210_v51 = vld [vmem:[%s5224_s19 + $0x40] sm:$0xff] }
 0x1ec   : > { %v2059_v26 = vpop.f32.mrf.mxu0  ;;  %v3372_v58 = vadd.f32 %v5219_v50, %v5212_v52 }
 0x1ed   : > { %2267 = vst [vmem:[%s5259_s21 + $0x8] sm:$0xff] %v2235_v20  ;;  %2176 = vst [vmem:[%s5250_s20 + $0x30] sm:$0xff] %v2068_v56  ;;  %v2240_v17 = vadd.f32 %v2208_v47, %v2068_v56  ;;  %v5287_v6 = vpop.f32.mrf.mxu1  ;;  %v2060_v14 = vadd.f32 %v2059_v26, %v1899_v19  ;;  %v2213_v56 = vld [vmem:[%s5224_s19 + $0x58] sm:$0xff]  ;;  %v1918_v26 = vadd.f32 %v3363_v27, %v5079_v1  ;;  %v2215_v27 = vld [vmem:[%s5224_s19 + $0x68] sm:$0xff] }
 0x1ee   : > { %v3477_v32 = vpop.f32.mrf.mxu0  ;;  %v3375_v1 = vadd.f32 %v5236_v43, %v5231_v18  ;;  %v1931_v4 = vadd.f32 %v3372_v58, %v5097_v46  ;;  %v1942_v43 = vadd.f32 %v3381_v21, %v5115_v62  ;;  %v2221_v58 = vld [vmem:[%s5224_s19 + $0x98] sm:$0xff] }
 0x1ef   : > { %2272 = vst [vmem:[%s5259_s21 + $0x30] sm:$0xff] %v2240_v17  ;;  %2174 = vst [vmem:[%s5250_s20 + $0x20] sm:$0xff] %v2060_v14  ;;  %v2238_v37 = vadd.f32 %v2206_v15, %v2060_v14  ;;  %v5295_v54 = vpop.f32.mrf.mxu1  ;;  %v2071_v23 = vadd.f32 %v3477_v32, %v1910_v2  ;;  %v1939_v14 = vadd.f32 %v3378_v22, %v5109_v39  ;;  %v2216_v32 = vld [vmem:[%s5224_s19 + $0x70] sm:$0xff] }
 0x1f0   : > { %v2062_v29 = vpop.f32.mrf.mxu0 }
 0x1f1   : > { %2270 = vst [vmem:[%s5259_s21 + $0x20] sm:$0xff] %v2238_v37  ;;  %2177 = vst [vmem:[%s5250_s20 + $0x38] sm:$0xff] %v2071_v23  ;;  %v2241_v13 = vadd.f32 %v2209_v5, %v2071_v23  ;;  %v5303_v34 = vpop.f32.mrf.mxu1  ;;  %v2063_v8 = vadd.f32 %v2062_v29, %v1902_v36  ;;  %v2214_v23 = vld [vmem:[%s5224_s19 + $0x60] sm:$0xff] }
 0x1f2   : > { %v3480_v45 = vpop.f32.mrf.mxu0 }
 0x1f3   : > { %2273 = vst [vmem:[%s5259_s21 + $0x38] sm:$0xff] %v2241_v13  ;;  %2175 = vst [vmem:[%s5250_s20 + $0x28] sm:$0xff] %v2063_v8  ;;  %v2239_v48 = vadd.f32 %v2207_v16, %v2063_v8  ;;  %v3388_v28 = vpop.f32.mrf.mxu1  ;;  %v2084_v41 = vadd.f32 %v3480_v45, %v1923_v9  ;;  %v3384_v13 = vadd.f32 %v5287_v6, %v5279_v24 }
 0x1f4   : > { %v2075_v55 = vpop.f32.mrf.mxu0  ;;  %v1934_v45 = vadd.f32 %v3375_v1, %v5103_v42 }
 0x1f5   : > { %2271 = vst [vmem:[%s5259_s21 + $0x28] sm:$0xff] %v2239_v48  ;;  %2180 = vst [vmem:[%s5250_s20 + $0x50] sm:$0xff] %v2084_v41  ;;  %v2244_v47 = vadd.f32 %v2212_v0, %v2084_v41  ;;  %v3389_v7 = vpop.f32.mrf.mxu1  ;;  %v2076_v33 = vadd.f32 %v2075_v55, %v1915_v30  ;;  %v2220_v30 = vld [vmem:[%s5224_s19 + $0x90] sm:$0xff]  ;;  %v3387_v55 = vadd.f32 %v5303_v34, %v5295_v54 }
 0x1f6   : > { %v3481_v20 = vpop.f32.mrf.mxu0  ;;  %v3390_v36 = vadd.f32 %v3389_v7, %v3388_v28 }
 0x1f7   : > { %2276 = vst [vmem:[%s5259_s21 + $0x50] sm:$0xff] %v2244_v47  ;;  %2178 = vst [vmem:[%s5250_s20 + $0x40] sm:$0xff] %v2076_v33  ;;  %v2242_v19 = vadd.f32 %v2210_v51, %v2076_v33  ;;  %v3391_v49 = vpop.f32.mrf.mxu1  ;;  %v2087_v53 = vadd.f32 %v3481_v20, %v1926_v57  ;;  %v1947_v47 = vadd.f32 %v3384_v13, %v5121_v38  ;;  %v2218_v33 = vld [vmem:[%s5224_s19 + $0x80] sm:$0xff] }
 0x1f8   : > { %v2078_v15 = vpop.f32.mrf.mxu0  ;;  %v1955_v28 = vadd.f32 %v3390_v36, %v5137_v31 }
 0x1f9   : > { %2274 = vst [vmem:[%s5259_s21 + $0x40] sm:$0xff] %v2242_v19  ;;  %2181 = vst [vmem:[%s5250_s20 + $0x58] sm:$0xff] %v2087_v53  ;;  %v2245_v17 = vadd.f32 %v2213_v56, %v2087_v53  ;;  %v3392_v52 = vpop.f32.mrf.mxu1  ;;  %v2079_v50 = vadd.f32 %v2078_v15, %v1918_v26  ;;  %v1950_v26 = vadd.f32 %v3387_v55, %v5127_v11 }
 0x1fa   : > { %v3484_v2 = vpop.f32.mrf.mxu0  ;;  %v3393_v48 = vadd.f32 %v3392_v52, %v3391_v49 }
 0x1fb   : > { %2277 = vst [vmem:[%s5259_s21 + $0x58] sm:$0xff] %v2245_v17  ;;  %2179 = vst [vmem:[%s5250_s20 + $0x48] sm:$0xff] %v2079_v50  ;;  %v2243_v5 = vadd.f32 %v2211_v3, %v2079_v50  ;;  %v3394_v40 = vpop.f32.mrf.mxu1  ;;  %v2100_v59 = vadd.f32 %v3484_v2, %v1939_v14  ;;  %v2219_v3 = vld [vmem:[%s5224_s19 + $0x88] sm:$0xff]  ;;  %v2224_v2 = vld [vmem:[%s5224_s19 + $0xb0] sm:$0xff] }
 0x1fc   : > { %v2091_v37 = vpop.f32.mrf.mxu0  ;;  %v1958_v34 = vadd.f32 %v3393_v48, %v5144_v60 }
 0x1fd   : > { %2275 = vst [vmem:[%s5259_s21 + $0x48] sm:$0xff] %v2243_v5  ;;  %2184 = vst [vmem:[%s5250_s20 + $0x70] sm:$0xff] %v2100_v59  ;;  %v2248_v39 = vadd.f32 %v2216_v32, %v2100_v59  ;;  %v3395_v29 = vpop.f32.mrf.mxu1  ;;  %v2092_v18 = vadd.f32 %v2091_v37, %v1931_v4  ;;  %v2222_v4 = vld [vmem:[%s5224_s19 + $0xa0] sm:$0xff] }
 0x1fe   : > { %v3485_v16 = vpop.f32.mrf.mxu0  ;;  %v3396_v19 = vadd.f32 %v3395_v29, %v3394_v40  ;;  %v2225_v29 = vld [vmem:[%s5224_s19 + $0xb8] sm:$0xff] }
 0x1ff   : > { %2280 = vst [vmem:[%s5259_s21 + $0x70] sm:$0xff] %v2248_v39  ;;  %2182 = vst [vmem:[%s5250_s20 + $0x60] sm:$0xff] %v2092_v18  ;;  %v2246_v46 = vadd.f32 %v2214_v23, %v2092_v18  ;;  %v3397_v8 = vpop.f32.mrf.mxu1  ;;  %v2103_v9 = vadd.f32 %v3485_v16, %v1942_v43 }
 0x200   : > { %v2094_v0 = vpop.f32.mrf.mxu0  ;;  %v1963_v40 = vadd.f32 %v3396_v19, %v5149_v63 }
 0x201   : > { %2278 = vst [vmem:[%s5259_s21 + $0x60] sm:$0xff] %v2246_v46  ;;  %2185 = vst [vmem:[%s5250_s20 + $0x78] sm:$0xff] %v2103_v9  ;;  %v2249_v62 = vadd.f32 %v2217_v12, %v2103_v9  ;;  %v3398_v24 = vpop.f32.mrf.mxu1  ;;  %v2095_v6 = vadd.f32 %v2094_v0, %v1934_v45  ;;  %v2223_v46 = vld [vmem:[%s5224_s19 + $0xa8] sm:$0xff] }
 0x202   : > { %v3488_v41 = vpop.f32.mrf.mxu0  ;;  %v3399_v32 = vadd.f32 %v3398_v24, %v3397_v8  ;;  %v2226_v24 = vld [vmem:[%s5224_s19 + $0xc0] sm:$0xff] }
 0x203   : > { %2281 = vst [vmem:[%s5259_s21 + $0x78] sm:$0xff] %v2249_v62  ;;  %2183 = vst [vmem:[%s5250_s20 + $0x68] sm:$0xff] %v2095_v6  ;;  %v2247_v42 = vadd.f32 %v2215_v27, %v2095_v6  ;;  %v3400_v51 = vpop.f32.mrf.mxu1  ;;  %v2116_v22 = vadd.f32 %v3488_v41, %v1955_v28 }
 0x204   : > { %v2107_v7 = vpop.f32.mrf.mxu0  ;;  %v1966_v12 = vadd.f32 %v3399_v32, %v5156_v61 }
 0x205   : > { %2279 = vst [vmem:[%s5259_s21 + $0x68] sm:$0xff] %v2247_v42  ;;  %2188 = vst [vmem:[%s5250_s20 + $0x90] sm:$0xff] %v2116_v22  ;;  %v2252_v31 = vadd.f32 %v2220_v30, %v2116_v22  ;;  %v3401_v57 = vpop.f32.mrf.mxu1  ;;  %v2108_v54 = vadd.f32 %v2107_v7, %v1947_v47  ;;  %v5553_v47 = vld [vmem:[#allocation10_spill] sm:$0xff] }
 0x206   : > { %v3402_v20 = vadd.f32 %v3401_v57, %v3400_v51  ;;  %v3489_v56 = vpop.f32.mrf.mxu0  ;;  %v5552_v51 = vld [vmem:[#allocation13_spill] sm:$0xff] }
 0x207   : > { %2284 = vst [vmem:[%s5259_s21 + $0x90] sm:$0xff] %v2252_v31  ;;  %2186 = vst [vmem:[%s5250_s20 + $0x80] sm:$0xff] %v2108_v54  ;;  %v2250_v38 = vadd.f32 %v2218_v33, %v2108_v54  ;;  %v3403_v49 = vpop.f32.mrf.mxu1  ;;  %v2119_v53 = vadd.f32 %v3489_v56, %v1958_v34  ;;  %v2228_v31 = vld [vmem:[%s5224_s19 + $0xd0] sm:$0xff] }
 0x208   : > { %v2110_v15 = vpop.f32.mrf.mxu0  ;;  %v1971_v52 = vadd.f32 %v3402_v20, %v5163_v35 }
 0x209   : > { %2282 = vst [vmem:[%s5259_s21 + $0x80] sm:$0xff] %v2250_v38  ;;  %2189 = vst [vmem:[%s5250_s20 + $0x98] sm:$0xff] %v2119_v53  ;;  %v2253_v60 = vadd.f32 %v2221_v58, %v2119_v53  ;;  %v3404_v21 = vpop.f32.mrf.mxu1  ;;  %v2111_v17 = vadd.f32 %v2110_v15, %v1950_v26  ;;  %v2229_v15 = vld [vmem:[%s5224_s19 + $0xd8] sm:$0xff] }
 0x20a   : > { %v3405_v50 = vadd.f32 %v3404_v21, %v3403_v49  ;;  %v3492_v14 = vpop.f32.mrf.mxu0  ;;  %v5554_v49 = vld [vmem:[#allocation8_spill] sm:$0xff] }
 0x20b   : > { %2285 = vst [vmem:[%s5259_s21 + $0x98] sm:$0xff] %v2253_v60  ;;  %2187 = vst [vmem:[%s5250_s20 + $0x88] sm:$0xff] %v2111_v17  ;;  %v2251_v11 = vadd.f32 %v2219_v3, %v2111_v17  ;;  %v3406_v1 = vpop.f32.mrf.mxu1  ;;  %v2132_v5 = vadd.f32 %v3492_v14, %v1971_v52  ;;  %v5555_v14 = vld [vmem:[#allocation9_spill] sm:$0xff] }
 0x20c   : > { %v2123_v59 = vpop.f32.mrf.mxu0  ;;  %v1974_v36 = vadd.f32 %v3405_v50, %v5170_v44 }
 0x20d   : > { %2283 = vst [vmem:[%s5259_s21 + $0x88] sm:$0xff] %v2251_v11  ;;  %2192 = vst [vmem:[%s5250_s20 + $0xb0] sm:$0xff] %v2132_v5  ;;  %v2256_v35 = vadd.f32 %v2224_v2, %v2132_v5  ;;  %v3407_v37 = vpop.f32.mrf.mxu1  ;;  %v2124_v23 = vadd.f32 %v2123_v59, %v1963_v40  ;;  %v2230_v11 = vld [vmem:[%s5224_s19 + $0xe0] sm:$0xff] }
 0x20e   : > { %v3493_v39 = vpop.f32.mrf.mxu0  ;;  %v3408_v18 = vadd.f32 %v3407_v37, %v3406_v1 }
 0x20f   : > { %2288 = vst [vmem:[%s5259_s21 + $0xb0] sm:$0xff] %v2256_v35  ;;  %2190 = vst [vmem:[%s5250_s20 + $0xa0] sm:$0xff] %v2124_v23  ;;  %v2254_v63 = vadd.f32 %v2222_v4, %v2124_v23  ;;  %v3409_v43 = vpop.f32.mrf.mxu1  ;;  %v2135_v16 = vadd.f32 %v3493_v39, %v1974_v36  ;;  %v5556_v35 = vld [vmem:[#allocation11_spill] sm:$0xff]  ;;  %v2231_v36 = vld [vmem:[%s5224_s19 + $0xe8] sm:$0xff] }
 0x210   : > { %v2126_v13 = vpop.f32.mrf.mxu0  ;;  %v1979_v61 = vadd.f32 %v3408_v18, %v5175_v25  ;;  %v2227_v25 = vld [vmem:[%s5224_s19 + $0xc8] sm:$0xff] }
 0x211   : > { %2286 = vst [vmem:[%s5259_s21 + $0xa0] sm:$0xff] %v2254_v63  ;;  %2193 = vst [vmem:[%s5250_s20 + $0xb8] sm:$0xff] %v2135_v16  ;;  %v2257_v8 = vadd.f32 %v2225_v29, %v2135_v16  ;;  %v3410_v44 = vpop.f32.mrf.mxu1  ;;  %v2127_v9 = vadd.f32 %v2126_v13, %v1966_v12  ;;  %v5557_v63 = vld [vmem:[#allocation12_spill] sm:$0xff]  ;;  %v2232_v12 = vld [vmem:[%s5224_s19 + $0xf0] sm:$0xff] }
 0x212   : > { %v3496_v45 = vpop.f32.mrf.mxu0  ;;  %v3411_v0 = vadd.f32 %v3410_v44, %v3409_v43 }
 0x213   : > { %2289 = vst [vmem:[%s5259_s21 + $0xb8] sm:$0xff] %v2257_v8  ;;  %2191 = vst [vmem:[%s5250_s20 + $0xa8] sm:$0xff] %v2127_v9  ;;  %v2255_v27 = vadd.f32 %v2223_v46, %v2127_v9  ;;  %v3412_v48 = vpop.f32.mrf.mxu1 }
 0x214   : > { %v2139_v62 = vpop.f32.mrf.mxu0  ;;  %v1982_v22 = vadd.f32 %v3411_v0, %v5552_v51 }
 0x215   : > { %2287 = vst [vmem:[%s5259_s21 + $0xa8] sm:$0xff] %v2255_v27  ;;  %v3413_v6 = vpop.f32.mrf.mxu1  ;;  %v2140_v28 = vadd.f32 %v2139_v62, %v1979_v61 }
 0x216   : > { %v3414_v41 = vadd.f32 %v3413_v6, %v3412_v48  ;;  %v3497_v30 = vpop.f32.mrf.mxu0 }
 0x217   : > { %2194 = vst [vmem:[%s5250_s20 + $0xc0] sm:$0xff] %v2140_v28  ;;  %v2258_v55 = vadd.f32 %v2226_v24, %v2140_v28  ;;  %v3415_v42 = vpop.f32.mrf.mxu1 }
 0x218   : > { %v1987_v7 = vadd.f32 %v3414_v41, %v5553_v47  ;;  %v2142_v33 = vpop.f32.mrf.mxu0 }
 0x219   : > { %2290 = vst [vmem:[%s5259_s21 + $0xc0] sm:$0xff] %v2258_v55  ;;  %v3416_v57 = vpop.f32.mrf.mxu1  ;;  %v2143_v54 = vadd.f32 %v2142_v33, %v1982_v22 }
 0x21a   : > { %v2148_v34 = vadd.f32 %v3496_v45, %v1987_v7  ;;  %v3417_v20 = vadd.f32 %v3416_v57, %v3415_v42  ;;  %v3500_v56 = vpop.f32.mrf.mxu0  ;;  %v2233_v45 = vld [vmem:[%s5224_s19 + $0xf8] sm:$0xff] }
 0x21b   : > { %2195 = vst [vmem:[%s5250_s20 + $0xc8] sm:$0xff] %v2143_v54  ;;  %v2259_v58 = vadd.f32 %v2227_v25, %v2143_v54  ;;  %v3418_v19 = vpop.f32.mrf.mxu1 }
 0x21c   : > { %2196 = vst [vmem:[%s5250_s20 + $0xd0] sm:$0xff] %v2148_v34  ;;  %v2260_v38 = vadd.f32 %v2228_v31, %v2148_v34  ;;  %v1990_v53 = vadd.f32 %v3417_v20, %v5554_v49  ;;  %v2155_v26 = vpop.f32.mrf.mxu0 }
 0x21d   : > { %2291 = vst [vmem:[%s5259_s21 + $0xc8] sm:$0xff] %v2259_v58  ;;  %v3419_v3 = vpop.f32.mrf.mxu1 }
 0x21e   : > { %2292 = vst [vmem:[%s5259_s21 + $0xd0] sm:$0xff] %v2260_v38  ;;  %v2151_v60 = vadd.f32 %v3497_v30, %v1990_v53  ;;  %v3420_v21 = vadd.f32 %v3419_v3, %v3418_v19  ;;  %v3501_v52 = vpop.f32.mrf.mxu0 }
 0x21f   : > { %v3421_v17 = vpop.f32.mrf.mxu1 }
 0x220   : > { %2197 = vst [vmem:[%s5250_s20 + $0xd8] sm:$0xff] %v2151_v60  ;;  %v2261_v50 = vadd.f32 %v2229_v15, %v2151_v60  ;;  %v1995_v2 = vadd.f32 %v3420_v21, %v5555_v14  ;;  %v2158_v59 = vpop.f32.mrf.mxu0 }
 0x221   : > { %v3422_v32 = vpop.f32.mrf.mxu1 }
 0x222   : > { %2293 = vst [vmem:[%s5259_s21 + $0xd8] sm:$0xff] %v2261_v50  ;;  %v3423_v1 = vadd.f32 %v3422_v32, %v3421_v17  ;;  %v2156_v5 = vadd.f32 %v2155_v26, %v1995_v2 }
 0x223   : > { %v3424_v40 = vpop.f32.mrf.mxu1 }
 0x224   : > { %2198 = vst [vmem:[%s5250_s20 + $0xe0] sm:$0xff] %v2156_v5  ;;  %v2262_v4 = vadd.f32 %v2230_v11, %v2156_v5  ;;  %v1998_v37 = vadd.f32 %v3423_v1, %v5556_v35 }
 0x225   : > { %v3425_v23 = vpop.f32.mrf.mxu1 }
 0x226   : > { %2294 = vst [vmem:[%s5259_s21 + $0xe0] sm:$0xff] %v2262_v4  ;;  %v3426_v39 = vadd.f32 %v3425_v23, %v3424_v40  ;;  %v2159_v29 = vadd.f32 %v2158_v59, %v1998_v37 }
 0x227   : > { %v3427_v18 = vpop.f32.mrf.mxu1 }
 0x228   : > { %v2003_v43 = vadd.f32 %v3426_v39, %v5557_v63  ;;  %2199 = vst [vmem:[%s5250_s20 + $0xe8] sm:$0xff] %v2159_v29  ;;  %v2263_v16 = vadd.f32 %v2231_v36, %v2159_v29 }
 0x229   : > { %v3428_v13 = vpop.f32.mrf.mxu1 }
 0x22a   : > { %v2164_v46 = vadd.f32 %v3500_v56, %v2003_v43  ;;  %2295 = vst [vmem:[%s5259_s21 + $0xe8] sm:$0xff] %v2263_v16  ;;  %v3429_v8 = vadd.f32 %v3428_v13, %v3427_v18 }
 0x22c   : > { %2200 = vst [vmem:[%s5250_s20 + $0xf0] sm:$0xff] %v2164_v46  ;;  %v2264_v44 = vadd.f32 %v2232_v12, %v2164_v46  ;;  %v2006_v9 = vadd.f32 %v3429_v8, %v5243_v10 }
 0x22e   : > { %2296 = vst [vmem:[%s5259_s21 + $0xf0] sm:$0xff] %v2264_v44  ;;  %v2167_v0 = vadd.f32 %v3501_v52, %v2006_v9 }
 0x230   : > { %2201 = vst [vmem:[%s5250_s20 + $0xf8] sm:$0xff] %v2167_v0  ;;  %v2265_v27 = vadd.f32 %v2233_v45, %v2167_v0 }
 0x231   : > { %3653 = shalt.err (!%p3650_p3)
}
 0x232   : > { %s3654_s20 = scalar_lea.hbm %s5422_s26, 4096  ;;  %s3658_s12 = scalar_lea.hbm %s5510_s8, 8192 }
 0x233   : > { %p3655_p4 = scmp.ne.s32.totalorder %s5422_s26, %s3654_s20  ;;  %p3659_p9 = scmp.lt.s32.totalorder %s5422_s26, %s5510_s8 }
 0x234   : > { %p3660_p10 = scmp.lt.s32.totalorder %s3658_s12, %s3654_s20 }
 0x235   : > { %p3656_p7 = pnand %p3655_p4, %p3821_p5 }
 0x236   : > { %p3661_p11 = por %p3660_p10, %p3659_p9 }
 0x237   : > { %p3657_p8 = pneg %p3656_p7 }
 0x239   : > { %p3662_p12 = pnand %p3661_p11, %p3657_p8 }
 0x23b   : > { %3665 = shalt.err (!%p3662_p12)
}
 0x23c   : > { %s3735_s0 = smov 128   ;;  %s3736_s18 = smov 8   ;;  %2297 = vst [vmem:[%s5259_s21 + $0xf8] sm:$0xff] %v2265_v27 }
 0x23d   : > { %s5558_s19 = scalar_lea.sflag [#allocation5], %s5216_s10  ;;  %s2299_s25 = scalar_lea.sflag [#allocation3], %s5216_s10 }
 0x23e   : > { %3519 = dma.vmem_to_hbm [thread:$0]  (%p3821_p5), %s5424_s23, 4096, %s5422_s26, %s5558_s19, %s3735_s0, %s3735_s0, %s3736_s18  }
 0x23f   : > { %s3666_s20 = scalar_lea.vmem %s5432_s24, 4096  ;;  %s3737_s22 = smov [#allocation2]  }
 0x240   : > { %p3667_p13 = scmp.ne.s32.totalorder %s5432_s24, %s3666_s20  ;;  %s3670_s9 = sshll.u32 %s3737_s22, 4  ;;  %s3671_s9 = int_to_ptr.vmem [resolvable:$false] %s3670_s9 }
 0x241   : > { %s3672_s12 = scalar_lea.vmem %s3671_s9, 8192  ;;  %p3673_p2 = scmp.lt.s32.totalorder %s5432_s24, %s3671_s9 }
 0x242   : > { %p3668_p0 = pnand %p3667_p13, %p3821_p5  ;;  %p3674_p3 = scmp.lt.s32.totalorder %s3672_s12, %s3666_s20 }
 0x244   : > { %p3669_p1 = pneg %p3668_p0  ;;  %p3675_p4 = por %p3674_p3, %p3673_p2 }
 0x246   : > { %p3676_p7 = pnand %p3675_p4, %p3669_p1 }
 0x248   : > { %3679 = shalt.err (!%p3676_p7)
}
 0x249   : > { %s3680_s21 = scalar_lea.hbm %s5430_s13, 4096  ;;  %s3684_s26 = scalar_lea.hbm %s5509_s7, 8192 }
 0x24a   : > { %p3681_p8 = scmp.ne.s32.totalorder %s5430_s13, %s3680_s21  ;;  %p3685_p11 = scmp.lt.s32.totalorder %s5430_s13, %s5509_s7 }
 0x24b   : > { %p3686_p12 = scmp.lt.s32.totalorder %s3684_s26, %s3680_s21 }
 0x24c   : > { %p3682_p9 = pnand %p3681_p8, %p3821_p5 }
 0x24d   : > { %p3687_p13 = por %p3686_p12, %p3685_p11 }
 0x24e   : > { %p3683_p10 = pneg %p3682_p9 }
 0x250   : > { %p3688_p0 = pnand %p3687_p13, %p3683_p10 }
 0x252   : > { %3691 = shalt.err (!%p3688_p0)
}
 0x253   : > { %3518 = dma.vmem_to_hbm [thread:$0]  (%p3821_p5), %s5432_s24, 4096, %s5430_s13, %s2299_s25, %s3735_s0, %s3735_s0, %s3736_s18  }
 0x254 PF: > { %p3529_p1 = scmp.ge.s32.totalorder %s3730_s30, 2  ;;  %s2348_s20 = sand.u32 1, %s3718_s27  }
 0x255   : > { %s2349_s22 = scalar_lea.sflag [#allocation3], %s2348_s20 }
 0x256   : > { %p3523_p2 = pnand %p3529_p1, %p3825_p6 }
 0x258   : > { %p3524_p3 = pneg %p3523_p2 }
 0x25a   : > { %3709 = dma.done.wait (%p3524_p3), %s2349_s22, 4096  }
 0x25b   : > { %3711 = vsyncadd (%p3524_p3), %s2349_s22, 4294963200  ;;  %s2358_s9 = scalar_lea.sflag [#allocation5], %s2348_s20 }
 0x25c   : > { %3713 = dma.done.wait (%p3524_p3), %s2358_s9, 4096  }
 0x25d   : > { %3715 = vsyncadd (%p3524_p3), %s2358_s9, 4294963200  ;;  %p22_p5 = scmp.ge.s32.totalorder %s3808_s11, 4   ;;  %s5559_s27 = smov %s3722_s28 }
 0x25e   : > { %s5560_s28 = smov %s3726_s29  ;;  %s5561_s29 = smov %s3819_s14 }
 0x25f   : > { %s5562_s30 = smov %s3808_s11  ;;  %24 = sbr.rel (!%p22_p5) target bundleno = 7 (0x7), region = 103 }
 0x264   :  { %2363 = vsyncpa [#allocation3], 1 }
 0x265   :  { %2365 = vsyncpa [#allocation3 + $0x1], 1 }
 0x266   :  { %2366 = vsyncpa [#allocation5], 1 }
 0x267   :  { %2368 = vsyncpa [#allocation5 + $0x1], 1 }

</bundles_post_ra>
